<compile_context>
chip_gen: v7x
topology: tpu7x:2x2x1
jax: 0.10.0
libtpu: 0.0.40
codegen_flags: <defaults>
</compile_context>

<pallas_src>
import functools

import numpy as np
import jax
import jax.numpy as jnp
from jax.experimental import pallas as pl
from jax.experimental.pallas import tpu as pltpu


_H = _W = 16
_HW = _H * _W
_CIN_PAD = 8          # input channels padded 3 -> 8: every im2col chunk is 8-row aligned

# Row offsets of each layer inside the packed weight / bias slabs.
_ROW = {"enc1a": 0, "enc1b": 8, "enc2a": 16, "enc2b": 32, "botta": 48,
        "bottb": 80, "dec2a": 112, "dec2b": 128, "dec1a": 144, "dec1b": 152,
        "head": 160}
_SLAB_ROWS = 168      # 163 used rows, padded to a multiple of 8
_SLAB_COLS = 512      # max K = 9 * 48 = 432, padded to a multiple of 128

# Mask-slab row bases: 9 conv boundary masks per dilation level, then 4 parity
# masks per upsample level.
_CMASK_BASE = {1: 0, 2: 9, 4: 18}
_UMASK_BASE = {2: 27, 1: 31}
_MASK_ROWS = 40       # 35 used rows, padded to a multiple of 8


# -----------------------------------------------------------------------------
# Parameters (deterministic He-normal init), HWIO conv weight layout (3,3,Cin,Cout)
# -----------------------------------------------------------------------------
def init_params(key, in_ch=3, num_classes=3):
    layers = [
        ("enc1a", in_ch, 8), ("enc1b", 8, 8),
        ("enc2a", 8, 16),    ("enc2b", 16, 16),
        ("botta", 16, 32),   ("bottb", 32, 32),
        ("dec2a", 32 + 16, 16), ("dec2b", 16, 16),
        ("dec1a", 16 + 8, 8),   ("dec1b", 8, 8),
        ("head", 8, num_classes),
    ]
    params = {}
    for name, cin, cout in layers:
        key, wk, bk = jax.random.split(key, 3)
        std = (2.0 / (9.0 * cin)) ** 0.5
        w = std * jax.random.normal(wk, (3, 3, cin, cout), jnp.float32)
        b = 0.1 * jax.random.normal(bk, (cout,), jnp.float32)
        params[name] = (w, b)
    return params


# -----------------------------------------------------------------------------
# Host-side packing: one bf16 weight slab, one f32 bias slab, one f32 mask slab
# -----------------------------------------------------------------------------
def _pack_params(params, in_ch, num_classes):
    assert in_ch <= _CIN_PAD and num_classes <= 8

    def flat(w):
        # (3,3,cin,cout) -> (cout, 9*cin); column order = (tap, cin), matching
        # the in-kernel im2col row order (tap t = kh*3 + kw).
        cin, cout = w.shape[2], w.shape[3]
        return np.asarray(w, np.float32).reshape(9 * cin, cout).T

    w_slab = np.zeros((_SLAB_ROWS, _SLAB_COLS), np.float32)
    b_slab = np.zeros((_SLAB_ROWS, 1), np.float32)

    def put(name, wf, bias):
        r = _ROW[name]
        w_slab[r:r + wf.shape[0], :wf.shape[1]] = wf
        b_slab[r:r + wf.shape[0], 0] = np.asarray(bias, np.float32)

    # First conv: zero-pad the input channels 3 -> 8.
    w, bias = params["enc1a"]
    w = np.pad(np.asarray(w, np.float32),
               ((0, 0), (0, 0), (0, _CIN_PAD - in_ch), (0, 0)))
    put("enc1a", flat(w), bias)

    for name in ("enc1b", "enc2a", "enc2b", "botta", "bottb",
                 "dec2b", "dec1b", "head"):
        w, bias = params[name]
        put(name, flat(w), bias)

    # Decoder first convs see concat([upsampled, skip]); split the weight so the
    # kernel can build its im2col as [up taps | skip taps] (no channel concat).
    for name, c_up in (("dec2a", 32), ("dec1a", 16)):
        w, bias = params[name]
        w = np.asarray(w, np.float32)
        wf = np.concatenate([flat(w[:, :, :c_up, :]), flat(w[:, :, c_up:, :])],
                            axis=1)
        put(name, wf, bias)

    return jnp.asarray(w_slab, jnp.bfloat16), jnp.asarray(b_slab, jnp.float32)


def _mask_slab(imgs_per_step):
    """(40, B*256) f32: 0/1 boundary masks per dilation + upsample parity masks."""
    ys, xs = np.divmod(np.arange(_HW), _W)
    rows = []
    # 3x3 boundary masks at each dilation (16x16 / 8x8 / 4x4 levels on the
    # dilated 16x16 grid).
    for dil in (1, 2, 4):
        for t in range(9):
            dy, dx = t // 3 - 1, t % 3 - 1
            ok = ((ys + dil * dy >= 0) & (ys + dil * dy < _H) &
                  (xs + dil * dx >= 0) & (xs + dil * dx < _W))
            rows.append(ok)
    # Parity masks for nearest 2x upsample onto dilation-2 then dilation-1 grids.
    for dil_out in (2, 1):
        ay = (ys // dil_out) % 2
        ax = (xs // dil_out) % 2
        for a0, a1 in ((0, 0), (0, 1), (1, 0), (1, 1)):
            rows.append((ay == a0) & (ax == a1))
    m = np.stack(rows, axis=0).astype(np.float32)            # (35, 256)
    m = np.tile(m, (1, imgs_per_step))                        # (35, B*256)
    m = np.pad(m, ((0, _MASK_ROWS - m.shape[0]), (0, 0)))
    return jnp.asarray(m, jnp.float32)


def _pick_images_per_step(n):
    # Keep >= 2 grid steps when possible (v7x has 2 TensorCores) and cap the
    # per-step batch so intermediates stay well inside the default VMEM budget
    # on every generation (raise vmem_limit_bytes to go bigger).
    for b in (4, 2):
        if n % b == 0 and n // b >= 2:
            return b
    return 1


# -----------------------------------------------------------------------------
# The fused Pallas kernel (B images per grid step, stacked along lanes)
# -----------------------------------------------------------------------------
def _unet_kernel(x_ref, m_ref, w_ref, b_ref, o_ref, *, n_lanes, num_classes):
    f32, bf16 = jnp.float32, jnp.bfloat16

    def taps(a, dil):
        """9 masked 3x3-neighbour copies of `a` at the given dilation."""
        base = _CMASK_BASE[dil]
        out = []
        for t in range(9):
            dy, dx = t // 3 - 1, t % 3 - 1
            off = dil * (dy * _W + dx)
            if off == 0:
                out.append(a)                                   # centre tap, no mask needed
            else:
                rolled = pltpu.roll(a, (-off) % n_lanes, axis=1)  # rolled[p] = a[p + off]
                out.append(rolled * m_ref[base + t:base + t + 1, :])
        return out

    def conv(tap_list, name, cout, relu=True):
        # Single big-K matmul: K = 9*Cin (or 9*(Cup+Cskip) for decoder convs).
        cols = jnp.concatenate(tap_list, axis=0).astype(bf16)   # (K, n_lanes)
        k = cols.shape[0]
        row = _ROW[name]
        z = jnp.dot(w_ref[row:row + cout, 0:k], cols,
                    preferred_element_type=f32)                  # (cout, n_lanes) f32
        z = z + b_ref[row:row + cout, :]
        return jnp.maximum(z, 0.0) if relu else z

    def pool(a, dil):
        # 2x2 maxpool, result kept on the dilated grid (valid at stride 2*dil).
        m = a
        for off in (dil, dil * _W, dil * (_W + 1)):
            m = jnp.maximum(m, pltpu.roll(a, (-off) % n_lanes, axis=1))
        return m

    def upsample(a, dil_out):
        # Nearest 2x upsample from dilation 2*dil_out to dil_out: parity-masked
        # sum of 4 rolled copies (masks are disjoint 0/1 -> exact selection).
        base = _UMASK_BASE[dil_out]
        out = a * m_ref[base:base + 1, :]
        for k, s in enumerate((dil_out, dil_out * _W, dil_out * (_W + 1)), start=1):
            out = out + pltpu.roll(a, s, axis=1) * m_ref[base + k:base + k + 1, :]
        return out

    x = x_ref[0].astype(f32)                                     # (8, n_lanes)

    e1 = conv(taps(x, 1), "enc1a", 8)
    e1 = conv(taps(e1, 1), "enc1b", 8)                           # 16x16
    p1 = pool(e1, 1)                                             # 8x8 (dilation 2)

    e2 = conv(taps(p1, 2), "enc2a", 16)
    e2 = conv(taps(e2, 2), "enc2b", 16)                          # 8x8
    p2 = pool(e2, 2)                                             # 4x4 (dilation 4)

    bn = conv(taps(p2, 4), "botta", 32)
    bn = conv(taps(bn, 4), "bottb", 32)                          # 4x4

    d2 = conv(taps(upsample(bn, 2), 2) + taps(e2, 2), "dec2a", 16)
    d2 = conv(taps(d2, 2), "dec2b", 16)                          # 8x8

    d1 = conv(taps(upsample(d2, 1), 1) + taps(e1, 1), "dec1a", 8)
    d1 = conv(taps(d1, 1), "dec1b", 8)                           # 16x16

    logits = conv(taps(d1, 1), "head", num_classes, relu=False)  # (nc, n_lanes)
    o_ref[0, :, :] = jax.nn.sigmoid(logits).astype(o_ref.dtype)


# -----------------------------------------------------------------------------
# Wrapper: builds the packed slabs and the pallas_call
# -----------------------------------------------------------------------------
def build_unet(params, in_ch=3, num_classes=3):
    w_slab, b_slab = _pack_params(params, in_ch, num_classes)

    def forward(x_nchw):
        n = x_nchw.shape[0]
        assert x_nchw.shape[1:] == (in_ch, _H, _W)
        b = _pick_images_per_step(n)
        g = n // b
        n_lanes = b * _HW
        masks = _mask_slab(b)

        # Channels-first (C, B*HW) lane-dense layout, bf16 feed, zero-padded to
        # 8 input channels so every im2col chunk is 8-row aligned.
        x = x_nchw.reshape(n, in_ch, _HW).astype(jnp.bfloat16)
        x = jnp.pad(x, ((0, 0), (0, _CIN_PAD - in_ch), (0, 0)))
        x = x.reshape(g, b, _CIN_PAD, _HW).transpose(0, 2, 1, 3)
        x = x.reshape(g, _CIN_PAD, n_lanes)

        kernel = functools.partial(_unet_kernel, n_lanes=n_lanes,
                                   num_classes=num_classes)
        out = pl.pallas_call(
            kernel,
            out_shape=jax.ShapeDtypeStruct((g, num_classes, n_lanes), jnp.float32),
            grid=(g,),
            in_specs=[
                pl.BlockSpec((1, _CIN_PAD, n_lanes), lambda i: (i, 0, 0)),
                pl.BlockSpec(masks.shape, lambda i: (0, 0)),
                pl.BlockSpec(w_slab.shape, lambda i: (0, 0)),
                pl.BlockSpec(b_slab.shape, lambda i: (0, 0)),
            ],
            out_specs=pl.BlockSpec((1, num_classes, n_lanes), lambda i: (i, 0, 0)),
            compiler_params=pltpu.CompilerParams(
                dimension_semantics=("parallel",)),
        )(x, masks, w_slab, b_slab)

        out = out.reshape(g, num_classes, b, _HW).transpose(0, 2, 1, 3)
        return out.reshape(n, num_classes, _H, _W)

    return forward


# -----------------------------------------------------------------------------
# Pure-JAX f32 reference (for correctness check)
# -----------------------------------------------------------------------------
def _ref_conv3x3(x, w, b, act):
    n, h, wd, cin = x.shape
    cout = w.shape[-1]
    xp = jnp.pad(x, ((0, 0), (1, 1), (1, 1), (0, 0)))
    cols = jnp.concatenate(
        [xp[:, kh:kh + h, kw:kw + wd, :] for kh in range(3) for kw in range(3)],
        axis=-1).reshape(n, h * wd, 9 * cin)
    y = cols @ w.reshape(9 * cin, cout) + b
    y = jnp.maximum(y, 0.0) if act == "relu" else jax.nn.sigmoid(y)
    return y.reshape(n, h, wd, cout)


def _ref_maxpool(x):
    n, h, w, c = x.shape
    return x.reshape(n, h // 2, 2, w // 2, 2, c).max(axis=(2, 4))


def _ref_upsample(x):
    return jnp.repeat(jnp.repeat(x, 2, axis=1), 2, axis=2)


def unet_reference(x_nchw, params):
    x = jnp.transpose(x_nchw, (0, 2, 3, 1))
    e1 = _ref_conv3x3(x, *params["enc1a"], act="relu")
    e1 = _ref_conv3x3(e1, *params["enc1b"], act="relu")
    p1 = _ref_maxpool(e1)
    e2 = _ref_conv3x3(p1, *params["enc2a"], act="relu")
    e2 = _ref_conv3x3(e2, *params["enc2b"], act="relu")
    p2 = _ref_maxpool(e2)
    bn = _ref_conv3x3(p2, *params["botta"], act="relu")
    bn = _ref_conv3x3(bn, *params["bottb"], act="relu")
    d2 = jnp.concatenate([_ref_upsample(bn), e2], axis=-1)
    d2 = _ref_conv3x3(d2, *params["dec2a"], act="relu")
    d2 = _ref_conv3x3(d2, *params["dec2b"], act="relu")
    d1 = jnp.concatenate([_ref_upsample(d2), e1], axis=-1)
    d1 = _ref_conv3x3(d1, *params["dec1a"], act="relu")
    d1 = _ref_conv3x3(d1, *params["dec1b"], act="relu")
    out = _ref_conv3x3(d1, *params["head"], act="sigmoid")
    return jnp.transpose(out, (0, 3, 1, 2))


if __name__ == "__main__":
    key = jax.random.PRNGKey(0)
    pkey, xkey = jax.random.split(key)

    N, IN_CH, H, W = 2, 3, 16, 16
    NUM_CLASSES = 3

    params = init_params(pkey, in_ch=IN_CH, num_classes=NUM_CLASSES)
    x = jax.random.normal(xkey, (N, IN_CH, H, W), jnp.float32)  # NCHW like PyTorch

    fwd = jax.jit(build_unet(params, in_ch=IN_CH, num_classes=NUM_CLASSES))
    y = fwd(x)
    jax.block_until_ready(y)

    assert y.shape == (N, NUM_CLASSES, H, W)
    assert bool(jnp.all(jnp.isfinite(y)))
    assert bool(jnp.all((y >= 0.0) & (y <= 1.0)))  # sigmoid head

    y_ref = unet_reference(x, params)
    max_err = float(jnp.max(jnp.abs(y - y_ref)))
    assert max_err < 5e-2, f"max abs err vs f32 reference: {max_err}"

    print("KERNEL_OK")
</pallas_src>

<mosaic_0001>
module attributes {stable_mosaic.version = 11 : i64} {
  func.func @_unet_kernel(%arg0: i32, %arg1: memref<1x8x256xbf16, #tpu.memory_space<vmem>>, %arg2: memref<40x256xf32, #tpu.memory_space<vmem>>, %arg3: memref<168x512xbf16, #tpu.memory_space<vmem>>, %arg4: memref<168x1xf32, #tpu.memory_space<vmem>>, %arg5: memref<1x3x256xf32, #tpu.memory_space<vmem>>) attributes {dimension_semantics = [#tpu.dimension_semantics<parallel>], iteration_bounds = array<i64: 2>, scalar_prefetch = 0 : i64, scratch_operands = 0 : i64, tpu.core_type = #tpu.core_type<tc>, window_params = [{transform_indices = @transform_0, window_bounds = array<i64: 1, 8, 256>}, {pipeline_mode = #tpu.pipeline_mode<synchronous>, transform_indices = @transform_1, window_bounds = array<i64: 40, 256>}, {pipeline_mode = #tpu.pipeline_mode<synchronous>, transform_indices = @transform_2, window_bounds = array<i64: 168, 512>}, {pipeline_mode = #tpu.pipeline_mode<synchronous>, transform_indices = @transform_3, window_bounds = array<i64: 168, 1>}, {transform_indices = @transform_4, window_bounds = array<i64: 1, 3, 256>}]} {
    %c0 = arith.constant 0 : index
    %c0_0 = arith.constant 0 : index
    %c0_1 = arith.constant 0 : index
    %0 = vector.load %arg1[%c0, %c0_0, %c0_1] : memref<1x8x256xbf16, #tpu.memory_space<vmem>>, vector<1x8x256xbf16>
    %1 = vector.shape_cast %0 : vector<1x8x256xbf16> to vector<8x256xbf16>
    %2 = arith.extf %1 : vector<8x256xbf16> to vector<8x256xf32>
    %c17_i32 = arith.constant 17 : i32
    %3 = tpu.dynamic_rotate %2 by %c17_i32 dim 1 : vector<8x256xf32>, i32 -> vector<8x256xf32>
    %c0_2 = arith.constant 0 : index
    %c0_3 = arith.constant 0 : index
    %4 = vector.load %arg2[%c0_2, %c0_3] : memref<40x256xf32, #tpu.memory_space<vmem>>, vector<1x256xf32>
    %5 = vector.broadcast %4 : vector<1x256xf32> to vector<8x256xf32>
    %6 = arith.mulf %3, %5 : vector<8x256xf32>
    %c16_i32 = arith.constant 16 : i32
    %7 = tpu.dynamic_rotate %2 by %c16_i32 dim 1 : vector<8x256xf32>, i32 -> vector<8x256xf32>
    %c1 = arith.constant 1 : index
    %c0_4 = arith.constant 0 : index
    %8 = vector.load %arg2[%c1, %c0_4] : memref<40x256xf32, #tpu.memory_space<vmem>>, vector<1x256xf32>
    %9 = vector.broadcast %8 : vector<1x256xf32> to vector<8x256xf32>
    %10 = arith.mulf %7, %9 : vector<8x256xf32>
    %c15_i32 = arith.constant 15 : i32
    %11 = tpu.dynamic_rotate %2 by %c15_i32 dim 1 : vector<8x256xf32>, i32 -> vector<8x256xf32>
    %c2 = arith.constant 2 : index
    %c0_5 = arith.constant 0 : index
    %12 = vector.load %arg2[%c2, %c0_5] : memref<40x256xf32, #tpu.memory_space<vmem>>, vector<1x256xf32>
    %13 = vector.broadcast %12 : vector<1x256xf32> to vector<8x256xf32>
    %14 = arith.mulf %11, %13 : vector<8x256xf32>
    %c1_i32 = arith.constant 1 : i32
    %15 = tpu.dynamic_rotate %2 by %c1_i32 dim 1 : vector<8x256xf32>, i32 -> vector<8x256xf32>
    %c3 = arith.constant 3 : index
    %c0_6 = arith.constant 0 : index
    %16 = vector.load %arg2[%c3, %c0_6] : memref<40x256xf32, #tpu.memory_space<vmem>>, vector<1x256xf32>
    %17 = vector.broadcast %16 : vector<1x256xf32> to vector<8x256xf32>
    %18 = arith.mulf %15, %17 : vector<8x256xf32>
    %c255_i32 = arith.constant 255 : i32
    %19 = tpu.dynamic_rotate %2 by %c255_i32 dim 1 : vector<8x256xf32>, i32 -> vector<8x256xf32>
    %c5 = arith.constant 5 : index
    %c0_7 = arith.constant 0 : index
    %20 = vector.load %arg2[%c5, %c0_7] : memref<40x256xf32, #tpu.memory_space<vmem>>, vector<1x256xf32>
    %21 = vector.broadcast %20 : vector<1x256xf32> to vector<8x256xf32>
    %22 = arith.mulf %19, %21 : vector<8x256xf32>
    %c241_i32 = arith.constant 241 : i32
    %23 = tpu.dynamic_rotate %2 by %c241_i32 dim 1 : vector<8x256xf32>, i32 -> vector<8x256xf32>
    %c6 = arith.constant 6 : index
    %c0_8 = arith.constant 0 : index
    %24 = vector.load %arg2[%c6, %c0_8] : memref<40x256xf32, #tpu.memory_space<vmem>>, vector<1x256xf32>
    %25 = vector.broadcast %24 : vector<1x256xf32> to vector<8x256xf32>
    %26 = arith.mulf %23, %25 : vector<8x256xf32>
    %c240_i32 = arith.constant 240 : i32
    %27 = tpu.dynamic_rotate %2 by %c240_i32 dim 1 : vector<8x256xf32>, i32 -> vector<8x256xf32>
    %c7 = arith.constant 7 : index
    %c0_9 = arith.constant 0 : index
    %28 = vector.load %arg2[%c7, %c0_9] : memref<40x256xf32, #tpu.memory_space<vmem>>, vector<1x256xf32>
    %29 = vector.broadcast %28 : vector<1x256xf32> to vector<8x256xf32>
    %30 = arith.mulf %27, %29 : vector<8x256xf32>
    %c239_i32 = arith.constant 239 : i32
    %31 = tpu.dynamic_rotate %2 by %c239_i32 dim 1 : vector<8x256xf32>, i32 -> vector<8x256xf32>
    %c8 = arith.constant 8 : index
    %c0_10 = arith.constant 0 : index
    %32 = vector.load %arg2[%c8, %c0_10] : memref<40x256xf32, #tpu.memory_space<vmem>>, vector<1x256xf32>
    %33 = vector.broadcast %32 : vector<1x256xf32> to vector<8x256xf32>
    %34 = arith.mulf %31, %33 : vector<8x256xf32>
    %35 = tpu.concatenate %6, %10, %14, %18, %2, %22, %26, %30, %34 in 0 : vector<8x256xf32>, vector<8x256xf32>, vector<8x256xf32>, vector<8x256xf32>, vector<8x256xf32>, vector<8x256xf32>, vector<8x256xf32>, vector<8x256xf32>, vector<8x256xf32> -> vector<72x256xf32>
    %36 = arith.truncf %35 : vector<72x256xf32> to vector<72x256xbf16>
    %c0_11 = arith.constant 0 : index
    %c0_12 = arith.constant 0 : index
    %37 = vector.load %arg3[%c0_11, %c0_12] : memref<168x512xbf16, #tpu.memory_space<vmem>>, vector<8x72xbf16>
    %cst = arith.constant dense<0.000000e+00> : vector<8x256xf32>
    %38 = tpu.matmul %37, %36, %cst {dimension_numbers = #tpu.dot_dimension_numbers<[1], [0], [0], [1], [0, 0, 1, 1], [], []>} : vector<8x72xbf16>, vector<72x256xbf16>, vector<8x256xf32> -> vector<8x256xf32>
    %c0_13 = arith.constant 0 : index
    %c0_14 = arith.constant 0 : index
    %39 = vector.load %arg4[%c0_13, %c0_14] : memref<168x1xf32, #tpu.memory_space<vmem>>, vector<8x1xf32>
    %40 = vector.broadcast %39 : vector<8x1xf32> to vector<8x256xf32>
    %41 = arith.addf %38, %40 : vector<8x256xf32>
    %cst_15 = arith.constant 0.000000e+00 : f32
    %42 = vector.broadcast %cst_15 : f32 to vector<8x256xf32>
    %43 = arith.maximumf %41, %42 : vector<8x256xf32>
    %c17_i32_16 = arith.constant 17 : i32
    %44 = tpu.dynamic_rotate %43 by %c17_i32_16 dim 1 : vector<8x256xf32>, i32 -> vector<8x256xf32>
    %c0_17 = arith.constant 0 : index
    %c0_18 = arith.constant 0 : index
    %45 = vector.load %arg2[%c0_17, %c0_18] : memref<40x256xf32, #tpu.memory_space<vmem>>, vector<1x256xf32>
    %46 = vector.broadcast %45 : vector<1x256xf32> to vector<8x256xf32>
    %47 = arith.mulf %44, %46 : vector<8x256xf32>
    %c16_i32_19 = arith.constant 16 : i32
    %48 = tpu.dynamic_rotate %43 by %c16_i32_19 dim 1 : vector<8x256xf32>, i32 -> vector<8x256xf32>
    %c1_20 = arith.constant 1 : index
    %c0_21 = arith.constant 0 : index
    %49 = vector.load %arg2[%c1_20, %c0_21] : memref<40x256xf32, #tpu.memory_space<vmem>>, vector<1x256xf32>
    %50 = vector.broadcast %49 : vector<1x256xf32> to vector<8x256xf32>
    %51 = arith.mulf %48, %50 : vector<8x256xf32>
    %c15_i32_22 = arith.constant 15 : i32
    %52 = tpu.dynamic_rotate %43 by %c15_i32_22 dim 1 : vector<8x256xf32>, i32 -> vector<8x256xf32>
    %c2_23 = arith.constant 2 : index
    %c0_24 = arith.constant 0 : index
    %53 = vector.load %arg2[%c2_23, %c0_24] : memref<40x256xf32, #tpu.memory_space<vmem>>, vector<1x256xf32>
    %54 = vector.broadcast %53 : vector<1x256xf32> to vector<8x256xf32>
    %55 = arith.mulf %52, %54 : vector<8x256xf32>
    %c1_i32_25 = arith.constant 1 : i32
    %56 = tpu.dynamic_rotate %43 by %c1_i32_25 dim 1 : vector<8x256xf32>, i32 -> vector<8x256xf32>
    %c3_26 = arith.constant 3 : index
    %c0_27 = arith.constant 0 : index
    %57 = vector.load %arg2[%c3_26, %c0_27] : memref<40x256xf32, #tpu.memory_space<vmem>>, vector<1x256xf32>
    %58 = vector.broadcast %57 : vector<1x256xf32> to vector<8x256xf32>
    %59 = arith.mulf %56, %58 : vector<8x256xf32>
    %c255_i32_28 = arith.constant 255 : i32
    %60 = tpu.dynamic_rotate %43 by %c255_i32_28 dim 1 : vector<8x256xf32>, i32 -> vector<8x256xf32>
    %c5_29 = arith.constant 5 : index
    %c0_30 = arith.constant 0 : index
    %61 = vector.load %arg2[%c5_29, %c0_30] : memref<40x256xf32, #tpu.memory_space<vmem>>, vector<1x256xf32>
    %62 = vector.broadcast %61 : vector<1x256xf32> to vector<8x256xf32>
    %63 = arith.mulf %60, %62 : vector<8x256xf32>
    %c241_i32_31 = arith.constant 241 : i32
    %64 = tpu.dynamic_rotate %43 by %c241_i32_31 dim 1 : vector<8x256xf32>, i32 -> vector<8x256xf32>
    %c6_32 = arith.constant 6 : index
    %c0_33 = arith.constant 0 : index
    %65 = vector.load %arg2[%c6_32, %c0_33] : memref<40x256xf32, #tpu.memory_space<vmem>>, vector<1x256xf32>
    %66 = vector.broadcast %65 : vector<1x256xf32> to vector<8x256xf32>
    %67 = arith.mulf %64, %66 : vector<8x256xf32>
    %c240_i32_34 = arith.constant 240 : i32
    %68 = tpu.dynamic_rotate %43 by %c240_i32_34 dim 1 : vector<8x256xf32>, i32 -> vector<8x256xf32>
    %c7_35 = arith.constant 7 : index
    %c0_36 = arith.constant 0 : index
    %69 = vector.load %arg2[%c7_35, %c0_36] : memref<40x256xf32, #tpu.memory_space<vmem>>, vector<1x256xf32>
    %70 = vector.broadcast %69 : vector<1x256xf32> to vector<8x256xf32>
    %71 = arith.mulf %68, %70 : vector<8x256xf32>
    %c239_i32_37 = arith.constant 239 : i32
    %72 = tpu.dynamic_rotate %43 by %c239_i32_37 dim 1 : vector<8x256xf32>, i32 -> vector<8x256xf32>
    %c8_38 = arith.constant 8 : index
    %c0_39 = arith.constant 0 : index
    %73 = vector.load %arg2[%c8_38, %c0_39] : memref<40x256xf32, #tpu.memory_space<vmem>>, vector<1x256xf32>
    %74 = vector.broadcast %73 : vector<1x256xf32> to vector<8x256xf32>
    %75 = arith.mulf %72, %74 : vector<8x256xf32>
    %76 = tpu.concatenate %47, %51, %55, %59, %43, %63, %67, %71, %75 in 0 : vector<8x256xf32>, vector<8x256xf32>, vector<8x256xf32>, vector<8x256xf32>, vector<8x256xf32>, vector<8x256xf32>, vector<8x256xf32>, vector<8x256xf32>, vector<8x256xf32> -> vector<72x256xf32>
    %77 = arith.truncf %76 : vector<72x256xf32> to vector<72x256xbf16>
    %c8_40 = arith.constant 8 : index
    %c0_41 = arith.constant 0 : index
    %78 = vector.load %arg3[%c8_40, %c0_41] : memref<168x512xbf16, #tpu.memory_space<vmem>>, vector<8x72xbf16>
    %cst_42 = arith.constant dense<0.000000e+00> : vector<8x256xf32>
    %79 = tpu.matmul %78, %77, %cst_42 {dimension_numbers = #tpu.dot_dimension_numbers<[1], [0], [0], [1], [0, 0, 1, 1], [], []>} : vector<8x72xbf16>, vector<72x256xbf16>, vector<8x256xf32> -> vector<8x256xf32>
    %c8_43 = arith.constant 8 : index
    %c0_44 = arith.constant 0 : index
    %80 = vector.load %arg4[%c8_43, %c0_44] : memref<168x1xf32, #tpu.memory_space<vmem>>, vector<8x1xf32>
    %81 = vector.broadcast %80 : vector<8x1xf32> to vector<8x256xf32>
    %82 = arith.addf %79, %81 : vector<8x256xf32>
    %cst_45 = arith.constant 0.000000e+00 : f32
    %83 = vector.broadcast %cst_45 : f32 to vector<8x256xf32>
    %84 = arith.maximumf %82, %83 : vector<8x256xf32>
    %c255_i32_46 = arith.constant 255 : i32
    %85 = tpu.dynamic_rotate %84 by %c255_i32_46 dim 1 : vector<8x256xf32>, i32 -> vector<8x256xf32>
    %86 = arith.maximumf %84, %85 : vector<8x256xf32>
    %c240_i32_47 = arith.constant 240 : i32
    %87 = tpu.dynamic_rotate %84 by %c240_i32_47 dim 1 : vector<8x256xf32>, i32 -> vector<8x256xf32>
    %88 = arith.maximumf %86, %87 : vector<8x256xf32>
    %c239_i32_48 = arith.constant 239 : i32
    %89 = tpu.dynamic_rotate %84 by %c239_i32_48 dim 1 : vector<8x256xf32>, i32 -> vector<8x256xf32>
    %90 = arith.maximumf %88, %89 : vector<8x256xf32>
    %c34_i32 = arith.constant 34 : i32
    %91 = tpu.dynamic_rotate %90 by %c34_i32 dim 1 : vector<8x256xf32>, i32 -> vector<8x256xf32>
    %c9 = arith.constant 9 : index
    %c0_49 = arith.constant 0 : index
    %92 = vector.load %arg2[%c9, %c0_49] : memref<40x256xf32, #tpu.memory_space<vmem>>, vector<1x256xf32>
    %93 = vector.broadcast %92 : vector<1x256xf32> to vector<8x256xf32>
    %94 = arith.mulf %91, %93 : vector<8x256xf32>
    %c32_i32 = arith.constant 32 : i32
    %95 = tpu.dynamic_rotate %90 by %c32_i32 dim 1 : vector<8x256xf32>, i32 -> vector<8x256xf32>
    %c10 = arith.constant 10 : index
    %c0_50 = arith.constant 0 : index
    %96 = vector.load %arg2[%c10, %c0_50] : memref<40x256xf32, #tpu.memory_space<vmem>>, vector<1x256xf32>
    %97 = vector.broadcast %96 : vector<1x256xf32> to vector<8x256xf32>
    %98 = arith.mulf %95, %97 : vector<8x256xf32>
    %c30_i32 = arith.constant 30 : i32
    %99 = tpu.dynamic_rotate %90 by %c30_i32 dim 1 : vector<8x256xf32>, i32 -> vector<8x256xf32>
    %c11 = arith.constant 11 : index
    %c0_51 = arith.constant 0 : index
    %100 = vector.load %arg2[%c11, %c0_51] : memref<40x256xf32, #tpu.memory_space<vmem>>, vector<1x256xf32>
    %101 = vector.broadcast %100 : vector<1x256xf32> to vector<8x256xf32>
    %102 = arith.mulf %99, %101 : vector<8x256xf32>
    %c2_i32 = arith.constant 2 : i32
    %103 = tpu.dynamic_rotate %90 by %c2_i32 dim 1 : vector<8x256xf32>, i32 -> vector<8x256xf32>
    %c12 = arith.constant 12 : index
    %c0_52 = arith.constant 0 : index
    %104 = vector.load %arg2[%c12, %c0_52] : memref<40x256xf32, #tpu.memory_space<vmem>>, vector<1x256xf32>
    %105 = vector.broadcast %104 : vector<1x256xf32> to vector<8x256xf32>
    %106 = arith.mulf %103, %105 : vector<8x256xf32>
    %c254_i32 = arith.constant 254 : i32
    %107 = tpu.dynamic_rotate %90 by %c254_i32 dim 1 : vector<8x256xf32>, i32 -> vector<8x256xf32>
    %c14 = arith.constant 14 : index
    %c0_53 = arith.constant 0 : index
    %108 = vector.load %arg2[%c14, %c0_53] : memref<40x256xf32, #tpu.memory_space<vmem>>, vector<1x256xf32>
    %109 = vector.broadcast %108 : vector<1x256xf32> to vector<8x256xf32>
    %110 = arith.mulf %107, %109 : vector<8x256xf32>
    %c226_i32 = arith.constant 226 : i32
    %111 = tpu.dynamic_rotate %90 by %c226_i32 dim 1 : vector<8x256xf32>, i32 -> vector<8x256xf32>
    %c15 = arith.constant 15 : index
    %c0_54 = arith.constant 0 : index
    %112 = vector.load %arg2[%c15, %c0_54] : memref<40x256xf32, #tpu.memory_space<vmem>>, vector<1x256xf32>
    %113 = vector.broadcast %112 : vector<1x256xf32> to vector<8x256xf32>
    %114 = arith.mulf %111, %113 : vector<8x256xf32>
    %c224_i32 = arith.constant 224 : i32
    %115 = tpu.dynamic_rotate %90 by %c224_i32 dim 1 : vector<8x256xf32>, i32 -> vector<8x256xf32>
    %c16 = arith.constant 16 : index
    %c0_55 = arith.constant 0 : index
    %116 = vector.load %arg2[%c16, %c0_55] : memref<40x256xf32, #tpu.memory_space<vmem>>, vector<1x256xf32>
    %117 = vector.broadcast %116 : vector<1x256xf32> to vector<8x256xf32>
    %118 = arith.mulf %115, %117 : vector<8x256xf32>
    %c222_i32 = arith.constant 222 : i32
    %119 = tpu.dynamic_rotate %90 by %c222_i32 dim 1 : vector<8x256xf32>, i32 -> vector<8x256xf32>
    %c17 = arith.constant 17 : index
    %c0_56 = arith.constant 0 : index
    %120 = vector.load %arg2[%c17, %c0_56] : memref<40x256xf32, #tpu.memory_space<vmem>>, vector<1x256xf32>
    %121 = vector.broadcast %120 : vector<1x256xf32> to vector<8x256xf32>
    %122 = arith.mulf %119, %121 : vector<8x256xf32>
    %123 = tpu.concatenate %94, %98, %102, %106, %90, %110, %114, %118, %122 in 0 : vector<8x256xf32>, vector<8x256xf32>, vector<8x256xf32>, vector<8x256xf32>, vector<8x256xf32>, vector<8x256xf32>, vector<8x256xf32>, vector<8x256xf32>, vector<8x256xf32> -> vector<72x256xf32>
    %124 = arith.truncf %123 : vector<72x256xf32> to vector<72x256xbf16>
    %c16_57 = arith.constant 16 : index
    %c0_58 = arith.constant 0 : index
    %125 = vector.load %arg3[%c16_57, %c0_58] : memref<168x512xbf16, #tpu.memory_space<vmem>>, vector<16x72xbf16>
    %cst_59 = arith.constant dense<0.000000e+00> : vector<16x256xf32>
    %126 = tpu.matmul %125, %124, %cst_59 {dimension_numbers = #tpu.dot_dimension_numbers<[1], [0], [0], [1], [0, 0, 1, 1], [], []>} : vector<16x72xbf16>, vector<72x256xbf16>, vector<16x256xf32> -> vector<16x256xf32>
    %c16_60 = arith.constant 16 : index
    %c0_61 = arith.constant 0 : index
    %127 = vector.load %arg4[%c16_60, %c0_61] : memref<168x1xf32, #tpu.memory_space<vmem>>, vector<16x1xf32>
    %128 = vector.broadcast %127 : vector<16x1xf32> to vector<16x256xf32>
    %129 = arith.addf %126, %128 : vector<16x256xf32>
    %cst_62 = arith.constant 0.000000e+00 : f32
    %130 = vector.broadcast %cst_62 : f32 to vector<16x256xf32>
    %131 = arith.maximumf %129, %130 : vector<16x256xf32>
    %c34_i32_63 = arith.constant 34 : i32
    %132 = tpu.dynamic_rotate %131 by %c34_i32_63 dim 1 : vector<16x256xf32>, i32 -> vector<16x256xf32>
    %c9_64 = arith.constant 9 : index
    %c0_65 = arith.constant 0 : index
    %133 = vector.load %arg2[%c9_64, %c0_65] : memref<40x256xf32, #tpu.memory_space<vmem>>, vector<1x256xf32>
    %134 = vector.broadcast %133 : vector<1x256xf32> to vector<16x256xf32>
    %135 = arith.mulf %132, %134 : vector<16x256xf32>
    %c32_i32_66 = arith.constant 32 : i32
    %136 = tpu.dynamic_rotate %131 by %c32_i32_66 dim 1 : vector<16x256xf32>, i32 -> vector<16x256xf32>
    %c10_67 = arith.constant 10 : index
    %c0_68 = arith.constant 0 : index
    %137 = vector.load %arg2[%c10_67, %c0_68] : memref<40x256xf32, #tpu.memory_space<vmem>>, vector<1x256xf32>
    %138 = vector.broadcast %137 : vector<1x256xf32> to vector<16x256xf32>
    %139 = arith.mulf %136, %138 : vector<16x256xf32>
    %c30_i32_69 = arith.constant 30 : i32
    %140 = tpu.dynamic_rotate %131 by %c30_i32_69 dim 1 : vector<16x256xf32>, i32 -> vector<16x256xf32>
    %c11_70 = arith.constant 11 : index
    %c0_71 = arith.constant 0 : index
    %141 = vector.load %arg2[%c11_70, %c0_71] : memref<40x256xf32, #tpu.memory_space<vmem>>, vector<1x256xf32>
    %142 = vector.broadcast %141 : vector<1x256xf32> to vector<16x256xf32>
    %143 = arith.mulf %140, %142 : vector<16x256xf32>
    %c2_i32_72 = arith.constant 2 : i32
    %144 = tpu.dynamic_rotate %131 by %c2_i32_72 dim 1 : vector<16x256xf32>, i32 -> vector<16x256xf32>
    %c12_73 = arith.constant 12 : index
    %c0_74 = arith.constant 0 : index
    %145 = vector.load %arg2[%c12_73, %c0_74] : memref<40x256xf32, #tpu.memory_space<vmem>>, vector<1x256xf32>
    %146 = vector.broadcast %145 : vector<1x256xf32> to vector<16x256xf32>
    %147 = arith.mulf %144, %146 : vector<16x256xf32>
    %c254_i32_75 = arith.constant 254 : i32
    %148 = tpu.dynamic_rotate %131 by %c254_i32_75 dim 1 : vector<16x256xf32>, i32 -> vector<16x256xf32>
    %c14_76 = arith.constant 14 : index
    %c0_77 = arith.constant 0 : index
    %149 = vector.load %arg2[%c14_76, %c0_77] : memref<40x256xf32, #tpu.memory_space<vmem>>, vector<1x256xf32>
    %150 = vector.broadcast %149 : vector<1x256xf32> to vector<16x256xf32>
    %151 = arith.mulf %148, %150 : vector<16x256xf32>
    %c226_i32_78 = arith.constant 226 : i32
    %152 = tpu.dynamic_rotate %131 by %c226_i32_78 dim 1 : vector<16x256xf32>, i32 -> vector<16x256xf32>
    %c15_79 = arith.constant 15 : index
    %c0_80 = arith.constant 0 : index
    %153 = vector.load %arg2[%c15_79, %c0_80] : memref<40x256xf32, #tpu.memory_space<vmem>>, vector<1x256xf32>
    %154 = vector.broadcast %153 : vector<1x256xf32> to vector<16x256xf32>
    %155 = arith.mulf %152, %154 : vector<16x256xf32>
    %c224_i32_81 = arith.constant 224 : i32
    %156 = tpu.dynamic_rotate %131 by %c224_i32_81 dim 1 : vector<16x256xf32>, i32 -> vector<16x256xf32>
    %c16_82 = arith.constant 16 : index
    %c0_83 = arith.constant 0 : index
    %157 = vector.load %arg2[%c16_82, %c0_83] : memref<40x256xf32, #tpu.memory_space<vmem>>, vector<1x256xf32>
    %158 = vector.broadcast %157 : vector<1x256xf32> to vector<16x256xf32>
    %159 = arith.mulf %156, %158 : vector<16x256xf32>
    %c222_i32_84 = arith.constant 222 : i32
    %160 = tpu.dynamic_rotate %131 by %c222_i32_84 dim 1 : vector<16x256xf32>, i32 -> vector<16x256xf32>
    %c17_85 = arith.constant 17 : index
    %c0_86 = arith.constant 0 : index
    %161 = vector.load %arg2[%c17_85, %c0_86] : memref<40x256xf32, #tpu.memory_space<vmem>>, vector<1x256xf32>
    %162 = vector.broadcast %161 : vector<1x256xf32> to vector<16x256xf32>
    %163 = arith.mulf %160, %162 : vector<16x256xf32>
    %164 = tpu.concatenate %135, %139, %143, %147, %131, %151, %155, %159, %163 in 0 : vector<16x256xf32>, vector<16x256xf32>, vector<16x256xf32>, vector<16x256xf32>, vector<16x256xf32>, vector<16x256xf32>, vector<16x256xf32>, vector<16x256xf32>, vector<16x256xf32> -> vector<144x256xf32>
    %165 = arith.truncf %164 : vector<144x256xf32> to vector<144x256xbf16>
    %c32 = arith.constant 32 : index
    %c0_87 = arith.constant 0 : index
    %166 = vector.load %arg3[%c32, %c0_87] : memref<168x512xbf16, #tpu.memory_space<vmem>>, vector<16x144xbf16>
    %cst_88 = arith.constant dense<0.000000e+00> : vector<16x256xf32>
    %167 = tpu.matmul %166, %165, %cst_88 {dimension_numbers = #tpu.dot_dimension_numbers<[1], [0], [0], [1], [0, 0, 1, 1], [], []>} : vector<16x144xbf16>, vector<144x256xbf16>, vector<16x256xf32> -> vector<16x256xf32>
    %c32_89 = arith.constant 32 : index
    %c0_90 = arith.constant 0 : index
    %168 = vector.load %arg4[%c32_89, %c0_90] : memref<168x1xf32, #tpu.memory_space<vmem>>, vector<16x1xf32>
    %169 = vector.broadcast %168 : vector<16x1xf32> to vector<16x256xf32>
    %170 = arith.addf %167, %169 : vector<16x256xf32>
    %cst_91 = arith.constant 0.000000e+00 : f32
    %171 = vector.broadcast %cst_91 : f32 to vector<16x256xf32>
    %172 = arith.maximumf %170, %171 : vector<16x256xf32>
    %c254_i32_92 = arith.constant 254 : i32
    %173 = tpu.dynamic_rotate %172 by %c254_i32_92 dim 1 : vector<16x256xf32>, i32 -> vector<16x256xf32>
    %174 = arith.maximumf %172, %173 : vector<16x256xf32>
    %c224_i32_93 = arith.constant 224 : i32
    %175 = tpu.dynamic_rotate %172 by %c224_i32_93 dim 1 : vector<16x256xf32>, i32 -> vector<16x256xf32>
    %176 = arith.maximumf %174, %175 : vector<16x256xf32>
    %c222_i32_94 = arith.constant 222 : i32
    %177 = tpu.dynamic_rotate %172 by %c222_i32_94 dim 1 : vector<16x256xf32>, i32 -> vector<16x256xf32>
    %178 = arith.maximumf %176, %177 : vector<16x256xf32>
    %c68_i32 = arith.constant 68 : i32
    %179 = tpu.dynamic_rotate %178 by %c68_i32 dim 1 : vector<16x256xf32>, i32 -> vector<16x256xf32>
    %c18 = arith.constant 18 : index
    %c0_95 = arith.constant 0 : index
    %180 = vector.load %arg2[%c18, %c0_95] : memref<40x256xf32, #tpu.memory_space<vmem>>, vector<1x256xf32>
    %181 = vector.broadcast %180 : vector<1x256xf32> to vector<16x256xf32>
    %182 = arith.mulf %179, %181 : vector<16x256xf32>
    %c64_i32 = arith.constant 64 : i32
    %183 = tpu.dynamic_rotate %178 by %c64_i32 dim 1 : vector<16x256xf32>, i32 -> vector<16x256xf32>
    %c19 = arith.constant 19 : index
    %c0_96 = arith.constant 0 : index
    %184 = vector.load %arg2[%c19, %c0_96] : memref<40x256xf32, #tpu.memory_space<vmem>>, vector<1x256xf32>
    %185 = vector.broadcast %184 : vector<1x256xf32> to vector<16x256xf32>
    %186 = arith.mulf %183, %185 : vector<16x256xf32>
    %c60_i32 = arith.constant 60 : i32
    %187 = tpu.dynamic_rotate %178 by %c60_i32 dim 1 : vector<16x256xf32>, i32 -> vector<16x256xf32>
    %c20 = arith.constant 20 : index
    %c0_97 = arith.constant 0 : index
    %188 = vector.load %arg2[%c20, %c0_97] : memref<40x256xf32, #tpu.memory_space<vmem>>, vector<1x256xf32>
    %189 = vector.broadcast %188 : vector<1x256xf32> to vector<16x256xf32>
    %190 = arith.mulf %187, %189 : vector<16x256xf32>
    %c4_i32 = arith.constant 4 : i32
    %191 = tpu.dynamic_rotate %178 by %c4_i32 dim 1 : vector<16x256xf32>, i32 -> vector<16x256xf32>
    %c21 = arith.constant 21 : index
    %c0_98 = arith.constant 0 : index
    %192 = vector.load %arg2[%c21, %c0_98] : memref<40x256xf32, #tpu.memory_space<vmem>>, vector<1x256xf32>
    %193 = vector.broadcast %192 : vector<1x256xf32> to vector<16x256xf32>
    %194 = arith.mulf %191, %193 : vector<16x256xf32>
    %c252_i32 = arith.constant 252 : i32
    %195 = tpu.dynamic_rotate %178 by %c252_i32 dim 1 : vector<16x256xf32>, i32 -> vector<16x256xf32>
    %c23 = arith.constant 23 : index
    %c0_99 = arith.constant 0 : index
    %196 = vector.load %arg2[%c23, %c0_99] : memref<40x256xf32, #tpu.memory_space<vmem>>, vector<1x256xf32>
    %197 = vector.broadcast %196 : vector<1x256xf32> to vector<16x256xf32>
    %198 = arith.mulf %195, %197 : vector<16x256xf32>
    %c196_i32 = arith.constant 196 : i32
    %199 = tpu.dynamic_rotate %178 by %c196_i32 dim 1 : vector<16x256xf32>, i32 -> vector<16x256xf32>
    %c24 = arith.constant 24 : index
    %c0_100 = arith.constant 0 : index
    %200 = vector.load %arg2[%c24, %c0_100] : memref<40x256xf32, #tpu.memory_space<vmem>>, vector<1x256xf32>
    %201 = vector.broadcast %200 : vector<1x256xf32> to vector<16x256xf32>
    %202 = arith.mulf %199, %201 : vector<16x256xf32>
    %c192_i32 = arith.constant 192 : i32
    %203 = tpu.dynamic_rotate %178 by %c192_i32 dim 1 : vector<16x256xf32>, i32 -> vector<16x256xf32>
    %c25 = arith.constant 25 : index
    %c0_101 = arith.constant 0 : index
    %204 = vector.load %arg2[%c25, %c0_101] : memref<40x256xf32, #tpu.memory_space<vmem>>, vector<1x256xf32>
    %205 = vector.broadcast %204 : vector<1x256xf32> to vector<16x256xf32>
    %206 = arith.mulf %203, %205 : vector<16x256xf32>
    %c188_i32 = arith.constant 188 : i32
    %207 = tpu.dynamic_rotate %178 by %c188_i32 dim 1 : vector<16x256xf32>, i32 -> vector<16x256xf32>
    %c26 = arith.constant 26 : index
    %c0_102 = arith.constant 0 : index
    %208 = vector.load %arg2[%c26, %c0_102] : memref<40x256xf32, #tpu.memory_space<vmem>>, vector<1x256xf32>
    %209 = vector.broadcast %208 : vector<1x256xf32> to vector<16x256xf32>
    %210 = arith.mulf %207, %209 : vector<16x256xf32>
    %211 = tpu.concatenate %182, %186, %190, %194, %178, %198, %202, %206, %210 in 0 : vector<16x256xf32>, vector<16x256xf32>, vector<16x256xf32>, vector<16x256xf32>, vector<16x256xf32>, vector<16x256xf32>, vector<16x256xf32>, vector<16x256xf32>, vector<16x256xf32> -> vector<144x256xf32>
    %212 = arith.truncf %211 : vector<144x256xf32> to vector<144x256xbf16>
    %c48 = arith.constant 48 : index
    %c0_103 = arith.constant 0 : index
    %213 = vector.load %arg3[%c48, %c0_103] : memref<168x512xbf16, #tpu.memory_space<vmem>>, vector<32x144xbf16>
    %cst_104 = arith.constant dense<0.000000e+00> : vector<32x256xf32>
    %214 = tpu.matmul %213, %212, %cst_104 {dimension_numbers = #tpu.dot_dimension_numbers<[1], [0], [0], [1], [0, 0, 1, 1], [], []>} : vector<32x144xbf16>, vector<144x256xbf16>, vector<32x256xf32> -> vector<32x256xf32>
    %c48_105 = arith.constant 48 : index
    %c0_106 = arith.constant 0 : index
    %215 = vector.load %arg4[%c48_105, %c0_106] : memref<168x1xf32, #tpu.memory_space<vmem>>, vector<32x1xf32>
    %216 = vector.broadcast %215 : vector<32x1xf32> to vector<32x256xf32>
    %217 = arith.addf %214, %216 : vector<32x256xf32>
    %cst_107 = arith.constant 0.000000e+00 : f32
    %218 = vector.broadcast %cst_107 : f32 to vector<32x256xf32>
    %219 = arith.maximumf %217, %218 : vector<32x256xf32>
    %c68_i32_108 = arith.constant 68 : i32
    %220 = tpu.dynamic_rotate %219 by %c68_i32_108 dim 1 : vector<32x256xf32>, i32 -> vector<32x256xf32>
    %c18_109 = arith.constant 18 : index
    %c0_110 = arith.constant 0 : index
    %221 = vector.load %arg2[%c18_109, %c0_110] : memref<40x256xf32, #tpu.memory_space<vmem>>, vector<1x256xf32>
    %222 = vector.broadcast %221 : vector<1x256xf32> to vector<32x256xf32>
    %223 = arith.mulf %220, %222 : vector<32x256xf32>
    %c64_i32_111 = arith.constant 64 : i32
    %224 = tpu.dynamic_rotate %219 by %c64_i32_111 dim 1 : vector<32x256xf32>, i32 -> vector<32x256xf32>
    %c19_112 = arith.constant 19 : index
    %c0_113 = arith.constant 0 : index
    %225 = vector.load %arg2[%c19_112, %c0_113] : memref<40x256xf32, #tpu.memory_space<vmem>>, vector<1x256xf32>
    %226 = vector.broadcast %225 : vector<1x256xf32> to vector<32x256xf32>
    %227 = arith.mulf %224, %226 : vector<32x256xf32>
    %c60_i32_114 = arith.constant 60 : i32
    %228 = tpu.dynamic_rotate %219 by %c60_i32_114 dim 1 : vector<32x256xf32>, i32 -> vector<32x256xf32>
    %c20_115 = arith.constant 20 : index
    %c0_116 = arith.constant 0 : index
    %229 = vector.load %arg2[%c20_115, %c0_116] : memref<40x256xf32, #tpu.memory_space<vmem>>, vector<1x256xf32>
    %230 = vector.broadcast %229 : vector<1x256xf32> to vector<32x256xf32>
    %231 = arith.mulf %228, %230 : vector<32x256xf32>
    %c4_i32_117 = arith.constant 4 : i32
    %232 = tpu.dynamic_rotate %219 by %c4_i32_117 dim 1 : vector<32x256xf32>, i32 -> vector<32x256xf32>
    %c21_118 = arith.constant 21 : index
    %c0_119 = arith.constant 0 : index
    %233 = vector.load %arg2[%c21_118, %c0_119] : memref<40x256xf32, #tpu.memory_space<vmem>>, vector<1x256xf32>
    %234 = vector.broadcast %233 : vector<1x256xf32> to vector<32x256xf32>
    %235 = arith.mulf %232, %234 : vector<32x256xf32>
    %c252_i32_120 = arith.constant 252 : i32
    %236 = tpu.dynamic_rotate %219 by %c252_i32_120 dim 1 : vector<32x256xf32>, i32 -> vector<32x256xf32>
    %c23_121 = arith.constant 23 : index
    %c0_122 = arith.constant 0 : index
    %237 = vector.load %arg2[%c23_121, %c0_122] : memref<40x256xf32, #tpu.memory_space<vmem>>, vector<1x256xf32>
    %238 = vector.broadcast %237 : vector<1x256xf32> to vector<32x256xf32>
    %239 = arith.mulf %236, %238 : vector<32x256xf32>
    %c196_i32_123 = arith.constant 196 : i32
    %240 = tpu.dynamic_rotate %219 by %c196_i32_123 dim 1 : vector<32x256xf32>, i32 -> vector<32x256xf32>
    %c24_124 = arith.constant 24 : index
    %c0_125 = arith.constant 0 : index
    %241 = vector.load %arg2[%c24_124, %c0_125] : memref<40x256xf32, #tpu.memory_space<vmem>>, vector<1x256xf32>
    %242 = vector.broadcast %241 : vector<1x256xf32> to vector<32x256xf32>
    %243 = arith.mulf %240, %242 : vector<32x256xf32>
    %c192_i32_126 = arith.constant 192 : i32
    %244 = tpu.dynamic_rotate %219 by %c192_i32_126 dim 1 : vector<32x256xf32>, i32 -> vector<32x256xf32>
    %c25_127 = arith.constant 25 : index
    %c0_128 = arith.constant 0 : index
    %245 = vector.load %arg2[%c25_127, %c0_128] : memref<40x256xf32, #tpu.memory_space<vmem>>, vector<1x256xf32>
    %246 = vector.broadcast %245 : vector<1x256xf32> to vector<32x256xf32>
    %247 = arith.mulf %244, %246 : vector<32x256xf32>
    %c188_i32_129 = arith.constant 188 : i32
    %248 = tpu.dynamic_rotate %219 by %c188_i32_129 dim 1 : vector<32x256xf32>, i32 -> vector<32x256xf32>
    %c26_130 = arith.constant 26 : index
    %c0_131 = arith.constant 0 : index
    %249 = vector.load %arg2[%c26_130, %c0_131] : memref<40x256xf32, #tpu.memory_space<vmem>>, vector<1x256xf32>
    %250 = vector.broadcast %249 : vector<1x256xf32> to vector<32x256xf32>
    %251 = arith.mulf %248, %250 : vector<32x256xf32>
    %252 = tpu.concatenate %223, %227, %231, %235, %219, %239, %243, %247, %251 in 0 : vector<32x256xf32>, vector<32x256xf32>, vector<32x256xf32>, vector<32x256xf32>, vector<32x256xf32>, vector<32x256xf32>, vector<32x256xf32>, vector<32x256xf32>, vector<32x256xf32> -> vector<288x256xf32>
    %253 = arith.truncf %252 : vector<288x256xf32> to vector<288x256xbf16>
    %c80 = arith.constant 80 : index
    %c0_132 = arith.constant 0 : index
    %254 = vector.load %arg3[%c80, %c0_132] : memref<168x512xbf16, #tpu.memory_space<vmem>>, vector<32x288xbf16>
    %cst_133 = arith.constant dense<0.000000e+00> : vector<32x256xf32>
    %255 = tpu.matmul %254, %253, %cst_133 {dimension_numbers = #tpu.dot_dimension_numbers<[1], [0], [0], [1], [0, 0, 1, 1], [], []>} : vector<32x288xbf16>, vector<288x256xbf16>, vector<32x256xf32> -> vector<32x256xf32>
    %c80_134 = arith.constant 80 : index
    %c0_135 = arith.constant 0 : index
    %256 = vector.load %arg4[%c80_134, %c0_135] : memref<168x1xf32, #tpu.memory_space<vmem>>, vector<32x1xf32>
    %257 = vector.broadcast %256 : vector<32x1xf32> to vector<32x256xf32>
    %258 = arith.addf %255, %257 : vector<32x256xf32>
    %cst_136 = arith.constant 0.000000e+00 : f32
    %259 = vector.broadcast %cst_136 : f32 to vector<32x256xf32>
    %260 = arith.maximumf %258, %259 : vector<32x256xf32>
    %c27 = arith.constant 27 : index
    %c0_137 = arith.constant 0 : index
    %261 = vector.load %arg2[%c27, %c0_137] : memref<40x256xf32, #tpu.memory_space<vmem>>, vector<1x256xf32>
    %262 = vector.broadcast %261 : vector<1x256xf32> to vector<32x256xf32>
    %263 = arith.mulf %260, %262 : vector<32x256xf32>
    %c2_i32_138 = arith.constant 2 : i32
    %264 = tpu.dynamic_rotate %260 by %c2_i32_138 dim 1 : vector<32x256xf32>, i32 -> vector<32x256xf32>
    %c28 = arith.constant 28 : index
    %c0_139 = arith.constant 0 : index
    %265 = vector.load %arg2[%c28, %c0_139] : memref<40x256xf32, #tpu.memory_space<vmem>>, vector<1x256xf32>
    %266 = vector.broadcast %265 : vector<1x256xf32> to vector<32x256xf32>
    %267 = arith.mulf %264, %266 : vector<32x256xf32>
    %268 = arith.addf %263, %267 : vector<32x256xf32>
    %c32_i32_140 = arith.constant 32 : i32
    %269 = tpu.dynamic_rotate %260 by %c32_i32_140 dim 1 : vector<32x256xf32>, i32 -> vector<32x256xf32>
    %c29 = arith.constant 29 : index
    %c0_141 = arith.constant 0 : index
    %270 = vector.load %arg2[%c29, %c0_141] : memref<40x256xf32, #tpu.memory_space<vmem>>, vector<1x256xf32>
    %271 = vector.broadcast %270 : vector<1x256xf32> to vector<32x256xf32>
    %272 = arith.mulf %269, %271 : vector<32x256xf32>
    %273 = arith.addf %268, %272 : vector<32x256xf32>
    %c34_i32_142 = arith.constant 34 : i32
    %274 = tpu.dynamic_rotate %260 by %c34_i32_142 dim 1 : vector<32x256xf32>, i32 -> vector<32x256xf32>
    %c30 = arith.constant 30 : index
    %c0_143 = arith.constant 0 : index
    %275 = vector.load %arg2[%c30, %c0_143] : memref<40x256xf32, #tpu.memory_space<vmem>>, vector<1x256xf32>
    %276 = vector.broadcast %275 : vector<1x256xf32> to vector<32x256xf32>
    %277 = arith.mulf %274, %276 : vector<32x256xf32>
    %278 = arith.addf %273, %277 : vector<32x256xf32>
    %c34_i32_144 = arith.constant 34 : i32
    %279 = tpu.dynamic_rotate %278 by %c34_i32_144 dim 1 : vector<32x256xf32>, i32 -> vector<32x256xf32>
    %c9_145 = arith.constant 9 : index
    %c0_146 = arith.constant 0 : index
    %280 = vector.load %arg2[%c9_145, %c0_146] : memref<40x256xf32, #tpu.memory_space<vmem>>, vector<1x256xf32>
    %281 = vector.broadcast %280 : vector<1x256xf32> to vector<32x256xf32>
    %282 = arith.mulf %279, %281 : vector<32x256xf32>
    %c32_i32_147 = arith.constant 32 : i32
    %283 = tpu.dynamic_rotate %278 by %c32_i32_147 dim 1 : vector<32x256xf32>, i32 -> vector<32x256xf32>
    %c10_148 = arith.constant 10 : index
    %c0_149 = arith.constant 0 : index
    %284 = vector.load %arg2[%c10_148, %c0_149] : memref<40x256xf32, #tpu.memory_space<vmem>>, vector<1x256xf32>
    %285 = vector.broadcast %284 : vector<1x256xf32> to vector<32x256xf32>
    %286 = arith.mulf %283, %285 : vector<32x256xf32>
    %c30_i32_150 = arith.constant 30 : i32
    %287 = tpu.dynamic_rotate %278 by %c30_i32_150 dim 1 : vector<32x256xf32>, i32 -> vector<32x256xf32>
    %c11_151 = arith.constant 11 : index
    %c0_152 = arith.constant 0 : index
    %288 = vector.load %arg2[%c11_151, %c0_152] : memref<40x256xf32, #tpu.memory_space<vmem>>, vector<1x256xf32>
    %289 = vector.broadcast %288 : vector<1x256xf32> to vector<32x256xf32>
    %290 = arith.mulf %287, %289 : vector<32x256xf32>
    %c2_i32_153 = arith.constant 2 : i32
    %291 = tpu.dynamic_rotate %278 by %c2_i32_153 dim 1 : vector<32x256xf32>, i32 -> vector<32x256xf32>
    %c12_154 = arith.constant 12 : index
    %c0_155 = arith.constant 0 : index
    %292 = vector.load %arg2[%c12_154, %c0_155] : memref<40x256xf32, #tpu.memory_space<vmem>>, vector<1x256xf32>
    %293 = vector.broadcast %292 : vector<1x256xf32> to vector<32x256xf32>
    %294 = arith.mulf %291, %293 : vector<32x256xf32>
    %c254_i32_156 = arith.constant 254 : i32
    %295 = tpu.dynamic_rotate %278 by %c254_i32_156 dim 1 : vector<32x256xf32>, i32 -> vector<32x256xf32>
    %c14_157 = arith.constant 14 : index
    %c0_158 = arith.constant 0 : index
    %296 = vector.load %arg2[%c14_157, %c0_158] : memref<40x256xf32, #tpu.memory_space<vmem>>, vector<1x256xf32>
    %297 = vector.broadcast %296 : vector<1x256xf32> to vector<32x256xf32>
    %298 = arith.mulf %295, %297 : vector<32x256xf32>
    %c226_i32_159 = arith.constant 226 : i32
    %299 = tpu.dynamic_rotate %278 by %c226_i32_159 dim 1 : vector<32x256xf32>, i32 -> vector<32x256xf32>
    %c15_160 = arith.constant 15 : index
    %c0_161 = arith.constant 0 : index
    %300 = vector.load %arg2[%c15_160, %c0_161] : memref<40x256xf32, #tpu.memory_space<vmem>>, vector<1x256xf32>
    %301 = vector.broadcast %300 : vector<1x256xf32> to vector<32x256xf32>
    %302 = arith.mulf %299, %301 : vector<32x256xf32>
    %c224_i32_162 = arith.constant 224 : i32
    %303 = tpu.dynamic_rotate %278 by %c224_i32_162 dim 1 : vector<32x256xf32>, i32 -> vector<32x256xf32>
    %c16_163 = arith.constant 16 : index
    %c0_164 = arith.constant 0 : index
    %304 = vector.load %arg2[%c16_163, %c0_164] : memref<40x256xf32, #tpu.memory_space<vmem>>, vector<1x256xf32>
    %305 = vector.broadcast %304 : vector<1x256xf32> to vector<32x256xf32>
    %306 = arith.mulf %303, %305 : vector<32x256xf32>
    %c222_i32_165 = arith.constant 222 : i32
    %307 = tpu.dynamic_rotate %278 by %c222_i32_165 dim 1 : vector<32x256xf32>, i32 -> vector<32x256xf32>
    %c17_166 = arith.constant 17 : index
    %c0_167 = arith.constant 0 : index
    %308 = vector.load %arg2[%c17_166, %c0_167] : memref<40x256xf32, #tpu.memory_space<vmem>>, vector<1x256xf32>
    %309 = vector.broadcast %308 : vector<1x256xf32> to vector<32x256xf32>
    %310 = arith.mulf %307, %309 : vector<32x256xf32>
    %c34_i32_168 = arith.constant 34 : i32
    %311 = tpu.dynamic_rotate %172 by %c34_i32_168 dim 1 : vector<16x256xf32>, i32 -> vector<16x256xf32>
    %c9_169 = arith.constant 9 : index
    %c0_170 = arith.constant 0 : index
    %312 = vector.load %arg2[%c9_169, %c0_170] : memref<40x256xf32, #tpu.memory_space<vmem>>, vector<1x256xf32>
    %313 = vector.broadcast %312 : vector<1x256xf32> to vector<16x256xf32>
    %314 = arith.mulf %311, %313 : vector<16x256xf32>
    %c32_i32_171 = arith.constant 32 : i32
    %315 = tpu.dynamic_rotate %172 by %c32_i32_171 dim 1 : vector<16x256xf32>, i32 -> vector<16x256xf32>
    %c10_172 = arith.constant 10 : index
    %c0_173 = arith.constant 0 : index
    %316 = vector.load %arg2[%c10_172, %c0_173] : memref<40x256xf32, #tpu.memory_space<vmem>>, vector<1x256xf32>
    %317 = vector.broadcast %316 : vector<1x256xf32> to vector<16x256xf32>
    %318 = arith.mulf %315, %317 : vector<16x256xf32>
    %c30_i32_174 = arith.constant 30 : i32
    %319 = tpu.dynamic_rotate %172 by %c30_i32_174 dim 1 : vector<16x256xf32>, i32 -> vector<16x256xf32>
    %c11_175 = arith.constant 11 : index
    %c0_176 = arith.constant 0 : index
    %320 = vector.load %arg2[%c11_175, %c0_176] : memref<40x256xf32, #tpu.memory_space<vmem>>, vector<1x256xf32>
    %321 = vector.broadcast %320 : vector<1x256xf32> to vector<16x256xf32>
    %322 = arith.mulf %319, %321 : vector<16x256xf32>
    %c2_i32_177 = arith.constant 2 : i32
    %323 = tpu.dynamic_rotate %172 by %c2_i32_177 dim 1 : vector<16x256xf32>, i32 -> vector<16x256xf32>
    %c12_178 = arith.constant 12 : index
    %c0_179 = arith.constant 0 : index
    %324 = vector.load %arg2[%c12_178, %c0_179] : memref<40x256xf32, #tpu.memory_space<vmem>>, vector<1x256xf32>
    %325 = vector.broadcast %324 : vector<1x256xf32> to vector<16x256xf32>
    %326 = arith.mulf %323, %325 : vector<16x256xf32>
    %c254_i32_180 = arith.constant 254 : i32
    %327 = tpu.dynamic_rotate %172 by %c254_i32_180 dim 1 : vector<16x256xf32>, i32 -> vector<16x256xf32>
    %c14_181 = arith.constant 14 : index
    %c0_182 = arith.constant 0 : index
    %328 = vector.load %arg2[%c14_181, %c0_182] : memref<40x256xf32, #tpu.memory_space<vmem>>, vector<1x256xf32>
    %329 = vector.broadcast %328 : vector<1x256xf32> to vector<16x256xf32>
    %330 = arith.mulf %327, %329 : vector<16x256xf32>
    %c226_i32_183 = arith.constant 226 : i32
    %331 = tpu.dynamic_rotate %172 by %c226_i32_183 dim 1 : vector<16x256xf32>, i32 -> vector<16x256xf32>
    %c15_184 = arith.constant 15 : index
    %c0_185 = arith.constant 0 : index
    %332 = vector.load %arg2[%c15_184, %c0_185] : memref<40x256xf32, #tpu.memory_space<vmem>>, vector<1x256xf32>
    %333 = vector.broadcast %332 : vector<1x256xf32> to vector<16x256xf32>
    %334 = arith.mulf %331, %333 : vector<16x256xf32>
    %c224_i32_186 = arith.constant 224 : i32
    %335 = tpu.dynamic_rotate %172 by %c224_i32_186 dim 1 : vector<16x256xf32>, i32 -> vector<16x256xf32>
    %c16_187 = arith.constant 16 : index
    %c0_188 = arith.constant 0 : index
    %336 = vector.load %arg2[%c16_187, %c0_188] : memref<40x256xf32, #tpu.memory_space<vmem>>, vector<1x256xf32>
    %337 = vector.broadcast %336 : vector<1x256xf32> to vector<16x256xf32>
    %338 = arith.mulf %335, %337 : vector<16x256xf32>
    %c222_i32_189 = arith.constant 222 : i32
    %339 = tpu.dynamic_rotate %172 by %c222_i32_189 dim 1 : vector<16x256xf32>, i32 -> vector<16x256xf32>
    %c17_190 = arith.constant 17 : index
    %c0_191 = arith.constant 0 : index
    %340 = vector.load %arg2[%c17_190, %c0_191] : memref<40x256xf32, #tpu.memory_space<vmem>>, vector<1x256xf32>
    %341 = vector.broadcast %340 : vector<1x256xf32> to vector<16x256xf32>
    %342 = arith.mulf %339, %341 : vector<16x256xf32>
    %343 = tpu.concatenate %282, %286, %290, %294, %278, %298, %302, %306, %310, %314, %318, %322, %326, %172, %330, %334 in 0 : vector<32x256xf32>, vector<32x256xf32>, vector<32x256xf32>, vector<32x256xf32>, vector<32x256xf32>, vector<32x256xf32>, vector<32x256xf32>, vector<32x256xf32>, vector<32x256xf32>, vector<16x256xf32>, vector<16x256xf32>, vector<16x256xf32>, vector<16x256xf32>, vector<16x256xf32>, vector<16x256xf32>, vector<16x256xf32> -> vector<400x256xf32>
    %344 = tpu.concatenate %338, %342 in 0 : vector<16x256xf32>, vector<16x256xf32> -> vector<32x256xf32>
    %345 = tpu.concatenate %343, %344 in 0 : vector<400x256xf32>, vector<32x256xf32> -> vector<432x256xf32>
    %346 = arith.truncf %345 : vector<432x256xf32> to vector<432x256xbf16>
    %c112 = arith.constant 112 : index
    %c0_192 = arith.constant 0 : index
    %347 = vector.load %arg3[%c112, %c0_192] : memref<168x512xbf16, #tpu.memory_space<vmem>>, vector<16x432xbf16>
    %cst_193 = arith.constant dense<0.000000e+00> : vector<16x256xf32>
    %348 = tpu.matmul %347, %346, %cst_193 {dimension_numbers = #tpu.dot_dimension_numbers<[1], [0], [0], [1], [0, 0, 1, 1], [], []>} : vector<16x432xbf16>, vector<432x256xbf16>, vector<16x256xf32> -> vector<16x256xf32>
    %c112_194 = arith.constant 112 : index
    %c0_195 = arith.constant 0 : index
    %349 = vector.load %arg4[%c112_194, %c0_195] : memref<168x1xf32, #tpu.memory_space<vmem>>, vector<16x1xf32>
    %350 = vector.broadcast %349 : vector<16x1xf32> to vector<16x256xf32>
    %351 = arith.addf %348, %350 : vector<16x256xf32>
    %cst_196 = arith.constant 0.000000e+00 : f32
    %352 = vector.broadcast %cst_196 : f32 to vector<16x256xf32>
    %353 = arith.maximumf %351, %352 : vector<16x256xf32>
    %c34_i32_197 = arith.constant 34 : i32
    %354 = tpu.dynamic_rotate %353 by %c34_i32_197 dim 1 : vector<16x256xf32>, i32 -> vector<16x256xf32>
    %c9_198 = arith.constant 9 : index
    %c0_199 = arith.constant 0 : index
    %355 = vector.load %arg2[%c9_198, %c0_199] : memref<40x256xf32, #tpu.memory_space<vmem>>, vector<1x256xf32>
    %356 = vector.broadcast %355 : vector<1x256xf32> to vector<16x256xf32>
    %357 = arith.mulf %354, %356 : vector<16x256xf32>
    %c32_i32_200 = arith.constant 32 : i32
    %358 = tpu.dynamic_rotate %353 by %c32_i32_200 dim 1 : vector<16x256xf32>, i32 -> vector<16x256xf32>
    %c10_201 = arith.constant 10 : index
    %c0_202 = arith.constant 0 : index
    %359 = vector.load %arg2[%c10_201, %c0_202] : memref<40x256xf32, #tpu.memory_space<vmem>>, vector<1x256xf32>
    %360 = vector.broadcast %359 : vector<1x256xf32> to vector<16x256xf32>
    %361 = arith.mulf %358, %360 : vector<16x256xf32>
    %c30_i32_203 = arith.constant 30 : i32
    %362 = tpu.dynamic_rotate %353 by %c30_i32_203 dim 1 : vector<16x256xf32>, i32 -> vector<16x256xf32>
    %c11_204 = arith.constant 11 : index
    %c0_205 = arith.constant 0 : index
    %363 = vector.load %arg2[%c11_204, %c0_205] : memref<40x256xf32, #tpu.memory_space<vmem>>, vector<1x256xf32>
    %364 = vector.broadcast %363 : vector<1x256xf32> to vector<16x256xf32>
    %365 = arith.mulf %362, %364 : vector<16x256xf32>
    %c2_i32_206 = arith.constant 2 : i32
    %366 = tpu.dynamic_rotate %353 by %c2_i32_206 dim 1 : vector<16x256xf32>, i32 -> vector<16x256xf32>
    %c12_207 = arith.constant 12 : index
    %c0_208 = arith.constant 0 : index
    %367 = vector.load %arg2[%c12_207, %c0_208] : memref<40x256xf32, #tpu.memory_space<vmem>>, vector<1x256xf32>
    %368 = vector.broadcast %367 : vector<1x256xf32> to vector<16x256xf32>
    %369 = arith.mulf %366, %368 : vector<16x256xf32>
    %c254_i32_209 = arith.constant 254 : i32
    %370 = tpu.dynamic_rotate %353 by %c254_i32_209 dim 1 : vector<16x256xf32>, i32 -> vector<16x256xf32>
    %c14_210 = arith.constant 14 : index
    %c0_211 = arith.constant 0 : index
    %371 = vector.load %arg2[%c14_210, %c0_211] : memref<40x256xf32, #tpu.memory_space<vmem>>, vector<1x256xf32>
    %372 = vector.broadcast %371 : vector<1x256xf32> to vector<16x256xf32>
    %373 = arith.mulf %370, %372 : vector<16x256xf32>
    %c226_i32_212 = arith.constant 226 : i32
    %374 = tpu.dynamic_rotate %353 by %c226_i32_212 dim 1 : vector<16x256xf32>, i32 -> vector<16x256xf32>
    %c15_213 = arith.constant 15 : index
    %c0_214 = arith.constant 0 : index
    %375 = vector.load %arg2[%c15_213, %c0_214] : memref<40x256xf32, #tpu.memory_space<vmem>>, vector<1x256xf32>
    %376 = vector.broadcast %375 : vector<1x256xf32> to vector<16x256xf32>
    %377 = arith.mulf %374, %376 : vector<16x256xf32>
    %c224_i32_215 = arith.constant 224 : i32
    %378 = tpu.dynamic_rotate %353 by %c224_i32_215 dim 1 : vector<16x256xf32>, i32 -> vector<16x256xf32>
    %c16_216 = arith.constant 16 : index
    %c0_217 = arith.constant 0 : index
    %379 = vector.load %arg2[%c16_216, %c0_217] : memref<40x256xf32, #tpu.memory_space<vmem>>, vector<1x256xf32>
    %380 = vector.broadcast %379 : vector<1x256xf32> to vector<16x256xf32>
    %381 = arith.mulf %378, %380 : vector<16x256xf32>
    %c222_i32_218 = arith.constant 222 : i32
    %382 = tpu.dynamic_rotate %353 by %c222_i32_218 dim 1 : vector<16x256xf32>, i32 -> vector<16x256xf32>
    %c17_219 = arith.constant 17 : index
    %c0_220 = arith.constant 0 : index
    %383 = vector.load %arg2[%c17_219, %c0_220] : memref<40x256xf32, #tpu.memory_space<vmem>>, vector<1x256xf32>
    %384 = vector.broadcast %383 : vector<1x256xf32> to vector<16x256xf32>
    %385 = arith.mulf %382, %384 : vector<16x256xf32>
    %386 = tpu.concatenate %357, %361, %365, %369, %353, %373, %377, %381, %385 in 0 : vector<16x256xf32>, vector<16x256xf32>, vector<16x256xf32>, vector<16x256xf32>, vector<16x256xf32>, vector<16x256xf32>, vector<16x256xf32>, vector<16x256xf32>, vector<16x256xf32> -> vector<144x256xf32>
    %387 = arith.truncf %386 : vector<144x256xf32> to vector<144x256xbf16>
    %c128 = arith.constant 128 : index
    %c0_221 = arith.constant 0 : index
    %388 = vector.load %arg3[%c128, %c0_221] : memref<168x512xbf16, #tpu.memory_space<vmem>>, vector<16x144xbf16>
    %cst_222 = arith.constant dense<0.000000e+00> : vector<16x256xf32>
    %389 = tpu.matmul %388, %387, %cst_222 {dimension_numbers = #tpu.dot_dimension_numbers<[1], [0], [0], [1], [0, 0, 1, 1], [], []>} : vector<16x144xbf16>, vector<144x256xbf16>, vector<16x256xf32> -> vector<16x256xf32>
    %c128_223 = arith.constant 128 : index
    %c0_224 = arith.constant 0 : index
    %390 = vector.load %arg4[%c128_223, %c0_224] : memref<168x1xf32, #tpu.memory_space<vmem>>, vector<16x1xf32>
    %391 = vector.broadcast %390 : vector<16x1xf32> to vector<16x256xf32>
    %392 = arith.addf %389, %391 : vector<16x256xf32>
    %cst_225 = arith.constant 0.000000e+00 : f32
    %393 = vector.broadcast %cst_225 : f32 to vector<16x256xf32>
    %394 = arith.maximumf %392, %393 : vector<16x256xf32>
    %c31 = arith.constant 31 : index
    %c0_226 = arith.constant 0 : index
    %395 = vector.load %arg2[%c31, %c0_226] : memref<40x256xf32, #tpu.memory_space<vmem>>, vector<1x256xf32>
    %396 = vector.broadcast %395 : vector<1x256xf32> to vector<16x256xf32>
    %397 = arith.mulf %394, %396 : vector<16x256xf32>
    %c1_i32_227 = arith.constant 1 : i32
    %398 = tpu.dynamic_rotate %394 by %c1_i32_227 dim 1 : vector<16x256xf32>, i32 -> vector<16x256xf32>
    %c32_228 = arith.constant 32 : index
    %c0_229 = arith.constant 0 : index
    %399 = vector.load %arg2[%c32_228, %c0_229] : memref<40x256xf32, #tpu.memory_space<vmem>>, vector<1x256xf32>
    %400 = vector.broadcast %399 : vector<1x256xf32> to vector<16x256xf32>
    %401 = arith.mulf %398, %400 : vector<16x256xf32>
    %402 = arith.addf %397, %401 : vector<16x256xf32>
    %c16_i32_230 = arith.constant 16 : i32
    %403 = tpu.dynamic_rotate %394 by %c16_i32_230 dim 1 : vector<16x256xf32>, i32 -> vector<16x256xf32>
    %c33 = arith.constant 33 : index
    %c0_231 = arith.constant 0 : index
    %404 = vector.load %arg2[%c33, %c0_231] : memref<40x256xf32, #tpu.memory_space<vmem>>, vector<1x256xf32>
    %405 = vector.broadcast %404 : vector<1x256xf32> to vector<16x256xf32>
    %406 = arith.mulf %403, %405 : vector<16x256xf32>
    %407 = arith.addf %402, %406 : vector<16x256xf32>
    %c17_i32_232 = arith.constant 17 : i32
    %408 = tpu.dynamic_rotate %394 by %c17_i32_232 dim 1 : vector<16x256xf32>, i32 -> vector<16x256xf32>
    %c34 = arith.constant 34 : index
    %c0_233 = arith.constant 0 : index
    %409 = vector.load %arg2[%c34, %c0_233] : memref<40x256xf32, #tpu.memory_space<vmem>>, vector<1x256xf32>
    %410 = vector.broadcast %409 : vector<1x256xf32> to vector<16x256xf32>
    %411 = arith.mulf %408, %410 : vector<16x256xf32>
    %412 = arith.addf %407, %411 : vector<16x256xf32>
    %c17_i32_234 = arith.constant 17 : i32
    %413 = tpu.dynamic_rotate %412 by %c17_i32_234 dim 1 : vector<16x256xf32>, i32 -> vector<16x256xf32>
    %c0_235 = arith.constant 0 : index
    %c0_236 = arith.constant 0 : index
    %414 = vector.load %arg2[%c0_235, %c0_236] : memref<40x256xf32, #tpu.memory_space<vmem>>, vector<1x256xf32>
    %415 = vector.broadcast %414 : vector<1x256xf32> to vector<16x256xf32>
    %416 = arith.mulf %413, %415 : vector<16x256xf32>
    %c16_i32_237 = arith.constant 16 : i32
    %417 = tpu.dynamic_rotate %412 by %c16_i32_237 dim 1 : vector<16x256xf32>, i32 -> vector<16x256xf32>
    %c1_238 = arith.constant 1 : index
    %c0_239 = arith.constant 0 : index
    %418 = vector.load %arg2[%c1_238, %c0_239] : memref<40x256xf32, #tpu.memory_space<vmem>>, vector<1x256xf32>
    %419 = vector.broadcast %418 : vector<1x256xf32> to vector<16x256xf32>
    %420 = arith.mulf %417, %419 : vector<16x256xf32>
    %c15_i32_240 = arith.constant 15 : i32
    %421 = tpu.dynamic_rotate %412 by %c15_i32_240 dim 1 : vector<16x256xf32>, i32 -> vector<16x256xf32>
    %c2_241 = arith.constant 2 : index
    %c0_242 = arith.constant 0 : index
    %422 = vector.load %arg2[%c2_241, %c0_242] : memref<40x256xf32, #tpu.memory_space<vmem>>, vector<1x256xf32>
    %423 = vector.broadcast %422 : vector<1x256xf32> to vector<16x256xf32>
    %424 = arith.mulf %421, %423 : vector<16x256xf32>
    %c1_i32_243 = arith.constant 1 : i32
    %425 = tpu.dynamic_rotate %412 by %c1_i32_243 dim 1 : vector<16x256xf32>, i32 -> vector<16x256xf32>
    %c3_244 = arith.constant 3 : index
    %c0_245 = arith.constant 0 : index
    %426 = vector.load %arg2[%c3_244, %c0_245] : memref<40x256xf32, #tpu.memory_space<vmem>>, vector<1x256xf32>
    %427 = vector.broadcast %426 : vector<1x256xf32> to vector<16x256xf32>
    %428 = arith.mulf %425, %427 : vector<16x256xf32>
    %c255_i32_246 = arith.constant 255 : i32
    %429 = tpu.dynamic_rotate %412 by %c255_i32_246 dim 1 : vector<16x256xf32>, i32 -> vector<16x256xf32>
    %c5_247 = arith.constant 5 : index
    %c0_248 = arith.constant 0 : index
    %430 = vector.load %arg2[%c5_247, %c0_248] : memref<40x256xf32, #tpu.memory_space<vmem>>, vector<1x256xf32>
    %431 = vector.broadcast %430 : vector<1x256xf32> to vector<16x256xf32>
    %432 = arith.mulf %429, %431 : vector<16x256xf32>
    %c241_i32_249 = arith.constant 241 : i32
    %433 = tpu.dynamic_rotate %412 by %c241_i32_249 dim 1 : vector<16x256xf32>, i32 -> vector<16x256xf32>
    %c6_250 = arith.constant 6 : index
    %c0_251 = arith.constant 0 : index
    %434 = vector.load %arg2[%c6_250, %c0_251] : memref<40x256xf32, #tpu.memory_space<vmem>>, vector<1x256xf32>
    %435 = vector.broadcast %434 : vector<1x256xf32> to vector<16x256xf32>
    %436 = arith.mulf %433, %435 : vector<16x256xf32>
    %c240_i32_252 = arith.constant 240 : i32
    %437 = tpu.dynamic_rotate %412 by %c240_i32_252 dim 1 : vector<16x256xf32>, i32 -> vector<16x256xf32>
    %c7_253 = arith.constant 7 : index
    %c0_254 = arith.constant 0 : index
    %438 = vector.load %arg2[%c7_253, %c0_254] : memref<40x256xf32, #tpu.memory_space<vmem>>, vector<1x256xf32>
    %439 = vector.broadcast %438 : vector<1x256xf32> to vector<16x256xf32>
    %440 = arith.mulf %437, %439 : vector<16x256xf32>
    %c239_i32_255 = arith.constant 239 : i32
    %441 = tpu.dynamic_rotate %412 by %c239_i32_255 dim 1 : vector<16x256xf32>, i32 -> vector<16x256xf32>
    %c8_256 = arith.constant 8 : index
    %c0_257 = arith.constant 0 : index
    %442 = vector.load %arg2[%c8_256, %c0_257] : memref<40x256xf32, #tpu.memory_space<vmem>>, vector<1x256xf32>
    %443 = vector.broadcast %442 : vector<1x256xf32> to vector<16x256xf32>
    %444 = arith.mulf %441, %443 : vector<16x256xf32>
    %c17_i32_258 = arith.constant 17 : i32
    %445 = tpu.dynamic_rotate %84 by %c17_i32_258 dim 1 : vector<8x256xf32>, i32 -> vector<8x256xf32>
    %c0_259 = arith.constant 0 : index
    %c0_260 = arith.constant 0 : index
    %446 = vector.load %arg2[%c0_259, %c0_260] : memref<40x256xf32, #tpu.memory_space<vmem>>, vector<1x256xf32>
    %447 = vector.broadcast %446 : vector<1x256xf32> to vector<8x256xf32>
    %448 = arith.mulf %445, %447 : vector<8x256xf32>
    %c16_i32_261 = arith.constant 16 : i32
    %449 = tpu.dynamic_rotate %84 by %c16_i32_261 dim 1 : vector<8x256xf32>, i32 -> vector<8x256xf32>
    %c1_262 = arith.constant 1 : index
    %c0_263 = arith.constant 0 : index
    %450 = vector.load %arg2[%c1_262, %c0_263] : memref<40x256xf32, #tpu.memory_space<vmem>>, vector<1x256xf32>
    %451 = vector.broadcast %450 : vector<1x256xf32> to vector<8x256xf32>
    %452 = arith.mulf %449, %451 : vector<8x256xf32>
    %c15_i32_264 = arith.constant 15 : i32
    %453 = tpu.dynamic_rotate %84 by %c15_i32_264 dim 1 : vector<8x256xf32>, i32 -> vector<8x256xf32>
    %c2_265 = arith.constant 2 : index
    %c0_266 = arith.constant 0 : index
    %454 = vector.load %arg2[%c2_265, %c0_266] : memref<40x256xf32, #tpu.memory_space<vmem>>, vector<1x256xf32>
    %455 = vector.broadcast %454 : vector<1x256xf32> to vector<8x256xf32>
    %456 = arith.mulf %453, %455 : vector<8x256xf32>
    %c1_i32_267 = arith.constant 1 : i32
    %457 = tpu.dynamic_rotate %84 by %c1_i32_267 dim 1 : vector<8x256xf32>, i32 -> vector<8x256xf32>
    %c3_268 = arith.constant 3 : index
    %c0_269 = arith.constant 0 : index
    %458 = vector.load %arg2[%c3_268, %c0_269] : memref<40x256xf32, #tpu.memory_space<vmem>>, vector<1x256xf32>
    %459 = vector.broadcast %458 : vector<1x256xf32> to vector<8x256xf32>
    %460 = arith.mulf %457, %459 : vector<8x256xf32>
    %c255_i32_270 = arith.constant 255 : i32
    %461 = tpu.dynamic_rotate %84 by %c255_i32_270 dim 1 : vector<8x256xf32>, i32 -> vector<8x256xf32>
    %c5_271 = arith.constant 5 : index
    %c0_272 = arith.constant 0 : index
    %462 = vector.load %arg2[%c5_271, %c0_272] : memref<40x256xf32, #tpu.memory_space<vmem>>, vector<1x256xf32>
    %463 = vector.broadcast %462 : vector<1x256xf32> to vector<8x256xf32>
    %464 = arith.mulf %461, %463 : vector<8x256xf32>
    %c241_i32_273 = arith.constant 241 : i32
    %465 = tpu.dynamic_rotate %84 by %c241_i32_273 dim 1 : vector<8x256xf32>, i32 -> vector<8x256xf32>
    %c6_274 = arith.constant 6 : index
    %c0_275 = arith.constant 0 : index
    %466 = vector.load %arg2[%c6_274, %c0_275] : memref<40x256xf32, #tpu.memory_space<vmem>>, vector<1x256xf32>
    %467 = vector.broadcast %466 : vector<1x256xf32> to vector<8x256xf32>
    %468 = arith.mulf %465, %467 : vector<8x256xf32>
    %c240_i32_276 = arith.constant 240 : i32
    %469 = tpu.dynamic_rotate %84 by %c240_i32_276 dim 1 : vector<8x256xf32>, i32 -> vector<8x256xf32>
    %c7_277 = arith.constant 7 : index
    %c0_278 = arith.constant 0 : index
    %470 = vector.load %arg2[%c7_277, %c0_278] : memref<40x256xf32, #tpu.memory_space<vmem>>, vector<1x256xf32>
    %471 = vector.broadcast %470 : vector<1x256xf32> to vector<8x256xf32>
    %472 = arith.mulf %469, %471 : vector<8x256xf32>
    %c239_i32_279 = arith.constant 239 : i32
    %473 = tpu.dynamic_rotate %84 by %c239_i32_279 dim 1 : vector<8x256xf32>, i32 -> vector<8x256xf32>
    %c8_280 = arith.constant 8 : index
    %c0_281 = arith.constant 0 : index
    %474 = vector.load %arg2[%c8_280, %c0_281] : memref<40x256xf32, #tpu.memory_space<vmem>>, vector<1x256xf32>
    %475 = vector.broadcast %474 : vector<1x256xf32> to vector<8x256xf32>
    %476 = arith.mulf %473, %475 : vector<8x256xf32>
    %477 = tpu.concatenate %416, %420, %424, %428, %412, %432, %436, %440, %444, %448, %452, %456, %460, %84, %464, %468 in 0 : vector<16x256xf32>, vector<16x256xf32>, vector<16x256xf32>, vector<16x256xf32>, vector<16x256xf32>, vector<16x256xf32>, vector<16x256xf32>, vector<16x256xf32>, vector<16x256xf32>, vector<8x256xf32>, vector<8x256xf32>, vector<8x256xf32>, vector<8x256xf32>, vector<8x256xf32>, vector<8x256xf32>, vector<8x256xf32> -> vector<200x256xf32>
    %478 = tpu.concatenate %472, %476 in 0 : vector<8x256xf32>, vector<8x256xf32> -> vector<16x256xf32>
    %479 = tpu.concatenate %477, %478 in 0 : vector<200x256xf32>, vector<16x256xf32> -> vector<216x256xf32>
    %480 = arith.truncf %479 : vector<216x256xf32> to vector<216x256xbf16>
    %c144 = arith.constant 144 : index
    %c0_282 = arith.constant 0 : index
    %481 = vector.load %arg3[%c144, %c0_282] : memref<168x512xbf16, #tpu.memory_space<vmem>>, vector<8x216xbf16>
    %cst_283 = arith.constant dense<0.000000e+00> : vector<8x256xf32>
    %482 = tpu.matmul %481, %480, %cst_283 {dimension_numbers = #tpu.dot_dimension_numbers<[1], [0], [0], [1], [0, 0, 1, 1], [], []>} : vector<8x216xbf16>, vector<216x256xbf16>, vector<8x256xf32> -> vector<8x256xf32>
    %c144_284 = arith.constant 144 : index
    %c0_285 = arith.constant 0 : index
    %483 = vector.load %arg4[%c144_284, %c0_285] : memref<168x1xf32, #tpu.memory_space<vmem>>, vector<8x1xf32>
    %484 = vector.broadcast %483 : vector<8x1xf32> to vector<8x256xf32>
    %485 = arith.addf %482, %484 : vector<8x256xf32>
    %cst_286 = arith.constant 0.000000e+00 : f32
    %486 = vector.broadcast %cst_286 : f32 to vector<8x256xf32>
    %487 = arith.maximumf %485, %486 : vector<8x256xf32>
    %c17_i32_287 = arith.constant 17 : i32
    %488 = tpu.dynamic_rotate %487 by %c17_i32_287 dim 1 : vector<8x256xf32>, i32 -> vector<8x256xf32>
    %c0_288 = arith.constant 0 : index
    %c0_289 = arith.constant 0 : index
    %489 = vector.load %arg2[%c0_288, %c0_289] : memref<40x256xf32, #tpu.memory_space<vmem>>, vector<1x256xf32>
    %490 = vector.broadcast %489 : vector<1x256xf32> to vector<8x256xf32>
    %491 = arith.mulf %488, %490 : vector<8x256xf32>
    %c16_i32_290 = arith.constant 16 : i32
    %492 = tpu.dynamic_rotate %487 by %c16_i32_290 dim 1 : vector<8x256xf32>, i32 -> vector<8x256xf32>
    %c1_291 = arith.constant 1 : index
    %c0_292 = arith.constant 0 : index
    %493 = vector.load %arg2[%c1_291, %c0_292] : memref<40x256xf32, #tpu.memory_space<vmem>>, vector<1x256xf32>
    %494 = vector.broadcast %493 : vector<1x256xf32> to vector<8x256xf32>
    %495 = arith.mulf %492, %494 : vector<8x256xf32>
    %c15_i32_293 = arith.constant 15 : i32
    %496 = tpu.dynamic_rotate %487 by %c15_i32_293 dim 1 : vector<8x256xf32>, i32 -> vector<8x256xf32>
    %c2_294 = arith.constant 2 : index
    %c0_295 = arith.constant 0 : index
    %497 = vector.load %arg2[%c2_294, %c0_295] : memref<40x256xf32, #tpu.memory_space<vmem>>, vector<1x256xf32>
    %498 = vector.broadcast %497 : vector<1x256xf32> to vector<8x256xf32>
    %499 = arith.mulf %496, %498 : vector<8x256xf32>
    %c1_i32_296 = arith.constant 1 : i32
    %500 = tpu.dynamic_rotate %487 by %c1_i32_296 dim 1 : vector<8x256xf32>, i32 -> vector<8x256xf32>
    %c3_297 = arith.constant 3 : index
    %c0_298 = arith.constant 0 : index
    %501 = vector.load %arg2[%c3_297, %c0_298] : memref<40x256xf32, #tpu.memory_space<vmem>>, vector<1x256xf32>
    %502 = vector.broadcast %501 : vector<1x256xf32> to vector<8x256xf32>
    %503 = arith.mulf %500, %502 : vector<8x256xf32>
    %c255_i32_299 = arith.constant 255 : i32
    %504 = tpu.dynamic_rotate %487 by %c255_i32_299 dim 1 : vector<8x256xf32>, i32 -> vector<8x256xf32>
    %c5_300 = arith.constant 5 : index
    %c0_301 = arith.constant 0 : index
    %505 = vector.load %arg2[%c5_300, %c0_301] : memref<40x256xf32, #tpu.memory_space<vmem>>, vector<1x256xf32>
    %506 = vector.broadcast %505 : vector<1x256xf32> to vector<8x256xf32>
    %507 = arith.mulf %504, %506 : vector<8x256xf32>
    %c241_i32_302 = arith.constant 241 : i32
    %508 = tpu.dynamic_rotate %487 by %c241_i32_302 dim 1 : vector<8x256xf32>, i32 -> vector<8x256xf32>
    %c6_303 = arith.constant 6 : index
    %c0_304 = arith.constant 0 : index
    %509 = vector.load %arg2[%c6_303, %c0_304] : memref<40x256xf32, #tpu.memory_space<vmem>>, vector<1x256xf32>
    %510 = vector.broadcast %509 : vector<1x256xf32> to vector<8x256xf32>
    %511 = arith.mulf %508, %510 : vector<8x256xf32>
    %c240_i32_305 = arith.constant 240 : i32
    %512 = tpu.dynamic_rotate %487 by %c240_i32_305 dim 1 : vector<8x256xf32>, i32 -> vector<8x256xf32>
    %c7_306 = arith.constant 7 : index
    %c0_307 = arith.constant 0 : index
    %513 = vector.load %arg2[%c7_306, %c0_307] : memref<40x256xf32, #tpu.memory_space<vmem>>, vector<1x256xf32>
    %514 = vector.broadcast %513 : vector<1x256xf32> to vector<8x256xf32>
    %515 = arith.mulf %512, %514 : vector<8x256xf32>
    %c239_i32_308 = arith.constant 239 : i32
    %516 = tpu.dynamic_rotate %487 by %c239_i32_308 dim 1 : vector<8x256xf32>, i32 -> vector<8x256xf32>
    %c8_309 = arith.constant 8 : index
    %c0_310 = arith.constant 0 : index
    %517 = vector.load %arg2[%c8_309, %c0_310] : memref<40x256xf32, #tpu.memory_space<vmem>>, vector<1x256xf32>
    %518 = vector.broadcast %517 : vector<1x256xf32> to vector<8x256xf32>
    %519 = arith.mulf %516, %518 : vector<8x256xf32>
    %520 = tpu.concatenate %491, %495, %499, %503, %487, %507, %511, %515, %519 in 0 : vector<8x256xf32>, vector<8x256xf32>, vector<8x256xf32>, vector<8x256xf32>, vector<8x256xf32>, vector<8x256xf32>, vector<8x256xf32>, vector<8x256xf32>, vector<8x256xf32> -> vector<72x256xf32>
    %521 = arith.truncf %520 : vector<72x256xf32> to vector<72x256xbf16>
    %c152 = arith.constant 152 : index
    %c0_311 = arith.constant 0 : index
    %522 = vector.load %arg3[%c152, %c0_311] : memref<168x512xbf16, #tpu.memory_space<vmem>>, vector<8x72xbf16>
    %cst_312 = arith.constant dense<0.000000e+00> : vector<8x256xf32>
    %523 = tpu.matmul %522, %521, %cst_312 {dimension_numbers = #tpu.dot_dimension_numbers<[1], [0], [0], [1], [0, 0, 1, 1], [], []>} : vector<8x72xbf16>, vector<72x256xbf16>, vector<8x256xf32> -> vector<8x256xf32>
    %c152_313 = arith.constant 152 : index
    %c0_314 = arith.constant 0 : index
    %524 = vector.load %arg4[%c152_313, %c0_314] : memref<168x1xf32, #tpu.memory_space<vmem>>, vector<8x1xf32>
    %525 = vector.broadcast %524 : vector<8x1xf32> to vector<8x256xf32>
    %526 = arith.addf %523, %525 : vector<8x256xf32>
    %cst_315 = arith.constant 0.000000e+00 : f32
    %527 = vector.broadcast %cst_315 : f32 to vector<8x256xf32>
    %528 = arith.maximumf %526, %527 : vector<8x256xf32>
    %c17_i32_316 = arith.constant 17 : i32
    %529 = tpu.dynamic_rotate %528 by %c17_i32_316 dim 1 : vector<8x256xf32>, i32 -> vector<8x256xf32>
    %c0_317 = arith.constant 0 : index
    %c0_318 = arith.constant 0 : index
    %530 = vector.load %arg2[%c0_317, %c0_318] : memref<40x256xf32, #tpu.memory_space<vmem>>, vector<1x256xf32>
    %531 = vector.broadcast %530 : vector<1x256xf32> to vector<8x256xf32>
    %532 = arith.mulf %529, %531 : vector<8x256xf32>
    %c16_i32_319 = arith.constant 16 : i32
    %533 = tpu.dynamic_rotate %528 by %c16_i32_319 dim 1 : vector<8x256xf32>, i32 -> vector<8x256xf32>
    %c1_320 = arith.constant 1 : index
    %c0_321 = arith.constant 0 : index
    %534 = vector.load %arg2[%c1_320, %c0_321] : memref<40x256xf32, #tpu.memory_space<vmem>>, vector<1x256xf32>
    %535 = vector.broadcast %534 : vector<1x256xf32> to vector<8x256xf32>
    %536 = arith.mulf %533, %535 : vector<8x256xf32>
    %c15_i32_322 = arith.constant 15 : i32
    %537 = tpu.dynamic_rotate %528 by %c15_i32_322 dim 1 : vector<8x256xf32>, i32 -> vector<8x256xf32>
    %c2_323 = arith.constant 2 : index
    %c0_324 = arith.constant 0 : index
    %538 = vector.load %arg2[%c2_323, %c0_324] : memref<40x256xf32, #tpu.memory_space<vmem>>, vector<1x256xf32>
    %539 = vector.broadcast %538 : vector<1x256xf32> to vector<8x256xf32>
    %540 = arith.mulf %537, %539 : vector<8x256xf32>
    %c1_i32_325 = arith.constant 1 : i32
    %541 = tpu.dynamic_rotate %528 by %c1_i32_325 dim 1 : vector<8x256xf32>, i32 -> vector<8x256xf32>
    %c3_326 = arith.constant 3 : index
    %c0_327 = arith.constant 0 : index
    %542 = vector.load %arg2[%c3_326, %c0_327] : memref<40x256xf32, #tpu.memory_space<vmem>>, vector<1x256xf32>
    %543 = vector.broadcast %542 : vector<1x256xf32> to vector<8x256xf32>
    %544 = arith.mulf %541, %543 : vector<8x256xf32>
    %c255_i32_328 = arith.constant 255 : i32
    %545 = tpu.dynamic_rotate %528 by %c255_i32_328 dim 1 : vector<8x256xf32>, i32 -> vector<8x256xf32>
    %c5_329 = arith.constant 5 : index
    %c0_330 = arith.constant 0 : index
    %546 = vector.load %arg2[%c5_329, %c0_330] : memref<40x256xf32, #tpu.memory_space<vmem>>, vector<1x256xf32>
    %547 = vector.broadcast %546 : vector<1x256xf32> to vector<8x256xf32>
    %548 = arith.mulf %545, %547 : vector<8x256xf32>
    %c241_i32_331 = arith.constant 241 : i32
    %549 = tpu.dynamic_rotate %528 by %c241_i32_331 dim 1 : vector<8x256xf32>, i32 -> vector<8x256xf32>
    %c6_332 = arith.constant 6 : index
    %c0_333 = arith.constant 0 : index
    %550 = vector.load %arg2[%c6_332, %c0_333] : memref<40x256xf32, #tpu.memory_space<vmem>>, vector<1x256xf32>
    %551 = vector.broadcast %550 : vector<1x256xf32> to vector<8x256xf32>
    %552 = arith.mulf %549, %551 : vector<8x256xf32>
    %c240_i32_334 = arith.constant 240 : i32
    %553 = tpu.dynamic_rotate %528 by %c240_i32_334 dim 1 : vector<8x256xf32>, i32 -> vector<8x256xf32>
    %c7_335 = arith.constant 7 : index
    %c0_336 = arith.constant 0 : index
    %554 = vector.load %arg2[%c7_335, %c0_336] : memref<40x256xf32, #tpu.memory_space<vmem>>, vector<1x256xf32>
    %555 = vector.broadcast %554 : vector<1x256xf32> to vector<8x256xf32>
    %556 = arith.mulf %553, %555 : vector<8x256xf32>
    %c239_i32_337 = arith.constant 239 : i32
    %557 = tpu.dynamic_rotate %528 by %c239_i32_337 dim 1 : vector<8x256xf32>, i32 -> vector<8x256xf32>
    %c8_338 = arith.constant 8 : index
    %c0_339 = arith.constant 0 : index
    %558 = vector.load %arg2[%c8_338, %c0_339] : memref<40x256xf32, #tpu.memory_space<vmem>>, vector<1x256xf32>
    %559 = vector.broadcast %558 : vector<1x256xf32> to vector<8x256xf32>
    %560 = arith.mulf %557, %559 : vector<8x256xf32>
    %561 = tpu.concatenate %532, %536, %540, %544, %528, %548, %552, %556, %560 in 0 : vector<8x256xf32>, vector<8x256xf32>, vector<8x256xf32>, vector<8x256xf32>, vector<8x256xf32>, vector<8x256xf32>, vector<8x256xf32>, vector<8x256xf32>, vector<8x256xf32> -> vector<72x256xf32>
    %562 = arith.truncf %561 : vector<72x256xf32> to vector<72x256xbf16>
    %c160 = arith.constant 160 : index
    %c0_340 = arith.constant 0 : index
    %563 = vector.load %arg3[%c160, %c0_340] : memref<168x512xbf16, #tpu.memory_space<vmem>>, vector<3x72xbf16>
    %cst_341 = arith.constant dense<0.000000e+00> : vector<3x256xf32>
    %564 = tpu.matmul %563, %562, %cst_341 {dimension_numbers = #tpu.dot_dimension_numbers<[1], [0], [0], [1], [0, 0, 1, 1], [], []>} : vector<3x72xbf16>, vector<72x256xbf16>, vector<3x256xf32> -> vector<3x256xf32>
    %c160_342 = arith.constant 160 : index
    %c0_343 = arith.constant 0 : index
    %565 = vector.load %arg4[%c160_342, %c0_343] : memref<168x1xf32, #tpu.memory_space<vmem>>, vector<3x1xf32>
    %566 = vector.broadcast %565 : vector<3x1xf32> to vector<3x256xf32>
    %567 = arith.addf %564, %566 : vector<3x256xf32>
    %568 = arith.negf %567 : vector<3x256xf32>
    %569 = math.exp %568 : vector<3x256xf32>
    %cst_344 = arith.constant 1.000000e+00 : f32
    %570 = vector.broadcast %cst_344 : f32 to vector<3x256xf32>
    %571 = arith.addf %570, %569 : vector<3x256xf32>
    %572 = arith.divf %570, %571 : vector<3x256xf32>
    %c0_345 = arith.constant 0 : index
    %c0_346 = arith.constant 0 : index
    %c0_347 = arith.constant 0 : index
    %573 = vector.load %arg5[%c0_345, %c0_346, %c0_347] : memref<1x3x256xf32, #tpu.memory_space<vmem>>, vector<1x3x256xf32>
    %574 = vector.shape_cast %573 : vector<1x3x256xf32> to vector<3x256xf32>
    %575 = vector.shape_cast %572 : vector<3x256xf32> to vector<1x3x256xf32>
    tpu.vector_store %arg5[%c0_345, %c0_346, %c0_347], %575 {strides = array<i32>} : memref<1x3x256xf32, #tpu.memory_space<vmem>>, vector<1x3x256xf32>,
    return
  }
  func.func @transform_0(%arg0: i32) -> (i32, i32, i32) {
    %c0_i32 = arith.constant 0 : i32
    %c0_i32_0 = arith.constant 0 : i32
    %c0_i32_1 = arith.constant 0 : i32
    return %arg0, %c0_i32, %c0_i32_0 : i32, i32, i32
  }
  func.func @transform_1(%arg0: i32) -> (i32, i32) {
    %c0_i32 = arith.constant 0 : i32
    %c0_i32_0 = arith.constant 0 : i32
    %c0_i32_1 = arith.constant 0 : i32
    return %c0_i32, %c0_i32_0 : i32, i32
  }
  func.func @transform_2(%arg0: i32) -> (i32, i32) {
    %c0_i32 = arith.constant 0 : i32
    %c0_i32_0 = arith.constant 0 : i32
    %c0_i32_1 = arith.constant 0 : i32
    return %c0_i32, %c0_i32_0 : i32, i32
  }
  func.func @transform_3(%arg0: i32) -> (i32, i32) {
    %c0_i32 = arith.constant 0 : i32
    %c0_i32_0 = arith.constant 0 : i32
    %c0_i32_1 = arith.constant 0 : i32
    return %c0_i32, %c0_i32_0 : i32, i32
  }
  func.func @transform_4(%arg0: i32) -> (i32, i32, i32) {
    %c0_i32 = arith.constant 0 : i32
    %c0_i32_0 = arith.constant 0 : i32
    %c0_i32_1 = arith.constant 0 : i32
    return %arg0, %c0_i32, %c0_i32_0 : i32, i32, i32
  }
}

</mosaic_0001>

<bundles_post_ra>
// kernel: forward.1
= control target key start
LH: loop header
LB: loop body
LE: loop exit
PB: predicated region body
PF: predicated region fallthrough
CT: control target
= control target key end

     0   :  { %9 = vsyncpa [#allocation3], 0  ;;  %s6814_s0 = inlined_call_operand.vmem [shape: bf16[2,8,256], index: 0, kind: input, shape index: {}]   ;;  %s6815_s1 = inlined_call_operand.hbm [shape: f32[40,256], index: 1, kind: input, shape index: {}]   ;;  %s6816_s2 = inlined_call_operand.hbm [shape: bf16[168,512], index: 2, kind: input, shape index: {}]   ;;  %s6817_s3 = inlined_call_operand.vmem [shape: f32[168,1], index: 3, kind: input, shape index: {}]   ;;  %s6818_s4 = inlined_call_operand.vmem [shape: f32[2,3,256], index: 4, kind: output, shape index: {}]  }
   0x1   :  { %10 = vsyncpa [#allocation5], 0  ;;  %s3911_s15 = smov 0  }
   0x2 LB: > { %s3917_s16 = sadd.s32 4294967295, %s3858_s15   ;;  %p3575_p0 = scmp.ge.s32.totalorder %s3858_s15, 1  ;;  %s3858_s15 = sphi %s3911_s15, %s16_s15  }
   0x3   : > { %p136_p1 = scmp.lt.s32.totalorder %s3858_s15, 3  ;;  %s3860_s17 = smov [#allocation2]  }
   0x4   : > { %s148_s18 = sshll.u32 %s3860_s17, 4  ;;  %p6819_p3 = scmp.eq.s32.totalorder %s3917_s16, 0  ;;  %s149_s18 = int_to_ptr.vmem [resolvable:$true] %s148_s18 }
   0x5   : > { %p3921_p2 = pnand %p3575_p0, %p136_p1  ;;  %s3861_s20 = smov [#allocation4]  }
   0x6   : > { %s161_s21 = sshll.u32 %s3861_s20, 4  ;;  %s3788_s25 = scalar_lea.hbm %s6815_s1, 1280  ;;  %s3934_s21 = int_to_ptr.vmem [resolvable:$true] %s161_s21 }
   0x7   : > { %s6945_s19 = scalar_select %p3921_p2, 1, 0 }
   0x8   : > { %p3664_p4 = pneg %p3921_p2  ;;  %p3789_p6 = scmp.ne.s32.totalorder %s6815_s1, %s3788_s25 }
   0x9   : > { %p3795_p10 = scmp.lt.u32.totalorder %s3788_s25, %s6815_s1 }
   0xa   : > { %p3930_p5 = pnand %p6819_p3, %p3664_p4 }
   0xc   : > { %p3790_p7 = pneg %p3930_p5 }
   0xe   : > { %p3791_p8 = pnand %p3790_p7, %p3789_p6 }
  0x10   : > { %p3792_p9 = pneg %p3791_p8 }
  0x12   : > { %p3797_p11 = pnand %p3795_p10, %p3792_p9 }
  0x14   : > { %3800 = shalt.err (!%p3797_p11)
}
  0x15   : > { %s3801_s30 = scalar_lea.vmem %s149_s18, 1280  ;;  %p3809_p1 = scmp.lt.s32.totalorder %s149_s18, %s149_s18 }
  0x16   : > { %p3802_p12 = scmp.ne.s32.totalorder %s149_s18, %s3801_s30  ;;  %p3810_p4 = scmp.lt.s32.totalorder %s3801_s30, %s3801_s30 }
  0x18   : > { %p3804_p13 = pnand %p3802_p12, %p3790_p7  ;;  %p3811_p3 = por %p3810_p4, %p3809_p1 }
  0x1a   : > { %p3805_p0 = pneg %p3804_p13 }
  0x1c   : > { %p3812_p2 = pnand %p3811_p3, %p3805_p0 }
  0x1e   : > { %3815 = shalt.err (!%p3812_p2)
}
  0x1f   : > { %s3862_s5 = smov 256   ;;  %s3863_s6 = smov 16  }
  0x20   : > { %3667 = dma.hbm_to_vmem [thread:$0]  (!%p3930_p5), %s6815_s1, 1280, %s149_s18, [#allocation3], %s3862_s5, %s3862_s5, %s3863_s6  }
  0x21   : > { %s3816_s11 = scalar_lea.hbm %s6816_s2, 5376 }
  0x22   : > { %p3817_p6 = scmp.ne.s32.totalorder %s6816_s2, %s3816_s11  ;;  %p3823_p8 = scmp.lt.u32.totalorder %s3816_s11, %s6816_s2 }
  0x24   : > { %p3819_p2 = pnand %p3817_p6, %p3790_p7 }
  0x26   : > { %p3820_p3 = pneg %p3819_p2 }
  0x28   : > { %p3825_p9 = pnand %p3823_p8, %p3820_p3 }
  0x2a   : > { %3828 = shalt.err (!%p3825_p9)
}
  0x2b   : > { %s3829_s18 = scalar_lea.vmem %s3934_s21, 5376  ;;  %p3837_p13 = scmp.lt.s32.totalorder %s3934_s21, %s3934_s21 }
  0x2c   : > { %p3830_p10 = scmp.ne.s32.totalorder %s3934_s21, %s3829_s18  ;;  %p3838_p0 = scmp.lt.s32.totalorder %s3829_s18, %s3829_s18 }
  0x2e   : > { %p3832_p11 = pnand %p3830_p10, %p3790_p7  ;;  %p3839_p1 = por %p3838_p0, %p3837_p13 }
  0x30   : > { %p3833_p12 = pneg %p3832_p11 }
  0x32   : > { %p3840_p4 = pnand %p3839_p1, %p3833_p12 }
  0x34   : > { %3843 = shalt.err (!%p3840_p4)
}
  0x35   : > { %3670 = dma.hbm_to_vmem [thread:$0]  (!%p3930_p5), %s6816_s2, 5376, %s3934_s21, [#allocation5], %s3862_s5, %s3862_s5, %s3863_s6  }
  0x36   : > { %p6947_p6 = scmp.ne.s32.totalorder %s6945_s19, 0 }
  0x38   : > { %188 = sbr.rel (%p6947_p6) target bundleno = 5068 (0x13cc), region = 36 }
  0x3f   : > { %p6948_p2 = scmp.eq.s32.totalorder %s3917_s16, 0 }
  0x41   : > { %3849 = dma.done.wait (%p6948_p2), [#allocation3], 1280   ;;  %p6949_p7 = pmov %p6948_p2 }
  0x42   : > { %p6950_p3 = pmov %p6948_p2 }
  0x43   : > { %3851 = vsyncadd (%p6949_p7), [#allocation3], 4294966016 }
  0x44   : > { %3853 = dma.done.wait (%p6950_p3), [#allocation5], 5376   ;;  %p6951_p8 = pmov %p6948_p2 }
  0x45   : > { %p218_p9 = scmp.lt.s32.totalorder %s3917_s16, 1  ;;  %s6853_s25 = smov 15   ;;  %v6824_v4 = vmov 0   ;;  %v420_v5 = vld [vmem:[%s6817_s3] sm:$0xff]  ;;  %v236_v6 = vlaneseq  ;;  %vm6855_vm8 = vcmask 1043456   ;;  %vm6823_vm9 = vcmask 588800  }
  0x46   : > { %3855 = vsyncadd (%p6951_p8), [#allocation5], 4294961920  ;;  %s3865_s26 = smov 17   ;;  %s3866_s27 = smov 1   ;;  %469 = vmatprep.mubr.bf16.mxu0 %v6824_v4  ;;  %3749 = vset.pattern.permute.xlu0 %v6824_v4 }
  0x47   : > { %s7160_s16 = smov (!%p218_p9, %s3917_s16), 1  ;;  %s3867_s28 = smov 16   ;;  %602 = vmatprep.mubr.bf16.mxu1 %v6824_v4  ;;  %3750 = vset.pattern.permute.xlu1 %v6824_v4  ;;  %v244_v7 = vshrl.u32 %v236_v6, 7  ;;  %v4026_v8 = vand.u32 127, %v236_v6 }
  0x48   : > { %s6844_s19 = sshll.u32 %s7160_s16, 3  ;;  %s6851_s29 = smov 127   ;;  %v241_v11 = vld [vmem:[#allocation2] ss:$8 sm:$0x3] }
  0x49   : > { %s222_s24 = scalar_lea.vmem %s6814_s0, %s6844_s19  ;;  %s6849_s30 = smov 113   ;;  %v4028_v9 = vsub.s32 0, %v244_v7  ;;  %v4030_v10 = vsub.s32 1, %v244_v7  ;;  %v263_v12 = vld [vmem:[#allocation2 + $0x1] ss:$8 sm:$0x3] }
  0x4a   : > { %v4003_v0 = vld [vmem:[%s222_s24] sm:$0xff]  ;;  %s6847_s5 = smov 112   ;;  %s6845_s6 = smov 111   ;;  %v285_v13 = vld [vmem:[#allocation2 + $0x2] ss:$8 sm:$0x3] }
  0x4b   : > { %v230_v1 = vunpack.c.l.bf16 %v4003_v0  ;;  %v231_v2 = vunpack.c.h.bf16 %v4003_v0  ;;  %6952 = vst [vmem:[#allocation8_spill] sm:$0xff] %v4028_v9  ;;  %6953 = vst [vmem:[#allocation9_spill] sm:$0xff] %v4030_v10  ;;  %v307_v14 = vld [vmem:[#allocation2 + $0x3] ss:$8 sm:$0x3]  ;;  %vm6894_vm0 = vcmp.lt.s32.totalorder %v4026_v8, 17  ;;  %v4036_v15 = vrot.slane %v241_v11, %v4030_v10 }
  0x4c   : > { %vm259_vm1 = vcmp.lt.s32.totalorder %v4026_v8, 16  ;;  %vm6886_vm2 = vcmp.lt.s32.totalorder %v4026_v8, 15  ;;  %v4039_v16 = vrot.slane %v263_v12, %v4030_v10  ;;  %v4042_v17 = vrot.slane %v241_v11, %v4028_v9  ;;  %v329_v18 = vld [vmem:[#allocation2 + $0x5] ss:$8 sm:$0x3]  ;;  %s3873_s11 = smov 34  }
  0x4d   : > { %v3719_v3 = vpack.i.bf16 %v231_v2, %v230_v1  ;;  %6954 = vst [vmem:[#allocation10_spill] sm:$0xff] %v4036_v15  ;;  %vm303_vm3 = vcmp.lt.s32.totalorder %v4026_v8, 1  ;;  %v4046_v21 = vrot.slane %v263_v12, %v4028_v9  ;;  %v4049_v22 = vrot.slane %v285_v13, %v4030_v10  ;;  %v351_v25 = vld [vmem:[#allocation2 + $0x6] ss:$8 sm:$0x3]  ;;  %s3874_s12 = smov 32  }
  0x4e   : > { %6955 = vst [vmem:[#allocation11_spill] sm:$0xff] %v4039_v16  ;;  %6956 = vst [vmem:[#allocation12_spill] sm:$0xff] %v4042_v17  ;;  %v4052_v23 = vrot.slane %v307_v14, %v4030_v10  ;;  %v4055_v24 = vrot.slane %v285_v13, %v4028_v9  ;;  %v373_v30 = vld [vmem:[#allocation2 + $0x7] ss:$8 sm:$0x3]  ;;  %v4058_v31 = vrot.slane %v307_v14, %v4028_v9  ;;  %vm6877_vm4 = vcmp.lt.s32.totalorder %v4026_v8, 127 }
  0x4f   : > { %3720 = vrot.lane.b32.xlu1 %v3719_v3, %s6853_s25  ;;  %3710 = vrot.lane.b32.xlu0 %v3719_v3, %s3865_s26  ;;  %6957 = vst [vmem:[#allocation13_spill] sm:$0xff] %v4046_v21  ;;  %6958 = vst [vmem:[#allocation14_spill] sm:$0xff] %v4049_v22  ;;  %v4062_v32 = vrot.slane %v329_v18, %v4030_v10  ;;  %v4065_v33 = vrot.slane %v329_v18, %v4028_v9  ;;  %vm6864_vm5 = vcmp.lt.s32.totalorder %v4026_v8, 113  ;;  %v395_v60 = vld [vmem:[#allocation2 + $0x10] ss:$8 sm:$0x3] }
  0x50   : > { %6959 = vst [vmem:[#allocation15_spill] sm:$0xff] %v4052_v23  ;;  %6960 = vst [vmem:[#allocation16_spill] sm:$0xff] %v4055_v24  ;;  %v4073_v36 = vrot.slane %v351_v25, %v4030_v10  ;;  %vm6821_vm6 = vcmp.lt.s32.totalorder %v4026_v8, 111  ;;  %vm6822_vm7 = vcmp.lt.s32.totalorder %v4026_v8, 112  ;;  %v4080_v40 = vrot.slane %v373_v30, %v4030_v10  ;;  %s3875_s13 = smov 30   ;;  %s3876_s14 = smov 2  }
  0x51   : > { %6961 = vst [vmem:[#allocation17_spill] sm:$0xff] %v4058_v31  ;;  %6962 = vst [vmem:[#allocation18_spill] sm:$0xff] %v4062_v32  ;;  %v4083_v41 = vrot.slane %v351_v25, %v4028_v9  ;;  %v4090_v49 = vrot.slane %v373_v30, %v4028_v9  ;;  %v4113_v18 = vrot.slane %v395_v60, %v4030_v10  ;;  %s3877_s17 = smov 126   ;;  %s3878_s18 = smov 98   ;;  %vm641_vm10 = vcmp.lt.s32.totalorder %v4026_v8, 34 }
  0x52   : > { %6963 = vst [vmem:[#allocation19_spill] sm:$0xff] %v4065_v33  ;;  %6964 = vst [vmem:[#allocation20_spill] sm:$0xff] %v4073_v36  ;;  %s3879_s20 = smov 96   ;;  %s3880_s23 = smov 94   ;;  %vm663_vm11 = vcmp.lt.s32.totalorder %v4026_v8, 32  ;;  %vm685_vm12 = vcmp.lt.s32.totalorder %v4026_v8, 30 }
  0x53   : > { %3725 = vrot.lane.b32.xlu1 %v3719_v3, %s3866_s27  ;;  %3715 = vrot.lane.b32.xlu0 %v3719_v3, %s3867_s28  ;;  %6965 = vst [vmem:[#allocation21_spill] sm:$0xff] %v4080_v40  ;;  %6966 = vst [vmem:[#allocation22_spill] sm:$0xff] %v4083_v41  ;;  %vm707_vm13 = vcmp.lt.s32.totalorder %v4026_v8, 2  ;;  %vm729_vm14 = vcmp.lt.s32.totalorder %v4026_v8, 126  ;;  %vm751_vm15 = vcmp.lt.s32.totalorder %v4026_v8, 98  ;;  %s3881_s22 = smov 68  }
  0x54   : > { %6967 = vst [vmem:[#allocation23_spill] sm:$0xff] %v4090_v49  ;;  %6968 = vst [vmem:[#allocation24_spill] sm:$0xff] %v4113_v18  ;;  %s3882_s24 = smov 64   ;;  %s3883_s7 = smov 60  }
  0x55   : > { %s3884_s8 = smov 4   ;;  %s3885_s9 = smov 124  }
  0x56   : > { %s7079_s21 = smov 111  }
  0x57   : > { %3730 = vrot.lane.b32.xlu0 %v3719_v3, %s6851_s29  ;;  %3735 = vrot.lane.b32.xlu1 %v3719_v3, %s6849_s30 }
  0x5b   : > { %3740 = vrot.lane.b32.xlu0 %v3719_v3, %s6847_s5  ;;  %3745 = vrot.lane.b32.xlu1 %v3719_v3, %s6845_s6 }
  0x5f   : > { %423 = vperm.xlu0 %3749, %v420_v5  }
  0xc1   : > { %v3721_v19 = vpop.permute.xlu1 %3720  ;;  %v3711_v20 = vpop.permute.xlu0 %3710 }
  0xc2   : > { %v3723_v26 = vunpack.i.h.bf16 %v3721_v19  ;;  %v3722_v27 = vunpack.i.l.bf16 %v3721_v19  ;;  %v3713_v28 = vunpack.i.h.bf16 %v3711_v20  ;;  %v3712_v29 = vunpack.i.l.bf16 %v3711_v20 }
  0xc4   : > { %v239_v34 = vsel %vm6894_vm0, %v3712_v29, %v3713_v28  ;;  %v240_v35 = vsel %vm6894_vm0, %v3713_v28, %v3712_v29  ;;  %v282_v39 = vsel %vm6886_vm2, %v3722_v27, %v3723_v26  ;;  %v283_v48 = vsel %vm6886_vm2, %v3723_v26, %v3722_v27 }
  0xc5   : > { %v3726_v37 = vpop.permute.xlu1 %3725  ;;  %v3716_v38 = vpop.permute.xlu0 %3715  ;;  %v254_v46 = vmul.f32 %v4036_v15, %v239_v34  ;;  %v253_v47 = vmul.f32 %v4042_v17, %v240_v35  ;;  %v298_v57 = vmul.f32 %v4049_v22, %v282_v39  ;;  %v297_v7 = vmul.f32 %v4055_v24, %v283_v48 }
  0xc6   : > { %v3728_v42 = vunpack.i.h.bf16 %v3726_v37  ;;  %v3727_v43 = vunpack.i.l.bf16 %v3726_v37  ;;  %v3718_v44 = vunpack.i.h.bf16 %v3716_v38  ;;  %v3717_v45 = vunpack.i.l.bf16 %v3716_v38 }
  0xc7   : > { %v4118_v28 = vrot.slane %v395_v60, %v4028_v9 }
  0xc8   : > { %v260_v50 = vsel %vm259_vm1, %v3717_v45, %v3718_v44  ;;  %v261_v51 = vsel %vm259_vm1, %v3718_v44, %v3717_v45  ;;  %v304_v52 = vsel %vm303_vm3, %v3727_v43, %v3728_v42  ;;  %v305_v53 = vsel %vm303_vm3, %v3728_v42, %v3727_v43 }
  0xc9   : > { %v3731_v54 = vpop.permute.xlu0 %3730  ;;  %v276_v55 = vmul.f32 %v4039_v16, %v260_v50  ;;  %v275_v56 = vmul.f32 %v4046_v21, %v261_v51  ;;  %v320_v58 = vmul.f32 %v4052_v23, %v304_v52  ;;  %v3736_v59 = vpop.permute.xlu1 %3735  ;;  %v319_v11 = vmul.f32 %v4058_v31, %v305_v53  ;;  %6969 = vst [vmem:[#allocation25_spill] sm:$0xff] %v4118_v28 }
  0xca   : > { %v3733_v61 = vunpack.i.h.bf16 %v3731_v54  ;;  %v3732_v62 = vunpack.i.l.bf16 %v3731_v54  ;;  %v3738_v63 = vunpack.i.h.bf16 %v3736_v59  ;;  %v3737_v3 = vunpack.i.l.bf16 %v3736_v59 }
  0xcb   : > { %v410_v5 = vpack.c.bf16 %v276_v55, %v254_v46  ;;  %v409_v6 = vpack.c.bf16 %v275_v56, %v253_v47  ;;  %v412_v19 = vpack.c.bf16 %v320_v58, %v298_v57  ;;  %v411_v37 = vpack.c.bf16 %v319_v11, %v297_v7 }
  0xcc   : > { %v327_v12 = vsel %vm6877_vm4, %v3733_v61, %v3732_v62  ;;  %v326_v13 = vsel %vm6877_vm4, %v3732_v62, %v3733_v61  ;;  %v349_v14 = vsel %vm6864_vm5, %v3738_v63, %v3737_v3  ;;  %v348_v42 = vsel %vm6864_vm5, %v3737_v3, %v3738_v63 }
  0xcd   : > { %437 = vmatprep.subr.bf16.mxu0 %v410_v5  ;;  %v3741_v20 = vpop.permute.xlu0 %3740  ;;  %v3746_v25 = vpop.permute.xlu1 %3745  ;;  %v342_v26 = vmul.f32 %v4062_v32, %v327_v12  ;;  %v341_v27 = vmul.f32 %v4065_v33, %v326_v13  ;;  %v364_v39 = vmul.f32 %v4073_v36, %v349_v14  ;;  %v363_v48 = vmul.f32 %v4083_v41, %v348_v42 }
  0xce   : > { %438 = vmatpush1.bf16.msra.mxu0 %v409_v6  ;;  %v3743_v29 = vunpack.i.h.bf16 %v3741_v20  ;;  %v3742_v30 = vunpack.i.l.bf16 %v3741_v20  ;;  %v3748_v34 = vunpack.i.h.bf16 %v3746_v25  ;;  %v3747_v35 = vunpack.i.l.bf16 %v3746_v25  ;;  %v555_v6 = vld [vmem:[%s6817_s3 + $0x8] sm:$0xff] }
  0xcf   : > { %439 = vmatprep.subr.bf16.mxu0 %v412_v19  ;;  %v414_v38 = vpack.c.bf16 %v342_v26, %v231_v2  ;;  %v413_v2 = vpack.c.bf16 %v341_v27, %v230_v1  ;;  %v419_v1 = vld [vmem:[#allocation4] sm:$0xf] }
  0xd0   : > { %v393_v43 = vsel %vm6821_vm6, %v3748_v34, %v3747_v35  ;;  %v371_v44 = vsel %vm6822_vm7, %v3743_v29, %v3742_v30  ;;  %v370_v45 = vsel %vm6822_vm7, %v3742_v30, %v3743_v29  ;;  %v392_v46 = vsel %vm6821_vm6, %v3747_v35, %v3748_v34 }
  0xd1   : > { %v386_v47 = vmul.f32 %v4080_v40, %v371_v44  ;;  %v385_v50 = vmul.f32 %v4090_v49, %v370_v45  ;;  %v408_v52 = vmul.f32 %v4113_v18, %v393_v43  ;;  %v407_v53 = vmul.f32 %v4118_v28, %v392_v46 }
  0xd2   : > { %440 = vmatpush1.bf16.msra.mxu0 %v411_v37 }
  0xd3   : > { %441 = vmatprep.subr.bf16.mxu0 %v414_v38  ;;  %v416_v51 = vpack.c.bf16 %v386_v47, %v364_v39  ;;  %v415_v54 = vpack.c.bf16 %v385_v50, %v363_v48  ;;  %v418_v55 = vpack.c.bf16 %v408_v52, %v408_v52  ;;  %v417_v56 = vpack.c.bf16 %v407_v53, %v407_v53 }
  0xd5   : > { %v432_v0 = vsel %vm6855_vm8, %v417_v56, 0 }
  0xd6   : > { %442 = vmatpush1.bf16.msra.mxu0 %v413_v2 }
  0xd7   : > { %443 = vmatprep.subr.bf16.mxu0 %v416_v51 }
  0xda   : > { %444 = vmatpush1.bf16.msra.mxu0 %v415_v54 }
  0xdb   : > { %3586 = vmatprep.subr.msk.bf16.mxu0 %vm6855_vm8, %v418_v55 }
  0xde   : > { %446 = vmatpush1.bf16.msra.mxu0 %v432_v0  ;;  %v424_v57 = vpop.permute.xlu0 %423 }
  0xe1   : > { %3587 = vmatmul.mubr.msk.bf16.vlgmr.msra.gmra.mrb[0].mxu0 %vm6823_vm9, %v419_v1 }
  0xe2   : > { %883 = vmatprep.mubr.bf16.mxu0 %v6824_v4 }
 0x1b4   : > { %v471_v58 = vpop.f32.mrb[0].mxu0 }
 0x1b5   : > { %v472_v59 = vadd.f32 %v471_v58, %v424_v57  ;;  %v473_v60 = vpop.f32.mrb[1].mxu0 }
 0x1b6   : > { %v475_v61 = vpop.f32.mrb[2].mxu0  ;;  %v474_v63 = vadd.f32 %v473_v60, %v424_v57 }
 0x1b7   : > { %v4144_v62 = vmax.f32 %v472_v59, 0.0  ;;  %v476_v3 = vpop.f32.mrb[3].mxu0 }
 0x1b8   : > { %v479_v5 = vmax.f32 %v474_v63, 0.0 }
 0x1b9   : > { %488 = vrot.lane.b32.xlu0 %v4144_v62, %s3867_s28  ;;  %480 = vrot.lane.b32.xlu1 %v4144_v62, %s3865_s26 }
 0x1bd   : > { %496 = vrot.lane.b32.xlu0 %v4144_v62, %s6853_s25  ;;  %482 = vrot.lane.b32.xlu1 %v479_v5, %s3865_s26 }
 0x1c1   : > { %504 = vrot.lane.b32.xlu0 %v4144_v62, %s3866_s27  ;;  %490 = vrot.lane.b32.xlu1 %v479_v5, %s3867_s28 }
 0x1c5   : > { %512 = vrot.lane.b32.xlu0 %v4144_v62, %s6851_s29  ;;  %498 = vrot.lane.b32.xlu1 %v479_v5, %s6853_s25 }
 0x1c9   : > { %520 = vrot.lane.b32.xlu0 %v4144_v62, %s6849_s30  ;;  %506 = vrot.lane.b32.xlu1 %v479_v5, %s3866_s27 }
 0x1cd   : > { %528 = vrot.lane.b32.xlu0 %v4144_v62, %s6847_s5  ;;  %514 = vrot.lane.b32.xlu1 %v479_v5, %s6851_s29 }
 0x1d1   : > { %536 = vrot.lane.b32.xlu0 %v4144_v62, %s6845_s6  ;;  %522 = vrot.lane.b32.xlu1 %v479_v5, %s6849_s30 }
 0x1d5   : > { %558 = vperm.xlu0 %3749, %v555_v6   ;;  %530 = vrot.lane.b32.xlu1 %v479_v5, %s6847_s5 }
 0x1d9   : > { %538 = vrot.lane.b32.xlu1 %v479_v5, %s6845_s6 }
 0x22b   : > { %v489_v7 = vpop.permute.xlu0 %488  ;;  %v481_v11 = vpop.permute.xlu1 %480 }
 0x22f   : > { %v497_v12 = vpop.permute.xlu0 %496  ;;  %v483_v13 = vpop.permute.xlu1 %482 }
 0x230   : > { %v485_v14 = vsel %vm6894_vm0, %v483_v13, %v481_v11  ;;  %v484_v19 = vsel %vm6894_vm0, %v481_v11, %v483_v13  ;;  %vm1294_vm0 = vcmp.lt.s32.totalorder %v4026_v8, 124 }
 0x231   : > { %v487_v29 = vmul.f32 %v484_v19, %v4036_v15  ;;  %v486_v34 = vmul.f32 %v485_v14, %v4042_v17 }
 0x233   : > { %v505_v20 = vpop.permute.xlu0 %504  ;;  %v491_v25 = vpop.permute.xlu1 %490 }
 0x234   : > { %v493_v26 = vsel %vm259_vm1, %v491_v25, %v489_v7  ;;  %v492_v27 = vsel %vm259_vm1, %v489_v7, %v491_v25 }
 0x235   : > { %v495_v30 = vmul.f32 %v492_v27, %v4039_v16  ;;  %v494_v35 = vmul.f32 %v493_v26, %v4046_v21 }
 0x237   : > { %v499_v37 = vpop.permute.xlu1 %498  ;;  %v545_v38 = vpack.c.bf16 %v495_v30, %v487_v29  ;;  %v544_v39 = vpack.c.bf16 %v494_v35, %v486_v34  ;;  %v513_v42 = vpop.permute.xlu0 %512 }
 0x238   : > { %v500_v43 = vsel %vm6886_vm2, %v497_v12, %v499_v37  ;;  %v501_v44 = vsel %vm6886_vm2, %v499_v37, %v497_v12  ;;  %vm1264_vm2 = vcmp.lt.s32.totalorder %v4026_v8, 4 }
 0x239   : > { %570 = vmatprep.subr.bf16.mxu1 %v545_v38  ;;  %v502_v2 = vmul.f32 %v501_v44, %v4055_v24  ;;  %v503_v48 = vmul.f32 %v500_v43, %v4049_v22  ;;  %v554_v38 = vld [vmem:[#allocation4 + $0x10] sm:$0xf] }
 0x23a   : > { %571 = vmatpush1.bf16.msra.mxu1 %v544_v39 }
 0x23b   : > { %v507_v45 = vpop.permute.xlu1 %506  ;;  %v521_v52 = vpop.permute.xlu0 %520 }
 0x23c   : > { %v508_v46 = vsel %vm303_vm3, %v505_v20, %v507_v45  ;;  %v509_v47 = vsel %vm303_vm3, %v507_v45, %v505_v20 }
 0x23d   : > { %v510_v50 = vmul.f32 %v509_v47, %v4058_v31  ;;  %v511_v51 = vmul.f32 %v508_v46, %v4052_v23 }
 0x23f   : > { %v515_v53 = vpop.permute.xlu1 %514  ;;  %v547_v54 = vpack.c.bf16 %v511_v51, %v503_v48  ;;  %v546_v55 = vpack.c.bf16 %v510_v50, %v502_v2  ;;  %v529_v61 = vpop.permute.xlu0 %528 }
 0x240   : > { %v516_v56 = vsel %vm6877_vm4, %v513_v42, %v515_v53  ;;  %v517_v0 = vsel %vm6877_vm4, %v515_v53, %v513_v42 }
 0x241   : > { %v518_v1 = vmul.f32 %v516_v56, %v4065_v33  ;;  %v519_v57 = vmul.f32 %v517_v0, %v4062_v32  ;;  %572 = vmatprep.subr.bf16.mxu1 %v547_v54  ;;  %v1210_v32 = vld [vmem:[#allocation2 + $0x23] ss:$8 sm:$0x3] }
 0x242   : > { %573 = vmatpush1.bf16.msra.mxu1 %v546_v55 }
 0x243   : > { %v523_v58 = vpop.permute.xlu1 %522  ;;  %v549_v59 = vpack.c.bf16 %v519_v57, %v479_v5  ;;  %v548_v60 = vpack.c.bf16 %v518_v1, %v4144_v62  ;;  %v537_v14 = vpop.permute.xlu0 %536 }
 0x244   : > { %v524_v63 = vsel %vm6864_vm5, %v521_v52, %v523_v58  ;;  %v525_v3 = vsel %vm6864_vm5, %v523_v58, %v521_v52  ;;  %vm1204_vm5 = vcmp.lt.s32.totalorder %v4026_v8, 64 }
 0x245   : > { %574 = vmatprep.subr.bf16.mxu1 %v549_v59  ;;  %v526_v5 = vmul.f32 %v524_v63, %v4083_v41  ;;  %v527_v62 = vmul.f32 %v525_v3, %v4073_v36 }
 0x246   : > { %575 = vmatpush1.bf16.msra.mxu1 %v548_v60 }
 0x247   : > { %v531_v6 = vpop.permute.xlu1 %530 }
 0x248   : > { %v532_v7 = vsel %vm6822_vm7, %v529_v61, %v531_v6  ;;  %v533_v11 = vsel %vm6822_vm7, %v531_v6, %v529_v61 }
 0x249   : > { %v534_v12 = vmul.f32 %v532_v7, %v4090_v49  ;;  %v535_v13 = vmul.f32 %v533_v11, %v4080_v40  ;;  %v826_v11 = vld [vmem:[%s6817_s3 + $0x18] sm:$0xff] }
 0x24b   : > { %v539_v19 = vpop.permute.xlu1 %538  ;;  %v551_v20 = vpack.c.bf16 %v535_v13, %v527_v62  ;;  %v550_v25 = vpack.c.bf16 %v534_v12, %v526_v5  ;;  %v825_v5 = vld [vmem:[%s6817_s3 + $0x10] sm:$0xff]  ;;  %v645_v62 = vld [vmem:[#allocation2 + $0x11] ss:$8 sm:$0x3] }
 0x24c   : > { %v540_v26 = vsel %vm6821_vm6, %v537_v14, %v539_v19  ;;  %v541_v27 = vsel %vm6821_vm6, %v539_v19, %v537_v14  ;;  %v667_v12 = vld [vmem:[#allocation2 + $0x12] ss:$8 sm:$0x3]  ;;  %v4317_v19 = vrot.slane %v645_v62, %v4028_v9 }
 0x24d   : > { %v543_v29 = vmul.f32 %v541_v27, %v4113_v18  ;;  %576 = vmatprep.subr.bf16.mxu1 %v551_v20  ;;  %v542_v30 = vmul.f32 %v540_v26, %v4118_v28  ;;  %v4320_v20 = vrot.slane %v645_v62, %v4030_v10  ;;  %v4327_v26 = vrot.slane %v667_v12, %v4030_v10 }
 0x24e   : > { %577 = vmatpush1.bf16.msra.mxu1 %v550_v25  ;;  %6978 = vst [vmem:[#allocation34_spill] sm:$0xff] %v4317_v19  ;;  %v4324_v25 = vrot.slane %v667_v12, %v4028_v9 }
 0x24f   : > { %v553_v34 = vpack.c.bf16 %v543_v29, %v543_v29  ;;  %v552_v35 = vpack.c.bf16 %v542_v30, %v542_v30  ;;  %6979 = vst [vmem:[#allocation35_spill] sm:$0xff] %v4320_v20  ;;  %6981 = vst [vmem:[#allocation37_spill] sm:$0xff] %v4327_v26 }
 0x250   : > { %6980 = vst [vmem:[#allocation36_spill] sm:$0xff] %v4324_v25 }
 0x251   : > { %3588 = vmatprep.subr.msk.bf16.mxu1 %vm6855_vm8, %v553_v34  ;;  %v565_v37 = vsel %vm6855_vm8, %v552_v35, 0 }
 0x252   : > { %579 = vmatpush1.bf16.msra.mxu1 %v565_v37 }
 0x254   : > { %v559_v39 = vpop.permute.xlu0 %558 }
 0x255   : > { %3589 = vmatmul.mubr.msk.bf16.vlgmr.msra.gmra.mrb[0].mxu1 %vm6823_vm9, %v554_v38 }
 0x328   : > { %v604_v42 = vpop.f32.mrb[0].mxu1 }
 0x329   : > { %v605_v43 = vadd.f32 %v604_v42, %v559_v39  ;;  %v606_v44 = vpop.f32.mrb[1].mxu1 }
 0x32a   : > { %v607_v45 = vadd.f32 %v606_v44, %v559_v39  ;;  %v608_v46 = vpop.f32.mrb[2].mxu1  ;;  %v689_v44 = vld [vmem:[#allocation2 + $0x13] ss:$8 sm:$0x3] }
 0x32b   : > { %v4225_v47 = vmax.f32 %v605_v43, 0.0  ;;  %v609_v2 = vpop.f32.mrb[3].mxu1 }
 0x32c   : > { %v4227_v48 = vmax.f32 %v607_v45, 0.0  ;;  %v711_v45 = vld [vmem:[#allocation2 + $0x14] ss:$8 sm:$0x3] }
 0x32d   : > { %6970 = vst [vmem:[#allocation26_spill] sm:$0xff] %v4225_v47  ;;  %613 = vrot.lane.b32.xlu1 %v4225_v47, %s6851_s29 }
 0x32e   : > { %6971 = vst [vmem:[#allocation27_spill] sm:$0xff] %v4227_v48  ;;  %615 = vrot.lane.b32.xlu0 %v4227_v48, %s6851_s29 }
 0x331   : > { %621 = vrot.lane.b32.xlu1 %v4225_v47, %s6847_s5 }
 0x332   : > { %623 = vrot.lane.b32.xlu0 %v4227_v48, %s6847_s5 }
 0x335   : > { %629 = vrot.lane.b32.xlu1 %v4225_v47, %s6845_s6 }
 0x336   : > { %631 = vrot.lane.b32.xlu0 %v4227_v48, %s6845_s6 }
 0x39f   : > { %v614_v50 = vpop.permute.xlu1 %613 }
 0x3a0   : > { %v616_v51 = vpop.permute.xlu0 %615 }
 0x3a1   : > { %v4243_v52 = vsel %vm6877_vm4, %v614_v50, %v616_v51  ;;  %v4247_v53 = vsel %vm6877_vm4, %v616_v51, %v614_v50  ;;  %vm1234_vm4 = vcmp.lt.s32.totalorder %v4026_v8, 60 }
 0x3a2   : > { %6972 = vst [vmem:[#allocation28_spill] sm:$0xff] %v4243_v52  ;;  %6973 = vst [vmem:[#allocation29_spill] sm:$0xff] %v4247_v53  ;;  %v619_v1 = vmax.f32 %v4225_v47, %v4243_v52  ;;  %v620_v57 = vmax.f32 %v4227_v48, %v4247_v53 }
 0x3a3   : > { %v622_v54 = vpop.permute.xlu1 %621 }
 0x3a4   : > { %v624_v55 = vpop.permute.xlu0 %623 }
 0x3a5   : > { %v4251_v56 = vsel %vm6822_vm7, %v622_v54, %v624_v55  ;;  %v4255_v0 = vsel %vm6822_vm7, %v624_v55, %v622_v54  ;;  %v4343_v54 = vrot.slane %v689_v44, %v4028_v9  ;;  %v4346_v55 = vrot.slane %v689_v44, %v4030_v10 }
 0x3a6   : > { %6974 = vst [vmem:[#allocation30_spill] sm:$0xff] %v4251_v56  ;;  %6975 = vst [vmem:[#allocation31_spill] sm:$0xff] %v4255_v0  ;;  %v627_v59 = vmax.f32 %v619_v1, %v4251_v56  ;;  %v628_v60 = vmax.f32 %v620_v57, %v4255_v0  ;;  %v4350_v1 = vrot.slane %v711_v45, %v4028_v9  ;;  %vm795_vm7 = vcmp.lt.s32.totalorder %v4026_v8, 94 }
 0x3a7   : > { %v630_v58 = vpop.permute.xlu1 %629  ;;  %6982 = vst [vmem:[#allocation38_spill] sm:$0xff] %v4343_v54  ;;  %6983 = vst [vmem:[#allocation39_spill] sm:$0xff] %v4346_v55  ;;  %v4353_v57 = vrot.slane %v711_v45, %v4030_v10  ;;  %v755_v45 = vld [vmem:[#allocation2 + $0x17] ss:$8 sm:$0x3] }
 0x3a8   : > { %v632_v61 = vpop.permute.xlu0 %631  ;;  %6984 = vst [vmem:[#allocation40_spill] sm:$0xff] %v4350_v1 }
 0x3a9   : > { %v4265_v63 = vsel %vm6821_vm6, %v630_v58, %v632_v61  ;;  %v4269_v3 = vsel %vm6821_vm6, %v632_v61, %v630_v58  ;;  %6985 = vst [vmem:[#allocation41_spill] sm:$0xff] %v4353_v57  ;;  %v733_v58 = vld [vmem:[#allocation2 + $0x16] ss:$8 sm:$0x3]  ;;  %vm773_vm6 = vcmp.lt.s32.totalorder %v4026_v8, 96 }
 0x3aa   : > { %6976 = vst [vmem:[#allocation32_spill] sm:$0xff] %v4265_v63  ;;  %6977 = vst [vmem:[#allocation33_spill] sm:$0xff] %v4269_v3  ;;  %v4272_v6 = vmax.f32 %v627_v59, %v4265_v63  ;;  %v4275_v7 = vmax.f32 %v628_v60, %v4269_v3  ;;  %v4365_v12 = vrot.slane %v733_v58, %v4028_v9 }
 0x3ac   : > { %639 = vrot.lane.b32.xlu0 %v4275_v7, %s3873_s11  ;;  %637 = vrot.lane.b32.xlu1 %v4272_v6, %s3873_s11  ;;  %6986 = vst [vmem:[#allocation42_spill] sm:$0xff] %v4365_v12 }
 0x3b0   : > { %661 = vrot.lane.b32.xlu0 %v4275_v7, %s3874_s12  ;;  %659 = vrot.lane.b32.xlu1 %v4272_v6, %s3874_s12 }
 0x3b4   : > { %683 = vrot.lane.b32.xlu0 %v4275_v7, %s3875_s13  ;;  %681 = vrot.lane.b32.xlu1 %v4272_v6, %s3875_s13 }
 0x3b8   : > { %705 = vrot.lane.b32.xlu0 %v4275_v7, %s3876_s14  ;;  %703 = vrot.lane.b32.xlu1 %v4272_v6, %s3876_s14 }
 0x3bc   : > { %727 = vrot.lane.b32.xlu0 %v4275_v7, %s3877_s17  ;;  %725 = vrot.lane.b32.xlu1 %v4272_v6, %s3877_s17 }
 0x3c0   : > { %749 = vrot.lane.b32.xlu0 %v4275_v7, %s3878_s18  ;;  %747 = vrot.lane.b32.xlu1 %v4272_v6, %s3878_s18 }
 0x3c4   : > { %771 = vrot.lane.b32.xlu0 %v4275_v7, %s3879_s20  ;;  %769 = vrot.lane.b32.xlu1 %v4272_v6, %s3879_s20 }
 0x3c8   : > { %793 = vrot.lane.b32.xlu0 %v4275_v7, %s3880_s23  ;;  %791 = vrot.lane.b32.xlu1 %v4272_v6, %s3880_s23 }
 0x3cc   : > { %834 = vperm.xlu0 %3749, %v826_v11   ;;  %829 = vperm.xlu1 %3750, %v825_v5  }
 0x41e   : > { %v640_v13 = vpop.permute.xlu0 %639  ;;  %v638_v14 = vpop.permute.xlu1 %637 }
 0x41f   : > { %v642_v27 = vsel %vm641_vm10, %v638_v14, %v640_v13  ;;  %v643_v29 = vsel %vm641_vm10, %v640_v13, %v638_v14  ;;  %v4368_v13 = vrot.slane %v733_v58, %v4030_v10 }
 0x420   : > { %v657_v38 = vmul.f32 %v4317_v19, %v643_v29  ;;  %v658_v39 = vmul.f32 %v4320_v20, %v642_v27 }
 0x421   : > { %6987 = vst [vmem:[#allocation43_spill] sm:$0xff] %v4368_v13 }
 0x422   : > { %v662_v30 = vpop.permute.xlu0 %661  ;;  %v660_v34 = vpop.permute.xlu1 %659 }
 0x423   : > { %v664_v35 = vsel %vm663_vm11, %v660_v34, %v662_v30  ;;  %v665_v37 = vsel %vm663_vm11, %v662_v30, %v660_v34 }
 0x424   : > { %v679_v42 = vmul.f32 %v4324_v25, %v665_v37  ;;  %v680_v43 = vmul.f32 %v4327_v26, %v664_v35 }
 0x426   : > { %v813_v46 = vpack.c.bf16 %v679_v42, %v657_v38  ;;  %v684_v2 = vpop.permute.xlu0 %683  ;;  %v682_v50 = vpop.permute.xlu1 %681  ;;  %v814_v51 = vpack.c.bf16 %v680_v43, %v658_v39 }
 0x427   : > { %v686_v59 = vsel %vm685_vm12, %v682_v50, %v684_v2  ;;  %v687_v60 = vsel %vm685_vm12, %v684_v2, %v682_v50 }
 0x428   : > { %851 = vmatprep.subr.bf16.mxu0 %v814_v51  ;;  %v701_v14 = vmul.f32 %v4343_v54, %v687_v60  ;;  %v702_v27 = vmul.f32 %v4346_v55, %v686_v59  ;;  %v4384_v59 = vrot.slane %v755_v45, %v4028_v9  ;;  %v4387_v60 = vrot.slane %v755_v45, %v4030_v10 }
 0x429   : > { %852 = vmatpush1.bf16.msra.mxu0 %v813_v46  ;;  %v777_v46 = vld [vmem:[#allocation2 + $0x20] ss:$8 sm:$0x3] }
 0x42a   : > { %v706_v61 = vpop.permute.xlu0 %705  ;;  %v704_v11 = vpop.permute.xlu1 %703  ;;  %6988 = vst [vmem:[#allocation44_spill] sm:$0xff] %v4384_v59  ;;  %6989 = vst [vmem:[#allocation45_spill] sm:$0xff] %v4387_v60 }
 0x42b   : > { %v708_v5 = vsel %vm707_vm13, %v704_v11, %v706_v61  ;;  %v709_v62 = vsel %vm707_vm13, %v706_v61, %v704_v11  ;;  %v4391_v61 = vrot.slane %v777_v46, %v4028_v9  ;;  %v799_v11 = vld [vmem:[#allocation2 + $0x21] ss:$8 sm:$0x3] }
 0x42c   : > { %v723_v29 = vmul.f32 %v4350_v1, %v709_v62  ;;  %v724_v30 = vmul.f32 %v4353_v57, %v708_v5 }
 0x42d   : > { %6990 = vst [vmem:[#allocation46_spill] sm:$0xff] %v4391_v61 }
 0x42e   : > { %v815_v34 = vpack.c.bf16 %v723_v29, %v701_v14  ;;  %v728_v35 = vpop.permute.xlu0 %727  ;;  %v726_v37 = vpop.permute.xlu1 %725  ;;  %v816_v38 = vpack.c.bf16 %v724_v30, %v702_v27  ;;  %v4406_v30 = vrot.slane %v799_v11, %v4028_v9 }
 0x42f   : > { %v730_v39 = vsel %vm729_vm14, %v726_v37, %v728_v35  ;;  %v731_v42 = vsel %vm729_vm14, %v728_v35, %v726_v37 }
 0x430   : > { %v745_v43 = vmul.f32 %v4365_v12, %v730_v39  ;;  %v746_v44 = vmul.f32 %v4368_v13, %v731_v42  ;;  %853 = vmatprep.subr.bf16.mxu0 %v816_v38  ;;  %6992 = vst [vmem:[#allocation48_spill] sm:$0xff] %v4406_v30 }
 0x431   : > { %854 = vmatpush1.bf16.msra.mxu0 %v815_v34  ;;  %v4409_v34 = vrot.slane %v799_v11, %v4030_v10 }
 0x432   : > { %v817_v2 = vpack.c.bf16 %v745_v43, %v4272_v6  ;;  %v750_v50 = vpop.permute.xlu0 %749  ;;  %v748_v51 = vpop.permute.xlu1 %747  ;;  %v818_v58 = vpack.c.bf16 %v746_v44, %v4275_v7  ;;  %v4394_v6 = vrot.slane %v777_v46, %v4030_v10 }
 0x433   : > { %v752_v5 = vsel %vm751_vm15, %v748_v51, %v750_v50  ;;  %v753_v7 = vsel %vm751_vm15, %v750_v50, %v748_v51  ;;  %6993 = vst [vmem:[#allocation49_spill] sm:$0xff] %v4409_v34 }
 0x434   : > { %855 = vmatprep.subr.bf16.mxu0 %v818_v58  ;;  %6991 = vst [vmem:[#allocation47_spill] sm:$0xff] %v4394_v6  ;;  %v767_v35 = vmul.f32 %v4384_v59, %v752_v5  ;;  %v768_v37 = vmul.f32 %v4387_v60, %v753_v7  ;;  %v3751_v7 = vld [vmem:[#allocation4 + $0x20] ss:$16 sps:$4 sm:$0xff]  }
 0x435   : > { %856 = vmatpush1.bf16.msra.mxu0 %v817_v2 }
 0x436   : > { %v772_v62 = vpop.permute.xlu0 %771  ;;  %v770_v14 = vpop.permute.xlu1 %769 }
 0x437   : > { %v774_v27 = vsel %vm773_vm6, %v770_v14, %v772_v62  ;;  %v775_v29 = vsel %vm773_vm6, %v772_v62, %v770_v14 }
 0x438   : > { %v789_v38 = vmul.f32 %v4391_v61, %v774_v27  ;;  %v790_v39 = vmul.f32 %v4394_v6, %v775_v29 }
 0x43a   : > { %v819_v42 = vpack.c.bf16 %v789_v38, %v767_v35  ;;  %v794_v43 = vpop.permute.xlu0 %793  ;;  %v792_v44 = vpop.permute.xlu1 %791  ;;  %v820_v45 = vpack.c.bf16 %v790_v39, %v768_v37 }
 0x43b   : > { %v796_v46 = vsel %vm795_vm7, %v792_v44, %v794_v43  ;;  %v797_v2 = vsel %vm795_vm7, %v794_v43, %v792_v44 }
 0x43c   : > { %v811_v50 = vmul.f32 %v4406_v30, %v796_v46  ;;  %v812_v51 = vmul.f32 %v4409_v34, %v797_v2  ;;  %857 = vmatprep.subr.bf16.mxu0 %v820_v45 }
 0x43d   : > { %858 = vmatpush1.bf16.msra.mxu0 %v819_v42 }
 0x43e   : > { %v821_v58 = vpack.c.bf16 %v811_v50, %v811_v50  ;;  %v822_v11 = vpack.c.bf16 %v812_v51, %v812_v51 }
 0x440   : > { %3591 = vmatprep.subr.msk.bf16.mxu0 %vm6855_vm8, %v822_v11  ;;  %v846_v5 = vsel %vm6855_vm8, %v821_v58, 0  ;;  %v3752_v58 = vld [vmem:[#allocation4 + $0x44] ss:$16 sps:$4 sm:$0xff]   ;;  %v1046_v11 = vld [vmem:[%s6817_s3 + $0x20] sm:$0xff]  ;;  %vm1174_vm8 = vcmp.lt.s32.totalorder %v4026_v8, 68 }
 0x441   : > { %860 = vmatpush1.bf16.msra.mxu0 %v846_v5  ;;  %v1047_v5 = vld [vmem:[%s6817_s3 + $0x28] sm:$0xff] }
 0x444   : > { %3592 = vmatmul.mubr.msk.bf16.vlgmr.msra.gmra.mrb[4].mxu0 %vm6823_vm9, %v3751_v7  ;;  %vm1067_vm9 = vcmask 130048  }
 0x445   : > { %3595 = vmatprep.mubr.msk.bf16.mxu1 %vm1067_vm9, %v3752_v58 }
 0x44b   : > { %v830_v62 = vpop.permute.xlu1 %829  ;;  %v835_v35 = vpop.permute.xlu0 %834 }
 0x517   : > { %v885_v14 = vpop.f32.mrb[4].mxu0 }
 0x518   : > { %v886_v27 = vadd.f32 %v885_v14, %v830_v62  ;;  %v887_v29 = vpop.f32.mrb[5].mxu0 }
 0x519   : > { %v888_v37 = vadd.f32 %v887_v29, %v830_v62  ;;  %v889_v38 = vpop.f32.mrb[6].mxu0 }
 0x51a   : > { %v4424_v39 = vmax.f32 %v886_v27, 0.0  ;;  %v890_v42 = vadd.f32 %v889_v38, %v835_v35  ;;  %v891_v43 = vpop.f32.mrb[7].mxu0 }
 0x51b   : > { %v892_v44 = vadd.f32 %v891_v43, %v835_v35  ;;  %v4430_v46 = vmax.f32 %v888_v37, 0.0 }
 0x51c   : > { %v4426_v45 = vmax.f32 %v890_v42, 0.0  ;;  %898 = vrot.lane.b32.xlu1 %v4424_v39, %s3873_s11 }
 0x51d   : > { %v4432_v2 = vmax.f32 %v892_v44, 0.0 }
 0x51e   : > { %900 = vrot.lane.b32.xlu0 %v4426_v45, %s3873_s11 }
 0x520   : > { %914 = vrot.lane.b32.xlu1 %v4424_v39, %s3874_s12 }
 0x522   : > { %916 = vrot.lane.b32.xlu0 %v4426_v45, %s3874_s12 }
 0x524   : > { %930 = vrot.lane.b32.xlu1 %v4424_v39, %s3875_s13 }
 0x526   : > { %932 = vrot.lane.b32.xlu0 %v4426_v45, %s3875_s13 }
 0x528   : > { %946 = vrot.lane.b32.xlu1 %v4424_v39, %s3876_s14 }
 0x52a   : > { %948 = vrot.lane.b32.xlu0 %v4426_v45, %s3876_s14 }
 0x52c   : > { %962 = vrot.lane.b32.xlu1 %v4424_v39, %s3877_s17 }
 0x52e   : > { %964 = vrot.lane.b32.xlu0 %v4426_v45, %s3877_s17 }
 0x530   : > { %978 = vrot.lane.b32.xlu1 %v4424_v39, %s3878_s18 }
 0x532   : > { %980 = vrot.lane.b32.xlu0 %v4426_v45, %s3878_s18 }
 0x534   : > { %994 = vrot.lane.b32.xlu1 %v4424_v39, %s3879_s20 }
 0x536   : > { %996 = vrot.lane.b32.xlu0 %v4426_v45, %s3879_s20 }
 0x538   : > { %902 = vrot.lane.b32.xlu1 %v4430_v46, %s3873_s11 }
 0x53a   : > { %904 = vrot.lane.b32.xlu0 %v4432_v2, %s3873_s11 }
 0x53c   : > { %918 = vrot.lane.b32.xlu1 %v4430_v46, %s3874_s12 }
 0x53e   : > { %920 = vrot.lane.b32.xlu0 %v4432_v2, %s3874_s12 }
 0x540   : > { %934 = vrot.lane.b32.xlu1 %v4430_v46, %s3875_s13 }
 0x542   : > { %936 = vrot.lane.b32.xlu0 %v4432_v2, %s3875_s13 }
 0x544   : > { %950 = vrot.lane.b32.xlu1 %v4430_v46, %s3876_s14 }
 0x546   : > { %952 = vrot.lane.b32.xlu0 %v4432_v2, %s3876_s14 }
 0x548   : > { %1010 = vrot.lane.b32.xlu1 %v4424_v39, %s3880_s23 }
 0x54a   : > { %1012 = vrot.lane.b32.xlu0 %v4426_v45, %s3880_s23 }
 0x54c   : > { %966 = vrot.lane.b32.xlu1 %v4430_v46, %s3877_s17 }
 0x54e   : > { %968 = vrot.lane.b32.xlu0 %v4432_v2, %s3877_s17 }
 0x550   : > { %982 = vrot.lane.b32.xlu1 %v4430_v46, %s3878_s18 }
 0x552   : > { %984 = vrot.lane.b32.xlu0 %v4432_v2, %s3878_s18 }
 0x554   : > { %998 = vrot.lane.b32.xlu1 %v4430_v46, %s3879_s20 }
 0x556   : > { %1000 = vrot.lane.b32.xlu0 %v4432_v2, %s3879_s20 }
 0x558   : > { %1014 = vrot.lane.b32.xlu1 %v4430_v46, %s3880_s23 }
 0x55a   : > { %1016 = vrot.lane.b32.xlu0 %v4432_v2, %s3880_s23 }
 0x55c   : > { %1050 = vperm.xlu1 %3750, %v1046_v11  }
 0x55e   : > { %1055 = vperm.xlu0 %3749, %v1047_v5  }
 0x58e   : > { %v899_v7 = vpop.permute.xlu1 %898 }
 0x590   : > { %v901_v62 = vpop.permute.xlu0 %900 }
 0x592   : > { %v915_v14 = vpop.permute.xlu1 %914 }
 0x594   : > { %v917_v27 = vpop.permute.xlu0 %916 }
 0x596   : > { %v931_v29 = vpop.permute.xlu1 %930 }
 0x598   : > { %v933_v35 = vpop.permute.xlu0 %932 }
 0x59a   : > { %v947_v37 = vpop.permute.xlu1 %946 }
 0x59c   : > { %v949_v38 = vpop.permute.xlu0 %948 }
 0x59e   : > { %v4507_v42 = vpop.permute.xlu1 %962 }
 0x5a0   : > { %v4509_v43 = vpop.permute.xlu0 %964 }
 0x5a2   : > { %v4511_v44 = vpop.permute.xlu1 %978 }
 0x5a4   : > { %v4513_v58 = vpop.permute.xlu0 %980 }
 0x5a6   : > { %v4515_v4 = vpop.permute.xlu1 %994 }
 0x5a8   : > { %v4517_v11 = vpop.permute.xlu0 %996 }
 0x5aa   : > { %v903_v5 = vpop.permute.xlu1 %902 }
 0x5ab   : > { %v906_v50 = vsel %vm641_vm10, %v899_v7, %v903_v5  ;;  %v908_v51 = vsel %vm641_vm10, %v903_v5, %v899_v7 }
 0x5ac   : > { %v905_v56 = vpop.permute.xlu0 %904  ;;  %v910_v0 = vmul.f32 %v908_v51, %v4317_v19  ;;  %v911_v52 = vmul.f32 %v906_v50, %v4320_v20 }
 0x5ad   : > { %v907_v3 = vsel %vm641_vm10, %v901_v62, %v905_v56  ;;  %v909_v63 = vsel %vm641_vm10, %v905_v56, %v901_v62 }
 0x5ae   : > { %v912_v53 = vmul.f32 %v909_v63, %v4317_v19  ;;  %v913_v18 = vmul.f32 %v907_v3, %v4320_v20  ;;  %v919_v28 = vpop.permute.xlu1 %918 }
 0x5af   : > { %v922_v40 = vsel %vm663_vm11, %v915_v14, %v919_v28  ;;  %v924_v7 = vsel %vm663_vm11, %v919_v28, %v915_v14 }
 0x5b0   : > { %v1026_v5 = vpack.c.bf16 %v912_v53, %v910_v0  ;;  %v921_v49 = vpop.permute.xlu0 %920  ;;  %v1027_v36 = vpack.c.bf16 %v913_v18, %v911_v52  ;;  %v926_v63 = vmul.f32 %v924_v7, %v4324_v25  ;;  %v927_v3 = vmul.f32 %v922_v40, %v4327_v26 }
 0x5b1   : > { %v923_v56 = vsel %vm663_vm11, %v917_v27, %v921_v49  ;;  %v925_v50 = vsel %vm663_vm11, %v921_v49, %v917_v27 }
 0x5b2   : > { %v928_v51 = vmul.f32 %v925_v50, %v4324_v25  ;;  %v929_v62 = vmul.f32 %v923_v56, %v4327_v26  ;;  %1071 = vmatprep.subr.bf16.mxu1 %v1027_v36  ;;  %v935_v41 = vpop.permute.xlu1 %934 }
 0x5b3   : > { %v938_v28 = vsel %vm685_vm12, %v931_v29, %v935_v41  ;;  %v940_v18 = vsel %vm685_vm12, %v935_v41, %v931_v29  ;;  %1072 = vmatpush1.bf16.msra.mxu1 %v1026_v5 }
 0x5b4   : > { %v1028_v52 = vpack.c.bf16 %v928_v51, %v926_v63  ;;  %v937_v53 = vpop.permute.xlu0 %936  ;;  %v1029_v49 = vpack.c.bf16 %v929_v62, %v927_v3  ;;  %v942_v14 = vmul.f32 %v940_v18, %v4343_v54  ;;  %v943_v36 = vmul.f32 %v938_v28, %v4346_v55 }
 0x5b5   : > { %v939_v0 = vsel %vm685_vm12, %v933_v35, %v937_v53  ;;  %v941_v40 = vsel %vm685_vm12, %v937_v53, %v933_v35 }
 0x5b6   : > { %v944_v27 = vmul.f32 %v941_v40, %v4343_v54  ;;  %v945_v7 = vmul.f32 %v939_v0, %v4346_v55  ;;  %1073 = vmatprep.subr.bf16.mxu1 %v1029_v49  ;;  %v951_v41 = vpop.permute.xlu1 %950 }
 0x5b7   : > { %v954_v29 = vsel %vm707_vm13, %v947_v37, %v951_v41  ;;  %v956_v5 = vsel %vm707_vm13, %v951_v41, %v947_v37  ;;  %1074 = vmatpush1.bf16.msra.mxu1 %v1028_v52 }
 0x5b8   : > { %v1030_v56 = vpack.c.bf16 %v944_v27, %v942_v14  ;;  %v953_v50 = vpop.permute.xlu0 %952  ;;  %v1031_v35 = vpack.c.bf16 %v945_v7, %v943_v36  ;;  %v958_v51 = vmul.f32 %v956_v5, %v4350_v1  ;;  %v959_v62 = vmul.f32 %v954_v29, %v4353_v57 }
 0x5b9   : > { %v955_v63 = vsel %vm707_vm13, %v949_v38, %v953_v50  ;;  %v957_v3 = vsel %vm707_vm13, %v953_v50, %v949_v38  ;;  %v6994_v36 = vpack.c.bf16 %v4432_v2, %v4430_v46 }
 0x5ba   : > { %v960_v28 = vmul.f32 %v957_v3, %v4350_v1  ;;  %v961_v18 = vmul.f32 %v955_v63, %v4353_v57  ;;  %1075 = vmatprep.subr.bf16.mxu1 %v1031_v35  ;;  %v1011_v37 = vpop.permute.xlu1 %1010 }
 0x5bb   : > { %1076 = vmatpush1.bf16.msra.mxu1 %v1030_v56 }
 0x5bc   : > { %v1032_v52 = vpack.c.bf16 %v960_v28, %v958_v51  ;;  %v1013_v53 = vpop.permute.xlu0 %1012  ;;  %v1033_v49 = vpack.c.bf16 %v961_v18, %v959_v62 }
 0x5be   : > { %1077 = vmatprep.subr.bf16.mxu1 %v1033_v49  ;;  %v967_v0 = vpop.permute.xlu1 %966 }
 0x5bf   : > { %v970_v38 = vsel %vm729_vm14, %v4507_v42, %v967_v0  ;;  %v972_v40 = vsel %vm729_vm14, %v967_v0, %v4507_v42  ;;  %1078 = vmatpush1.bf16.msra.mxu1 %v1032_v52 }
 0x5c0   : > { %v969_v14 = vpop.permute.xlu0 %968  ;;  %1079 = vmatprep.subr.bf16.mxu1 %v6994_v36  ;;  %v974_v41 = vmul.f32 %v970_v38, %v4365_v12  ;;  %v975_v29 = vmul.f32 %v972_v40, %v4368_v13 }
 0x5c1   : > { %v971_v27 = vsel %vm729_vm14, %v4509_v43, %v969_v14  ;;  %v973_v7 = vsel %vm729_vm14, %v969_v14, %v4509_v43  ;;  %v6995_v43 = vpack.c.bf16 %v4426_v45, %v4424_v39 }
 0x5c2   : > { %v976_v42 = vmul.f32 %v971_v27, %v4365_v12  ;;  %v977_v5 = vmul.f32 %v973_v7, %v4368_v13  ;;  %v983_v56 = vpop.permute.xlu1 %982 }
 0x5c3   : > { %v986_v46 = vsel %vm751_vm15, %v4511_v44, %v983_v56  ;;  %v988_v2 = vsel %vm751_vm15, %v983_v56, %v4511_v44  ;;  %1080 = vmatpush1.bf16.msra.mxu1 %v6995_v43 }
 0x5c4   : > { %v1036_v50 = vpack.c.bf16 %v976_v42, %v974_v41  ;;  %v985_v35 = vpop.permute.xlu0 %984  ;;  %v1037_v63 = vpack.c.bf16 %v977_v5, %v975_v29  ;;  %v990_v62 = vmul.f32 %v986_v46, %v4384_v59  ;;  %v991_v28 = vmul.f32 %v988_v2, %v4387_v60 }
 0x5c5   : > { %v987_v3 = vsel %vm751_vm15, %v4513_v58, %v985_v35  ;;  %v989_v51 = vsel %vm751_vm15, %v985_v35, %v4513_v58 }
 0x5c6   : > { %v992_v44 = vmul.f32 %v987_v3, %v4384_v59  ;;  %v993_v39 = vmul.f32 %v989_v51, %v4387_v60  ;;  %v999_v45 = vpop.permute.xlu1 %998  ;;  %1081 = vmatprep.subr.bf16.mxu1 %v1037_v63  ;;  %v3754_v3 = vld [vmem:[#allocation4 + $0x40] ss:$16 sps:$4 sm:$0xff]  }
 0x5c7   : > { %v1002_v18 = vsel %vm773_vm6, %v4515_v4, %v999_v45  ;;  %v1004_v52 = vsel %vm773_vm6, %v999_v45, %v4515_v4  ;;  %1082 = vmatpush1.bf16.msra.mxu1 %v1036_v50 }
 0x5c8   : > { %v1038_v58 = vpack.c.bf16 %v992_v44, %v990_v62  ;;  %v1001_v49 = vpop.permute.xlu0 %1000  ;;  %v1039_v0 = vpack.c.bf16 %v993_v39, %v991_v28  ;;  %v1006_v14 = vmul.f32 %v1002_v18, %v4391_v61  ;;  %v1007_v36 = vmul.f32 %v1004_v52, %v4394_v6 }
 0x5c9   : > { %v1003_v38 = vsel %vm773_vm6, %v4517_v11, %v1001_v49  ;;  %v1005_v40 = vsel %vm773_vm6, %v1001_v49, %v4517_v11 }
 0x5ca   : > { %v1008_v27 = vmul.f32 %v1003_v38, %v4391_v61  ;;  %v1009_v4 = vmul.f32 %v1005_v40, %v4394_v6  ;;  %v1015_v7 = vpop.permute.xlu1 %1014  ;;  %1083 = vmatprep.subr.bf16.mxu1 %v1039_v0 }
 0x5cb   : > { %v1018_v41 = vsel %vm795_vm7, %v1011_v37, %v1015_v7  ;;  %v1020_v29 = vsel %vm795_vm7, %v1015_v7, %v1011_v37  ;;  %1084 = vmatpush1.bf16.msra.mxu1 %v1038_v58 }
 0x5cc   : > { %v1040_v42 = vpack.c.bf16 %v1008_v27, %v1006_v14  ;;  %v1017_v5 = vpop.permute.xlu0 %1016  ;;  %v1041_v11 = vpack.c.bf16 %v1009_v4, %v1007_v36  ;;  %v1022_v2 = vmul.f32 %v1018_v41, %v4406_v30  ;;  %v1023_v43 = vmul.f32 %v1020_v29, %v4409_v34 }
 0x5cd   : > { %v1019_v56 = vsel %vm795_vm7, %v1013_v53, %v1017_v5  ;;  %v1021_v46 = vsel %vm795_vm7, %v1017_v5, %v1013_v53 }
 0x5ce   : > { %v1024_v50 = vmul.f32 %v1019_v56, %v4406_v30  ;;  %v1025_v35 = vmul.f32 %v1021_v46, %v4409_v34  ;;  %1085 = vmatprep.subr.bf16.mxu1 %v1041_v11 }
 0x5cf   : > { %1086 = vmatpush1.bf16.msra.mxu1 %v1040_v42 }
 0x5d0   : > { %v1042_v37 = vpack.c.bf16 %v1024_v50, %v1022_v2  ;;  %v1043_v63 = vpack.c.bf16 %v1025_v35, %v1023_v43 }
 0x5d2   : > { %1087 = vmatprep.subr.bf16.mxu1 %v1043_v63 }
 0x5d3   : > { %1088 = vmatpush1.bf16.msra.mxu1 %v1042_v37 }
 0x5d6   : > { %1104 = vmatmul.mubr.bf16.vlgmr.msra.gmra.mrb[4].mxu1 %v3754_v3 }
 0x5db   : > { %v1051_v51 = vpop.permute.xlu1 %1050 }
 0x5dd   : > { %v1056_v44 = vpop.permute.xlu0 %1055 }
 0x6a9   : > { %v1105_v62 = vpop.f32.mrb[4].mxu1 }
 0x6aa   : > { %v1106_v28 = vadd.f32 %v1105_v62, %v1051_v51  ;;  %v1107_v53 = vpop.f32.mrb[5].mxu1 }
 0x6ab   : > { %v1109_v39 = vpop.f32.mrb[6].mxu1  ;;  %v1108_v49 = vadd.f32 %v1107_v53, %v1051_v51 }
 0x6ac   : > { %v4633_v45 = vmax.f32 %v1106_v28, 0.0  ;;  %v1110_v18 = vadd.f32 %v1109_v39, %v1056_v44  ;;  %v1111_v52 = vpop.f32.mrb[7].mxu1 }
 0x6ad   : > { %v1112_v0 = vadd.f32 %v1111_v52, %v1056_v44  ;;  %v4647_v38 = vmax.f32 %v1108_v49, 0.0 }
 0x6ae   : > { %6996 = vst [vmem:[#allocation50_spill] sm:$0xff] %v4633_v45  ;;  %v4635_v58 = vmax.f32 %v1110_v18, 0.0  ;;  %1118 = vrot.lane.b32.xlu1 %v4633_v45, %s3877_s17 }
 0x6af   : > { %6998 = vst [vmem:[#allocation52_spill] sm:$0xff] %v4647_v38  ;;  %v4651_v40 = vmax.f32 %v1112_v0, 0.0 }
 0x6b0   : > { %6997 = vst [vmem:[#allocation51_spill] sm:$0xff] %v4635_v58  ;;  %1120 = vrot.lane.b32.xlu0 %v4635_v58, %s3877_s17 }
 0x6b1   : > { %6999 = vst [vmem:[#allocation53_spill] sm:$0xff] %v4651_v40 }
 0x6b2   : > { %1134 = vrot.lane.b32.xlu1 %v4633_v45, %s3879_s20 }
 0x6b4   : > { %1136 = vrot.lane.b32.xlu0 %v4635_v58, %s3879_s20 }
 0x6b6   : > { %1150 = vrot.lane.b32.xlu1 %v4633_v45, %s3880_s23 }
 0x6b8   : > { %1152 = vrot.lane.b32.xlu0 %v4635_v58, %s3880_s23 }
 0x6ba   : > { %1122 = vrot.lane.b32.xlu1 %v4647_v38, %s3877_s17 }
 0x6bc   : > { %1124 = vrot.lane.b32.xlu0 %v4651_v40, %s3877_s17 }
 0x6be   : > { %1138 = vrot.lane.b32.xlu1 %v4647_v38, %s3879_s20 }
 0x6c0   : > { %1140 = vrot.lane.b32.xlu0 %v4651_v40, %s3879_s20 }
 0x6c2   : > { %1154 = vrot.lane.b32.xlu1 %v4647_v38, %s3880_s23 }
 0x6c4   : > { %1156 = vrot.lane.b32.xlu0 %v4651_v40, %s3880_s23 }
 0x720   : > { %v1119_v14 = vpop.permute.xlu1 %1118 }
 0x722   : > { %v1121_v36 = vpop.permute.xlu0 %1120 }
 0x724   : > { %v1135_v27 = vpop.permute.xlu1 %1134 }
 0x726   : > { %v1137_v4 = vpop.permute.xlu0 %1136 }
 0x728   : > { %v1151_v7 = vpop.permute.xlu1 %1150 }
 0x72a   : > { %v1153_v41 = vpop.permute.xlu0 %1152 }
 0x72c   : > { %v1123_v29 = vpop.permute.xlu1 %1122 }
 0x72d   : > { %v1126_v42 = vsel %vm729_vm14, %v1119_v14, %v1123_v29  ;;  %v1128_v5 = vsel %vm729_vm14, %v1123_v29, %v1119_v14 }
 0x72e   : > { %v1125_v11 = vpop.permute.xlu0 %1124  ;;  %v4674_v2 = vmul.f32 %v1126_v42, %v4365_v12  ;;  %v4683_v37 = vmul.f32 %v1128_v5, %v4368_v13  ;;  %v1130_v51 = vmax.f32 %v4633_v45, %v1126_v42  ;;  %v1131_v62 = vmax.f32 %v4647_v38, %v1128_v5 }
 0x72f   : > { %v1127_v56 = vsel %vm729_vm14, %v1121_v36, %v1125_v11  ;;  %v1129_v46 = vsel %vm729_vm14, %v1125_v11, %v1121_v36 }
 0x730   : > { %7000 = vst [vmem:[#allocation54_spill] sm:$0xff] %v4674_v2  ;;  %v4677_v43 = vmul.f32 %v1127_v56, %v4365_v12  ;;  %v4680_v50 = vmul.f32 %v1129_v46, %v4368_v13  ;;  %v1139_v35 = vpop.permute.xlu1 %1138  ;;  %7003 = vst [vmem:[#allocation57_spill] sm:$0xff] %v4683_v37  ;;  %v1132_v28 = vmax.f32 %v4635_v58, %v1127_v56  ;;  %v1317_v37 = vld [vmem:[#allocation2 + $0x30] ss:$8 sm:$0x3] }
 0x731   : > { %v1142_v63 = vsel %vm773_vm6, %v1135_v27, %v1139_v35  ;;  %v1144_v3 = vsel %vm773_vm6, %v1139_v35, %v1135_v27  ;;  %v1133_v39 = vmax.f32 %v4651_v40, %v1129_v46 }
 0x732   : > { %7001 = vst [vmem:[#allocation55_spill] sm:$0xff] %v4677_v43  ;;  %7002 = vst [vmem:[#allocation56_spill] sm:$0xff] %v4680_v50  ;;  %v1141_v44 = vpop.permute.xlu0 %1140  ;;  %v1146_v0 = vmax.f32 %v1130_v51, %v1142_v63  ;;  %v1147_v14 = vmax.f32 %v1131_v62, %v1144_v3  ;;  %v4702_v36 = vmul.f32 %v1142_v63, %v4391_v61  ;;  %v1300_v43 = vld [vmem:[#allocation2 + $0x27] ss:$8 sm:$0x3] }
 0x733   : > { %v1143_v18 = vsel %vm773_vm6, %v1137_v4, %v1141_v44  ;;  %v1145_v52 = vsel %vm773_vm6, %v1141_v44, %v1137_v4  ;;  %v4708_v42 = vmul.f32 %v1144_v3, %v4394_v6  ;;  %v4920_v50 = vrot.slane %v1300_v43, %v4028_v9 }
 0x734   : > { %7004 = vst [vmem:[#allocation58_spill] sm:$0xff] %v4702_v36  ;;  %v4705_v27 = vmul.f32 %v1143_v18, %v4391_v61  ;;  %v1155_v29 = vpop.permute.xlu1 %1154  ;;  %v1148_v5 = vmax.f32 %v1132_v28, %v1143_v18  ;;  %v1149_v56 = vmax.f32 %v1133_v39, %v1145_v52  ;;  %v4715_v46 = vmul.f32 %v1145_v52, %v4394_v6 }
 0x735   : > { %7006 = vst [vmem:[#allocation60_spill] sm:$0xff] %v4708_v42  ;;  %v1158_v11 = vsel %vm795_vm7, %v1151_v7, %v1155_v29  ;;  %v1160_v4 = vsel %vm795_vm7, %v1155_v29, %v1151_v7 }
 0x736   : > { %7005 = vst [vmem:[#allocation59_spill] sm:$0xff] %v4705_v27  ;;  %7007 = vst [vmem:[#allocation61_spill] sm:$0xff] %v4715_v46  ;;  %v4719_v63 = vmax.f32 %v1146_v0, %v1158_v11  ;;  %v1157_v51 = vpop.permute.xlu0 %1156  ;;  %v4721_v62 = vmax.f32 %v1147_v14, %v1160_v4  ;;  %v4724_v3 = vmul.f32 %v1158_v11, %v4406_v30  ;;  %v1180_v11 = vld [vmem:[#allocation2 + $0x22] ss:$8 sm:$0x3] }
 0x737   : > { %v1159_v28 = vsel %vm795_vm7, %v1153_v41, %v1157_v51  ;;  %v1161_v7 = vsel %vm795_vm7, %v1157_v51, %v1153_v41  ;;  %v4743_v0 = vmul.f32 %v1160_v4, %v4409_v34  ;;  %v1389_v4 = vld [vmem:[%s6817_s3 + $0x30] sm:$0xff]  ;;  %v1391_v51 = vld [vmem:[%s6817_s3 + $0x40] sm:$0xff] }
 0x738   : > { %7008 = vst [vmem:[#allocation62_spill] sm:$0xff] %v4724_v3  ;;  %v4730_v44 = vmax.f32 %v1148_v5, %v1159_v28  ;;  %v4732_v39 = vmax.f32 %v1149_v56, %v1161_v7  ;;  %v4735_v18 = vmul.f32 %v1159_v28, %v4406_v30  ;;  %v4738_v52 = vmul.f32 %v1161_v7, %v4409_v34  ;;  %v1390_v56 = vld [vmem:[%s6817_s3 + $0x38] sm:$0xff]  ;;  %v1392_v28 = vld [vmem:[%s6817_s3 + $0x48] sm:$0xff] }
 0x739   : > { %1166 = vrot.lane.b32.xlu1 %v4719_v63, %s3881_s22  ;;  %7011 = vst [vmem:[#allocation65_spill] sm:$0xff] %v4743_v0  ;;  %v3755_v7 = vld [vmem:[#allocation4 + $0x64] ss:$16 sps:$4 sm:$0xff]   ;;  %v4811_v5 = vrot.slane %v1180_v11, %v4030_v10 }
 0x73a   : > { %7009 = vst [vmem:[#allocation63_spill] sm:$0xff] %v4735_v18  ;;  %7010 = vst [vmem:[#allocation64_spill] sm:$0xff] %v4738_v52  ;;  %1168 = vrot.lane.b32.xlu0 %v4730_v44, %s3881_s22  ;;  %3600 = vmatprep.mubr.msk.bf16.mxu0 %vm1067_vm9, %v3755_v7 }
 0x73d   : > { %1170 = vrot.lane.b32.xlu1 %v4721_v62, %s3881_s22 }
 0x73e   : > { %1172 = vrot.lane.b32.xlu0 %v4732_v39, %s3881_s22 }
 0x741   : > { %1196 = vrot.lane.b32.xlu1 %v4719_v63, %s3882_s24 }
 0x742   : > { %1198 = vrot.lane.b32.xlu0 %v4730_v44, %s3882_s24 }
 0x745   : > { %1200 = vrot.lane.b32.xlu1 %v4721_v62, %s3882_s24 }
 0x746   : > { %1202 = vrot.lane.b32.xlu0 %v4732_v39, %s3882_s24 }
 0x749   : > { %1226 = vrot.lane.b32.xlu1 %v4719_v63, %s3883_s7 }
 0x74a   : > { %1228 = vrot.lane.b32.xlu0 %v4730_v44, %s3883_s7 }
 0x74d   : > { %1230 = vrot.lane.b32.xlu1 %v4721_v62, %s3883_s7 }
 0x74e   : > { %1232 = vrot.lane.b32.xlu0 %v4732_v39, %s3883_s7 }
 0x751   : > { %1256 = vrot.lane.b32.xlu1 %v4719_v63, %s3884_s8 }
 0x752   : > { %1258 = vrot.lane.b32.xlu0 %v4730_v44, %s3884_s8 }
 0x755   : > { %1260 = vrot.lane.b32.xlu1 %v4721_v62, %s3884_s8 }
 0x756   : > { %1262 = vrot.lane.b32.xlu0 %v4732_v39, %s3884_s8 }
 0x759   : > { %1286 = vrot.lane.b32.xlu1 %v4719_v63, %s3885_s9 }
 0x75a   : > { %1288 = vrot.lane.b32.xlu0 %v4730_v44, %s3885_s9 }
 0x75d   : > { %1290 = vrot.lane.b32.xlu1 %v4721_v62, %s3885_s9 }
 0x75e   : > { %1292 = vrot.lane.b32.xlu0 %v4732_v39, %s3885_s9 }
 0x761   : > { %1395 = vperm.xlu1 %3750, %v1389_v4   ;;  %v4808_v4 = vrot.slane %v1180_v11, %v4028_v9 }
 0x762   : > { %1400 = vperm.xlu0 %3749, %v1390_v56  }
 0x765   : > { %1405 = vperm.xlu1 %3750, %v1391_v51  }
 0x766   : > { %1410 = vperm.xlu0 %3749, %v1392_v28  }
 0x7ab   : > { %v1167_v41 = vpop.permute.xlu1 %1166 }
 0x7ac   : > { %v1169_v35 = vpop.permute.xlu0 %1168 }
 0x7af   : > { %v1171_v56 = vpop.permute.xlu1 %1170 }
 0x7b0   : > { %v4815_v53 = vsel %vm1174_vm8, %v1167_v41, %v1171_v56  ;;  %v4819_v51 = vsel %vm1174_vm8, %v1171_v56, %v1167_v41  ;;  %v1173_v28 = vpop.permute.xlu0 %1172 }
 0x7b1   : > { %v4823_v7 = vsel %vm1174_vm8, %v1169_v35, %v1173_v28  ;;  %v4827_v49 = vsel %vm1174_vm8, %v1173_v28, %v1169_v35  ;;  %v1192_v11 = vmul.f32 %v4808_v4, %v4819_v51  ;;  %v1193_v29 = vmul.f32 %v4811_v5, %v4815_v53 }
 0x7b2   : > { %v1194_v14 = vmul.f32 %v4808_v4, %v4827_v49  ;;  %v1195_v41 = vmul.f32 %v4811_v5, %v4823_v7  ;;  %v4839_v35 = vrot.slane %v1210_v32, %v4028_v9  ;;  %v4842_v28 = vrot.slane %v1210_v32, %v4030_v10 }
 0x7b3   : > { %v1197_v56 = vpop.permute.xlu1 %1196 }
 0x7b4   : > { %v1367_v33 = vpack.c.bf16 %v1194_v14, %v1192_v11  ;;  %v1199_v23 = vpop.permute.xlu0 %1198  ;;  %v1368_v31 = vpack.c.bf16 %v1195_v41, %v1193_v29 }
 0x7b6   : > { %1437 = vmatprep.subr.bf16.mxu0 %v1368_v31 }
 0x7b7   : > { %v1201_v22 = vpop.permute.xlu1 %1200  ;;  %1438 = vmatpush1.bf16.msra.mxu0 %v1367_v33 }
 0x7b8   : > { %v4846_v24 = vsel %vm1204_vm5, %v1197_v56, %v1201_v22  ;;  %v4850_v16 = vsel %vm1204_vm5, %v1201_v22, %v1197_v56  ;;  %v1203_v14 = vpop.permute.xlu0 %1202  ;;  %v1240_v56 = vld [vmem:[#allocation2 + $0x24] ss:$8 sm:$0x3] }
 0x7b9   : > { %v4854_v31 = vsel %vm1204_vm5, %v1199_v23, %v1203_v14  ;;  %v4858_v29 = vsel %vm1204_vm5, %v1203_v14, %v1199_v23  ;;  %v1222_v32 = vmul.f32 %v4839_v35, %v4850_v16  ;;  %v1223_v11 = vmul.f32 %v4842_v28, %v4846_v24 }
 0x7ba   : > { %v1224_v22 = vmul.f32 %v4839_v35, %v4858_v29  ;;  %v1225_v33 = vmul.f32 %v4842_v28, %v4854_v31  ;;  %v4870_v23 = vrot.slane %v1240_v56, %v4028_v9  ;;  %v4873_v14 = vrot.slane %v1240_v56, %v4030_v10  ;;  %v1270_v56 = vld [vmem:[#allocation2 + $0x25] ss:$8 sm:$0x3] }
 0x7bb   : > { %v1227_v41 = vpop.permute.xlu1 %1226 }
 0x7bc   : > { %v1369_v21 = vpack.c.bf16 %v1224_v22, %v1222_v32  ;;  %v1229_v15 = vpop.permute.xlu0 %1228  ;;  %v1370_v17 = vpack.c.bf16 %v1225_v33, %v1223_v11 }
 0x7be   : > { %1439 = vmatprep.subr.bf16.mxu0 %v1370_v17 }
 0x7bf   : > { %v1231_v48 = vpop.permute.xlu1 %1230  ;;  %1440 = vmatpush1.bf16.msra.mxu0 %v1369_v21 }
 0x7c0   : > { %v4877_v47 = vsel %vm1234_vm4, %v1227_v41, %v1231_v48  ;;  %v4881_v3 = vsel %vm1234_vm4, %v1231_v48, %v1227_v41  ;;  %v1233_v32 = vpop.permute.xlu0 %1232 }
 0x7c1   : > { %v4885_v17 = vsel %vm1234_vm4, %v1229_v15, %v1233_v32  ;;  %v4889_v11 = vsel %vm1234_vm4, %v1233_v32, %v1229_v15  ;;  %v1252_v22 = vmul.f32 %v4870_v23, %v4881_v3  ;;  %v1253_v33 = vmul.f32 %v4873_v14, %v4877_v47 }
 0x7c2   : > { %v1254_v48 = vmul.f32 %v4870_v23, %v4889_v11  ;;  %v1255_v21 = vmul.f32 %v4873_v14, %v4885_v17  ;;  %v4901_v15 = vrot.slane %v1270_v56, %v4028_v9  ;;  %v4904_v32 = vrot.slane %v1270_v56, %v4030_v10 }
 0x7c3   : > { %v1257_v41 = vpop.permute.xlu1 %1256 }
 0x7c4   : > { %v1371_v18 = vpack.c.bf16 %v1254_v48, %v1252_v22  ;;  %v1259_v0 = vpop.permute.xlu0 %1258  ;;  %v1372_v52 = vpack.c.bf16 %v1255_v21, %v1253_v33 }
 0x7c6   : > { %1441 = vmatprep.subr.bf16.mxu0 %v1372_v52 }
 0x7c7   : > { %v1261_v36 = vpop.permute.xlu1 %1260  ;;  %1442 = vmatpush1.bf16.msra.mxu0 %v1371_v18 }
 0x7c8   : > { %v1265_v27 = vsel %vm1264_vm2, %v1257_v41, %v1261_v36  ;;  %v1267_v42 = vsel %vm1264_vm2, %v1261_v36, %v1257_v41  ;;  %v1263_v22 = vpop.permute.xlu0 %1262 }
 0x7c9   : > { %v1266_v33 = vsel %vm1264_vm2, %v1259_v0, %v1263_v22  ;;  %v1268_v52 = vsel %vm1264_vm2, %v1263_v22, %v1259_v0  ;;  %v1282_v48 = vmul.f32 %v4901_v15, %v1267_v42  ;;  %v1283_v21 = vmul.f32 %v4904_v32, %v1265_v27 }
 0x7ca   : > { %v1284_v56 = vmul.f32 %v4901_v15, %v1268_v52  ;;  %v1285_v46 = vmul.f32 %v4904_v32, %v1266_v33  ;;  %v4923_v42 = vrot.slane %v1300_v43, %v4030_v10  ;;  %v4926_v0 = vrot.slane %v1317_v37, %v4030_v10 }
 0x7cb   : > { %v1287_v2 = vpop.permute.xlu1 %1286  ;;  %v7012_v52 = vpack.c.bf16 %v4732_v39, %v4721_v62  ;;  %v4946_v62 = vrot.slane %v1317_v37, %v4028_v9 }
 0x7cc   : > { %v1373_v36 = vpack.c.bf16 %v1284_v56, %v1282_v48  ;;  %v1289_v18 = vpop.permute.xlu0 %1288  ;;  %v1374_v41 = vpack.c.bf16 %v1285_v46, %v1283_v21  ;;  %v1332_v43 = vmul.f32 %v4926_v0, %v4827_v49  ;;  %v1334_v48 = vld [vmem:[#allocation2 + $0x31] ss:$8 sm:$0x3]  ;;  %v7013_v49 = vpack.c.bf16 %v4730_v44, %v4719_v63 }
 0x7cd   : > { %v1330_v39 = vmul.f32 %v4926_v0, %v4819_v51  ;;  %v1329_v63 = vmul.f32 %v4946_v62, %v4815_v53  ;;  %v4963_v44 = vrot.slane %v1334_v48, %v4028_v9 }
 0x7ce   : > { %1443 = vmatprep.subr.bf16.mxu0 %v1374_v41 }
 0x7cf   : > { %v1291_v27 = vpop.permute.xlu1 %1290  ;;  %1444 = vmatpush1.bf16.msra.mxu0 %v1373_v36  ;;  %v1346_v53 = vmul.f32 %v4963_v44, %v4846_v24  ;;  %v3757_v24 = vld [vmem:[#allocation4 + $0x60] ss:$16 sps:$4 sm:$0xff]  }
 0x7d0   : > { %v1295_v22 = vsel %vm1294_vm0, %v1287_v2, %v1291_v27  ;;  %v1297_v33 = vsel %vm1294_vm0, %v1291_v27, %v1287_v2  ;;  %v1293_v46 = vpop.permute.xlu0 %1292  ;;  %1445 = vmatprep.subr.bf16.mxu0 %v7012_v52  ;;  %v1351_v52 = vld [vmem:[#allocation2 + $0x32] ss:$8 sm:$0x3] }
 0x7d1   : > { %v1296_v21 = vsel %vm1294_vm0, %v1289_v18, %v1293_v46  ;;  %v1298_v56 = vsel %vm1294_vm0, %v1293_v46, %v1289_v18  ;;  %v1312_v41 = vmul.f32 %v4920_v50, %v1295_v22  ;;  %v1313_v2 = vmul.f32 %v4923_v42, %v1297_v33 }
 0x7d2   : > { %v1314_v36 = vmul.f32 %v4920_v50, %v1296_v21  ;;  %v1315_v27 = vmul.f32 %v4923_v42, %v1298_v56  ;;  %v4954_v18 = vrot.slane %v1334_v48, %v4030_v10  ;;  %v1331_v33 = vmul.f32 %v4946_v62, %v4823_v7 }
 0x7d3   : > { %1446 = vmatpush1.bf16.msra.mxu0 %v7013_v49  ;;  %v1380_v21 = vpack.c.bf16 %v1332_v43, %v1330_v39  ;;  %v4968_v56 = vrot.slane %v1351_v52, %v4030_v10  ;;  %v4977_v48 = vrot.slane %v1351_v52, %v4028_v9  ;;  %v3758_v49 = vld [vmem:[#allocation4 + $0x84] ss:$16 sps:$4 sm:$0xff]   ;;  %v3760_v39 = vld [vmem:[#allocation4 + $0x80] ss:$16 sps:$4 sm:$0xff]  }
 0x7d4   : > { %v1377_v22 = vpack.c.bf16 %v1314_v36, %v1312_v41  ;;  %v1378_v46 = vpack.c.bf16 %v1315_v27, %v1313_v2  ;;  %v1349_v37 = vmul.f32 %v4954_v18, %v4858_v29  ;;  %v1347_v51 = vmul.f32 %v4954_v18, %v4850_v16 }
 0x7d5   : > { %v1379_v7 = vpack.c.bf16 %v1331_v33, %v1329_v63  ;;  %v1348_v29 = vmul.f32 %v4963_v44, %v4854_v31  ;;  %v1366_v43 = vmul.f32 %v4968_v56, %v4889_v11  ;;  %v1364_v16 = vmul.f32 %v4968_v56, %v4881_v3 }
 0x7d6   : > { %1447 = vmatprep.subr.bf16.mxu0 %v1378_v46  ;;  %v1382_v41 = vpack.c.bf16 %v1349_v37, %v1347_v51  ;;  %v1365_v36 = vmul.f32 %v4977_v48, %v4885_v17  ;;  %v1363_v11 = vmul.f32 %v4977_v48, %v4877_v47 }
 0x7d7   : > { %1448 = vmatpush1.bf16.msra.mxu0 %v1377_v22  ;;  %v1381_v2 = vpack.c.bf16 %v1348_v29, %v1346_v53  ;;  %v1384_v31 = vpack.c.bf16 %v1366_v43, %v1364_v16 }
 0x7d8   : > { %1449 = vmatprep.subr.bf16.mxu0 %v1380_v21  ;;  %v1383_v27 = vpack.c.bf16 %v1365_v36, %v1363_v11 }
 0x7db   : > { %1450 = vmatpush1.bf16.msra.mxu0 %v1379_v7 }
 0x7dc   : > { %1451 = vmatprep.subr.bf16.mxu0 %v1382_v41 }
 0x7df   : > { %1452 = vmatpush1.bf16.msra.mxu0 %v1381_v2 }
 0x7e0   : > { %1453 = vmatprep.subr.bf16.mxu0 %v1384_v31  ;;  %v1396_v3 = vpop.permute.xlu1 %1395 }
 0x7e1   : > { %v1401_v17 = vpop.permute.xlu0 %1400 }
 0x7e3   : > { %1454 = vmatpush1.bf16.msra.mxu0 %v1383_v27 }
 0x7e4   : > { %v1406_v7 = vpop.permute.xlu1 %1405 }
 0x7e5   : > { %v1411_v53 = vpop.permute.xlu0 %1410 }
 0x7e6   : > { %1470 = vmatmul.mubr.bf16.vlgmr.msra.gmra.mrb[8].mxu0 %v3757_v24 }
 0x7e7   : > { %3601 = vmatprep.mubr.msk.bf16.mxu0 %vm1067_vm9, %v3758_v49 }
 0x7ee   : > { %1480 = vmatmul.mubr.bf16.gmra.mrb[12].mxu0 %v3760_v39 }
 0x8b9   : > { %v1471_v22 = vpop.f32.mrb[8].mxu0 }
 0x8ba   : > { %v1472_v46 = vadd.f32 %v1471_v22, %v1396_v3  ;;  %v1473_v33 = vpop.f32.mrb[9].mxu0 }
 0x8bb   : > { %v1475_v52 = vpop.f32.mrb[10].mxu0  ;;  %v1474_v2 = vadd.f32 %v1473_v33, %v1396_v3 }
 0x8bc   : > { %v4986_v37 = vmax.f32 %v1472_v46, 0.0  ;;  %v1476_v47 = vadd.f32 %v1475_v52, %v1401_v17  ;;  %v1477_v21 = vpop.f32.mrb[11].mxu0  ;;  %v1726_v52 = vld [vmem:[%s6817_s3 + $0x50] sm:$0xff] }
 0x8bd   : > { %v1478_v11 = vadd.f32 %v1477_v21, %v1401_v17  ;;  %v5006_v49 = vmax.f32 %v1474_v2, 0.0  ;;  %v1728_v21 = vld [vmem:[%s6817_s3 + $0x60] sm:$0xff] }
 0x8be   : > { %v4988_v63 = vmax.f32 %v1476_v47, 0.0  ;;  %1498 = vrot.lane.b32.xlu1 %v4986_v37, %s3881_s22  ;;  %v1727_v47 = vld [vmem:[%s6817_s3 + $0x58] sm:$0xff] }
 0x8bf   : > { %v5012_v3 = vmax.f32 %v1478_v11, 0.0 }
 0x8c0   : > { %1500 = vrot.lane.b32.xlu0 %v4988_v63, %s3881_s22 }
 0x8c1   : > { %v1481_v29 = vpop.f32.mrb[12].mxu0 }
 0x8c2   : > { %v1482_v43 = vadd.f32 %v1481_v29, %v1406_v7  ;;  %v1483_v41 = vpop.f32.mrb[13].mxu0  ;;  %1530 = vrot.lane.b32.xlu1 %v4986_v37, %s3882_s24  ;;  %v3763_v29 = vld [vmem:[#allocation4 + $0xa4] ss:$16 sps:$4 sm:$0xff]  }
 0x8c3   : > { %v1485_v16 = vpop.f32.mrb[14].mxu0  ;;  %v1484_v22 = vadd.f32 %v1483_v41, %v1406_v7  ;;  %v1729_v7 = vld [vmem:[%s6817_s3 + $0x68] sm:$0xff]  ;;  %1819 = vmatprep.mubr.bf16.mxu1 %v3763_v29 }
 0x8c4   : > { %v1486_v36 = vadd.f32 %v1485_v16, %v1411_v53  ;;  %v1487_v31 = vpop.f32.mrb[15].mxu0  ;;  %1532 = vrot.lane.b32.xlu0 %v4988_v63, %s3882_s24  ;;  %v5000_v27 = vmax.f32 %v1482_v43, 0.0 }
 0x8c5   : > { %v1488_v46 = vadd.f32 %v1487_v31, %v1411_v53  ;;  %v5036_v33 = vmax.f32 %v1484_v22, 0.0 }
 0x8c6   : > { %v5002_v24 = vmax.f32 %v1486_v36, 0.0  ;;  %1562 = vrot.lane.b32.xlu1 %v4986_v37, %s3883_s7 }
 0x8c7   : > { %v5040_v17 = vmax.f32 %v1488_v46, 0.0 }
 0x8c8   : > { %1564 = vrot.lane.b32.xlu0 %v4988_v63, %s3883_s7 }
 0x8ca   : > { %1506 = vrot.lane.b32.xlu1 %v5006_v49, %s3881_s22 }
 0x8cc   : > { %1508 = vrot.lane.b32.xlu0 %v5012_v3, %s3881_s22 }
 0x8ce   : > { %1538 = vrot.lane.b32.xlu1 %v5006_v49, %s3882_s24 }
 0x8d0   : > { %1540 = vrot.lane.b32.xlu0 %v5012_v3, %s3882_s24 }
 0x8d2   : > { %1570 = vrot.lane.b32.xlu1 %v5006_v49, %s3883_s7 }
 0x8d4   : > { %1572 = vrot.lane.b32.xlu0 %v5012_v3, %s3883_s7 }
 0x8d6   : > { %1502 = vrot.lane.b32.xlu1 %v5000_v27, %s3881_s22 }
 0x8d8   : > { %1504 = vrot.lane.b32.xlu0 %v5002_v24, %s3881_s22 }
 0x8da   : > { %1534 = vrot.lane.b32.xlu1 %v5000_v27, %s3882_s24 }
 0x8dc   : > { %1536 = vrot.lane.b32.xlu0 %v5002_v24, %s3882_s24 }
 0x8de   : > { %1566 = vrot.lane.b32.xlu1 %v5000_v27, %s3883_s7 }
 0x8e0   : > { %1568 = vrot.lane.b32.xlu0 %v5002_v24, %s3883_s7 }
 0x8e2   : > { %1510 = vrot.lane.b32.xlu1 %v5036_v33, %s3881_s22 }
 0x8e4   : > { %1512 = vrot.lane.b32.xlu0 %v5040_v17, %s3881_s22 }
 0x8e6   : > { %1594 = vrot.lane.b32.xlu1 %v4986_v37, %s3884_s8 }
 0x8e8   : > { %1596 = vrot.lane.b32.xlu0 %v4988_v63, %s3884_s8 }
 0x8ea   : > { %1542 = vrot.lane.b32.xlu1 %v5036_v33, %s3882_s24 }
 0x8ec   : > { %1544 = vrot.lane.b32.xlu0 %v5040_v17, %s3882_s24 }
 0x8ee   : > { %1574 = vrot.lane.b32.xlu1 %v5036_v33, %s3883_s7 }
 0x8f0   : > { %1604 = vrot.lane.b32.xlu0 %v5012_v3, %s3884_s8 }
 0x8f2   : > { %1602 = vrot.lane.b32.xlu1 %v5006_v49, %s3884_s8 }
 0x8f4   : > { %1576 = vrot.lane.b32.xlu0 %v5040_v17, %s3883_s7 }
 0x8f6   : > { %1598 = vrot.lane.b32.xlu1 %v5000_v27, %s3884_s8 }
 0x8f8   : > { %1600 = vrot.lane.b32.xlu0 %v5002_v24, %s3884_s8 }
 0x8fa   : > { %1606 = vrot.lane.b32.xlu1 %v5036_v33, %s3884_s8 }
 0x8fc   : > { %1608 = vrot.lane.b32.xlu0 %v5040_v17, %s3884_s8 }
 0x8fe   : > { %1626 = vrot.lane.b32.xlu1 %v4986_v37, %s3885_s9 }
 0x900   : > { %1628 = vrot.lane.b32.xlu0 %v4988_v63, %s3885_s9 }
 0x902   : > { %1634 = vrot.lane.b32.xlu1 %v5006_v49, %s3885_s9 }
 0x904   : > { %1636 = vrot.lane.b32.xlu0 %v5012_v3, %s3885_s9 }
 0x906   : > { %1630 = vrot.lane.b32.xlu1 %v5000_v27, %s3885_s9 }
 0x908   : > { %1632 = vrot.lane.b32.xlu0 %v5002_v24, %s3885_s9 }
 0x90a   : > { %1638 = vrot.lane.b32.xlu1 %v5036_v33, %s3885_s9 }
 0x90c   : > { %1640 = vrot.lane.b32.xlu0 %v5040_v17, %s3885_s9 }
 0x90e   : > { %1732 = vperm.xlu1 %3750, %v1726_v52  }
 0x910   : > { %1737 = vperm.xlu0 %3749, %v1727_v47  }
 0x912   : > { %1742 = vperm.xlu1 %3750, %v1728_v21  }
 0x914   : > { %1747 = vperm.xlu0 %3749, %v1729_v7  }
 0x916   : > { %2337 = vrot.lane.b32.xlu1 %v4633_v45, %s3873_s11 }
 0x918   : > { %2339 = vrot.lane.b32.xlu0 %v4635_v58, %s3873_s11 }
 0x91a   : > { %2341 = vrot.lane.b32.xlu1 %v4647_v38, %s3873_s11 }
 0x91c   : > { %2343 = vrot.lane.b32.xlu0 %v4651_v40, %s3873_s11 }
 0x930   : > { %v1499_v43 = vpop.permute.xlu1 %1498 }
 0x932   : > { %v1501_v41 = vpop.permute.xlu0 %1500 }
 0x934   : > { %v1531_v53 = vpop.permute.xlu1 %1530 }
 0x936   : > { %v1533_v16 = vpop.permute.xlu0 %1532 }
 0x938   : > { %v5106_v2 = vpop.permute.xlu1 %1562 }
 0x93a   : > { %v5108_v36 = vpop.permute.xlu0 %1564 }
 0x93c   : > { %v1507_v31 = vpop.permute.xlu1 %1506 }
 0x93d   : > { %v1514_v11 = vsel %vm1174_vm8, %v1499_v43, %v1507_v31  ;;  %v1518_v46 = vsel %vm1174_vm8, %v1507_v31, %v1499_v43 }
 0x93e   : > { %v1509_v22 = vpop.permute.xlu0 %1508  ;;  %v5119_v21 = vmul.f32 %v1514_v11, %v4946_v62  ;;  %v1522_v43 = vmul.f32 %v1518_v46, %v4808_v4  ;;  %v5134_v34 = vmul.f32 %v1518_v46, %v4926_v0 }
 0x93f   : > { %v1515_v52 = vsel %vm1174_vm8, %v1501_v41, %v1509_v22  ;;  %v1519_v47 = vsel %vm1174_vm8, %v1509_v22, %v1501_v41  ;;  %v1523_v22 = vmul.f32 %v1514_v11, %v4811_v5 }
 0x940   : > { %v1524_v7 = vmul.f32 %v1519_v47, %v4808_v4  ;;  %v5123_v29 = vmul.f32 %v1515_v52, %v4946_v62  ;;  %v1539_v39 = vpop.permute.xlu1 %1538  ;;  %v1525_v51 = vmul.f32 %v1515_v52, %v4811_v5  ;;  %v5127_v30 = vmul.f32 %v1519_v47, %v4926_v0 }
 0x941   : > { %v5178_v25 = vsel %vm1204_vm5, %v1539_v39, %v1531_v53 }
 0x942   : > { %v1541_v41 = vpop.permute.xlu0 %1540  ;;  %v1682_v61 = vpack.c.bf16 %v1524_v7, %v1522_v43  ;;  %v1683_v59 = vpack.c.bf16 %v1525_v51, %v1523_v22 }
 0x943   : > { %v5140_v11 = vsel %vm1204_vm5, %v1533_v16, %v1541_v41  ;;  %v5156_v43 = vsel %vm1204_vm5, %v1541_v41, %v1533_v16 }
 0x944   : > { %v1571_v6 = vpop.permute.xlu1 %1570  ;;  %1787 = vmatprep.subr.bf16.mxu1 %v1683_v59  ;;  %v5152_v59 = vsel %vm1204_vm5, %v1531_v53, %v1539_v39  ;;  %v1557_v22 = vmul.f32 %v5140_v11, %v4842_v28 }
 0x945   : > { %1788 = vmatpush1.bf16.msra.mxu1 %v1682_v61 }
 0x946   : > { %v1573_v60 = vpop.permute.xlu0 %1572 }
 0x948   : > { %v1503_v47 = vpop.permute.xlu1 %1502 }
 0x94a   : > { %v1505_v12 = vpop.permute.xlu0 %1504 }
 0x94c   : > { %v1535_v13 = vpop.permute.xlu1 %1534 }
 0x94e   : > { %v1537_v1 = vpop.permute.xlu0 %1536 }
 0x950   : > { %v1567_v31 = vpop.permute.xlu1 %1566 }
 0x952   : > { %v1569_v57 = vpop.permute.xlu0 %1568 }
 0x954   : > { %v1511_v46 = vpop.permute.xlu1 %1510 }
 0x955   : > { %v5144_v51 = vsel %vm1174_vm8, %v1503_v47, %v1511_v46  ;;  %v5148_v7 = vsel %vm1174_vm8, %v1511_v46, %v1503_v47 }
 0x956   : > { %v1513_v61 = vpop.permute.xlu0 %1512  ;;  %v1526_v46 = vmul.f32 %v5148_v7, %v4808_v4  ;;  %v1527_v54 = vmul.f32 %v5144_v51, %v4811_v5 }
 0x957   : > { %v5162_v52 = vsel %vm1174_vm8, %v1505_v12, %v1513_v61  ;;  %v5166_v47 = vsel %vm1174_vm8, %v1513_v61, %v1505_v12  ;;  %v1555_v12 = vmul.f32 %v5152_v59, %v4842_v28  ;;  %v1556_v61 = vmul.f32 %v5156_v43, %v4839_v35 }
 0x958   : > { %v1528_v16 = vmul.f32 %v5166_v47, %v4808_v4  ;;  %v1529_v41 = vmul.f32 %v5162_v52, %v4811_v5  ;;  %v1595_v55 = vpop.permute.xlu1 %1594  ;;  %v1554_v4 = vmul.f32 %v5178_v25, %v4839_v35 }
 0x959   : > { %v1687_v5 = vpack.c.bf16 %v1557_v22, %v1555_v12 }
 0x95a   : > { %v1684_v26 = vpack.c.bf16 %v1528_v16, %v1526_v46  ;;  %v1597_v38 = vpop.permute.xlu0 %1596  ;;  %v1685_v20 = vpack.c.bf16 %v1529_v41, %v1527_v54  ;;  %v1686_v40 = vpack.c.bf16 %v1556_v61, %v1554_v4  ;;  %v5193_v46 = vsel %vm1234_vm4, %v5108_v36, %v1573_v60 }
 0x95b   : > { %v1589_v12 = vmul.f32 %v5193_v46, %v4873_v14 }
 0x95c   : > { %1789 = vmatprep.subr.bf16.mxu1 %v1685_v20  ;;  %v1543_v19 = vpop.permute.xlu1 %1542 }
 0x95d   : > { %1790 = vmatpush1.bf16.msra.mxu1 %v1684_v26  ;;  %v5188_v39 = vsel %vm1204_vm5, %v1543_v19, %v1535_v13  ;;  %v5197_v54 = vsel %vm1204_vm5, %v1535_v13, %v1543_v19  ;;  %v5214_v19 = vsel %vm1234_vm4, %v5106_v2, %v1571_v6 }
 0x95e   : > { %v1545_v53 = vpop.permute.xlu0 %1544  ;;  %1791 = vmatprep.subr.bf16.mxu1 %v1687_v5  ;;  %v1558_v13 = vmul.f32 %v5188_v39, %v4839_v35  ;;  %v1559_v61 = vmul.f32 %v5197_v54, %v4842_v28 }
 0x95f   : > { %v5201_v20 = vsel %vm1204_vm5, %v1537_v1, %v1545_v53  ;;  %v5205_v26 = vsel %vm1204_vm5, %v1545_v53, %v1537_v1  ;;  %v5221_v1 = vsel %vm1234_vm4, %v1573_v60, %v5108_v36  ;;  %v5230_v53 = vsel %vm1234_vm4, %v1571_v6, %v5106_v2 }
 0x960   : > { %v1560_v22 = vmul.f32 %v5205_v26, %v4839_v35  ;;  %v1561_v16 = vmul.f32 %v5201_v20, %v4842_v28  ;;  %v1575_v41 = vpop.permute.xlu1 %1574  ;;  %v1588_v60 = vmul.f32 %v5221_v1, %v4870_v23  ;;  %v1586_v2 = vmul.f32 %v5230_v53, %v4870_v23 }
 0x961   : > { %1792 = vmatpush1.bf16.msra.mxu1 %v1686_v40  ;;  %v1587_v40 = vmul.f32 %v5214_v19, %v4873_v14  ;;  %v5238_v36 = vsel %vm1234_vm4, %v1567_v31, %v1575_v41  ;;  %v5242_v28 = vsel %vm1234_vm4, %v1575_v41, %v1567_v31 }
 0x962   : > { %v1605_v4 = vpop.permute.xlu0 %1604  ;;  %v1688_v5 = vpack.c.bf16 %v1560_v22, %v1558_v13  ;;  %v1689_v35 = vpack.c.bf16 %v1561_v16, %v1559_v61  ;;  %7014 = vst [vmem:[#allocation66_spill] sm:$0xff] %v5238_v36  ;;  %v1591_v31 = vmul.f32 %v5238_v36, %v4873_v14 }
 0x963   : > { %v1691_v6 = vpack.c.bf16 %v1589_v12, %v1587_v40  ;;  %v1611_v45 = vsel %vm1264_vm2, %v1597_v38, %v1605_v4 }
 0x964   : > { %v1603_v58 = vpop.permute.xlu1 %1602  ;;  %1793 = vmatprep.subr.bf16.mxu1 %v1689_v35  ;;  %v1590_v35 = vmul.f32 %v5242_v28, %v4870_v23 }
 0x965   : > { %v1610_v16 = vsel %vm1264_vm2, %v1595_v55, %v1603_v58  ;;  %1794 = vmatpush1.bf16.msra.mxu1 %v1688_v5  ;;  %v1690_v5 = vpack.c.bf16 %v1588_v60, %v1586_v2  ;;  %v1621_v60 = vmul.f32 %v1611_v45, %v4904_v32 }
 0x966   : > { %v1577_v22 = vpop.permute.xlu0 %1576  ;;  %1795 = vmatprep.subr.bf16.mxu1 %v1691_v6 }
 0x967   : > { %v5250_v13 = vsel %vm1234_vm4, %v1569_v57, %v1577_v22  ;;  %v5254_v61 = vsel %vm1234_vm4, %v1577_v22, %v1569_v57  ;;  %v1614_v57 = vsel %vm1264_vm2, %v1603_v58, %v1595_v55  ;;  %v1619_v22 = vmul.f32 %v1610_v16, %v4904_v32 }
 0x968   : > { %v1592_v41 = vmul.f32 %v5254_v61, %v4870_v23  ;;  %v1593_v12 = vmul.f32 %v5250_v13, %v4873_v14  ;;  %v1599_v40 = vpop.permute.xlu1 %1598  ;;  %v1615_v14 = vsel %vm1264_vm2, %v1605_v4, %v1597_v38  ;;  %v1618_v23 = vmul.f32 %v1614_v57, %v4901_v15 }
 0x969   : > { %1796 = vmatpush1.bf16.msra.mxu1 %v1690_v5  ;;  %v1695_v16 = vpack.c.bf16 %v1621_v60, %v1619_v22  ;;  %vm7069_vm4 = vcmp.lt.s32.totalorder %v4026_v8, 17 }
 0x96a   : > { %v1601_v10 = vpop.permute.xlu0 %1600  ;;  %v1693_v9 = vpack.c.bf16 %v1593_v12, %v1591_v31  ;;  %v1692_v36 = vpack.c.bf16 %v1592_v41, %v1590_v35  ;;  %v1620_v31 = vmul.f32 %v1615_v14, %v4901_v15  ;;  %vm7070_vm5 = vmmov %vm7069_vm4 }
 0x96b   : > { %vm7073_vm8 = vmmov %vm7069_vm4 }
 0x96c   : > { %1797 = vmatprep.subr.bf16.mxu1 %v1693_v9  ;;  %v1607_v6 = vpop.permute.xlu1 %1606 }
 0x96d   : > { %v1612_v2 = vsel %vm1264_vm2, %v1599_v40, %v1607_v6  ;;  %v1616_v55 = vsel %vm1264_vm2, %v1607_v6, %v1599_v40  ;;  %1798 = vmatpush1.bf16.msra.mxu1 %v1692_v36  ;;  %v1694_v40 = vpack.c.bf16 %v1620_v31, %v1618_v23 }
 0x96e   : > { %v1609_v58 = vpop.permute.xlu0 %1608  ;;  %v1623_v45 = vmul.f32 %v1612_v2, %v4904_v32  ;;  %1799 = vmatprep.subr.bf16.mxu1 %v1695_v16  ;;  %v1622_v5 = vmul.f32 %v1616_v55, %v4901_v15  ;;  %v1701_v55 = vpack.c.bf16 %v5040_v17, %v5036_v33 }
 0x96f   : > { %v1613_v38 = vsel %vm1264_vm2, %v1601_v10, %v1609_v58  ;;  %v1617_v9 = vsel %vm1264_vm2, %v1609_v58, %v1601_v10  ;;  %v1699_v10 = vpack.c.bf16 %v5012_v3, %v5006_v49  ;;  %v7015_v49 = vpack.c.bf16 %v4988_v63, %v4986_v37 }
 0x970   : > { %v1624_v4 = vmul.f32 %v1617_v9, %v4901_v15  ;;  %v1625_v41 = vmul.f32 %v1613_v38, %v4904_v32  ;;  %v1627_v12 = vpop.permute.xlu1 %1626  ;;  %v7016_v63 = vpack.c.bf16 %v5002_v24, %v5000_v27  ;;  %v1665_v27 = vmul.f32 %v5166_v47, %v4926_v0 }
 0x971   : > { %1800 = vmatpush1.bf16.msra.mxu1 %v1694_v40  ;;  %v1663_v24 = vmul.f32 %v5148_v7, %v4926_v0  ;;  %v7018_v47 = vpack.c.bf16 %v5123_v29, %v5119_v21  ;;  %v1667_v0 = vmul.f32 %v5178_v25, %v4954_v18  ;;  %v1672_v25 = vmul.f32 %v5201_v20, %v4963_v44 }
 0x972   : > { %v1629_v35 = vpop.permute.xlu0 %1628  ;;  %v1697_v57 = vpack.c.bf16 %v1625_v41, %v1623_v45  ;;  %v1696_v36 = vpack.c.bf16 %v1624_v4, %v1622_v5  ;;  %v1677_v29 = vmul.f32 %v5221_v1, %v4968_v56  ;;  %v1674_v1 = vmul.f32 %v5214_v19, %v4977_v48  ;;  %v3766_v19 = vld [vmem:[#allocation4 + $0xc0] ss:$16 sps:$4 sm:$0xff]  }
 0x973   : > { %vm2518_vm2 = vcmask 392192  }
 0x974   : > { %1801 = vmatprep.subr.bf16.mxu1 %v1697_v57  ;;  %v1635_v22 = vpop.permute.xlu1 %1634 }
 0x975   : > { %1802 = vmatpush1.bf16.msra.mxu1 %v1696_v36  ;;  %v1646_v6 = vsel %vm1294_vm0, %v1635_v22, %v1627_v12  ;;  %v1642_v3 = vsel %vm1294_vm0, %v1627_v12, %v1635_v22  ;;  %v7017_v22 = vpack.c.bf16 %v5127_v30, %v5134_v34  ;;  %v1668_v30 = vmul.f32 %v5140_v11, %v4963_v44 }
 0x976   : > { %v1637_v14 = vpop.permute.xlu0 %1636  ;;  %1803 = vmatprep.subr.bf16.mxu1 %v1699_v10  ;;  %v1651_v58 = vmul.f32 %v1646_v6, %v4923_v42  ;;  %v1650_v37 = vmul.f32 %v1642_v3, %v4920_v50  ;;  %v1662_v10 = vmul.f32 %v5144_v51, %v4946_v62  ;;  %v1670_v51 = vmul.f32 %v5197_v54, %v4963_v44  ;;  %v7019_v6 = vld [vmem:[#allocation66_spill] sm:$0xff] }
 0x977   : > { %v1647_v60 = vsel %vm1294_vm0, %v1637_v14, %v1629_v35  ;;  %v1643_v15 = vsel %vm1294_vm0, %v1629_v35, %v1637_v14  ;;  %v1709_v14 = vpack.c.bf16 %v1665_v27, %v1663_v24 }
 0x978   : > { %v1631_v32 = vpop.permute.xlu1 %1630  ;;  %v1653_v23 = vmul.f32 %v1647_v60, %v4923_v42  ;;  %v1652_v31 = vmul.f32 %v1643_v15, %v4920_v50  ;;  %v3761_v60 = vld [vmem:[#allocation4 + $0xa0] ss:$16 sps:$4 sm:$0xff]  }
 0x979   : > { %1804 = vmatpush1.bf16.msra.mxu1 %v7015_v49 }
 0x97a   : > { %v1633_v2 = vpop.permute.xlu0 %1632  ;;  %1805 = vmatprep.subr.bf16.mxu1 %v1701_v55  ;;  %v1703_v17 = vpack.c.bf16 %v1653_v23, %v1651_v58  ;;  %v1702_v5 = vpack.c.bf16 %v1652_v31, %v1650_v37  ;;  %v7020_v23 = vmov 0  }
 0x97c   : > { %v1639_v16 = vpop.permute.xlu1 %1638 }
 0x97d   : > { %v1648_v38 = vsel %vm1294_vm0, %v1639_v16, %v1631_v32  ;;  %v1644_v9 = vsel %vm1294_vm0, %v1631_v32, %v1639_v16  ;;  %1806 = vmatpush1.bf16.msra.mxu1 %v7016_v63  ;;  %v3764_v32 = vld [vmem:[#allocation4 + $0xc4] ss:$16 sps:$4 sm:$0xff]  }
 0x97e   : > { %v1641_v33 = vpop.permute.xlu0 %1640  ;;  %v1655_v41 = vmul.f32 %v1648_v38, %v4923_v42  ;;  %1807 = vmatprep.subr.bf16.mxu1 %v1703_v17  ;;  %v1654_v35 = vmul.f32 %v1644_v9, %v4920_v50  ;;  %v1902_v17 = vld [vmem:[#allocation2 + $0x33] ss:$8 sm:$0x3] }
 0x97f   : > { %v1645_v45 = vsel %vm1294_vm0, %v1633_v2, %v1641_v33  ;;  %v1649_v4 = vsel %vm1294_vm0, %v1641_v33, %v1633_v2  ;;  %vm1780_vm0 = vcmask 261120  }
 0x980   : > { %v1656_v12 = vmul.f32 %v1645_v45, %v4920_v50  ;;  %v1657_v40 = vmul.f32 %v1649_v4, %v4923_v42  ;;  %v1664_v42 = vmul.f32 %v5162_v52, %v4946_v62  ;;  %v1669_v50 = vmul.f32 %v5156_v43, %v4954_v18 }
 0x981   : > { %1808 = vmatpush1.bf16.msra.mxu1 %v1702_v5  ;;  %v1673_v52 = vmul.f32 %v5205_v26, %v4954_v18  ;;  %v1666_v43 = vmul.f32 %v5152_v59, %v4963_v44  ;;  %v1671_v62 = vmul.f32 %v5188_v39, %v4954_v18  ;;  %v1675_v59 = vmul.f32 %v5230_v53, %v4968_v56 }
 0x982   : > { %v1705_v57 = vpack.c.bf16 %v1657_v40, %v1655_v41  ;;  %v1704_v36 = vpack.c.bf16 %v1656_v12, %v1654_v35  ;;  %v1708_v34 = vpack.c.bf16 %v1664_v42, %v1662_v10  ;;  %v1711_v7 = vpack.c.bf16 %v1669_v50, %v1667_v0 }
 0x983   : > { %v1710_v21 = vpack.c.bf16 %v1668_v30, %v1666_v43  ;;  %v1713_v11 = vpack.c.bf16 %v1673_v52, %v1671_v62  ;;  %v1676_v18 = vmul.f32 %v5193_v46, %v4977_v48  ;;  %v1712_v39 = vpack.c.bf16 %v1672_v25, %v1670_v51 }
 0x984   : > { %1809 = vmatprep.subr.bf16.mxu1 %v1705_v57  ;;  %v1681_v26 = vmul.f32 %v5254_v61, %v4968_v56  ;;  %v1715_v20 = vpack.c.bf16 %v1677_v29, %v1675_v59  ;;  %v1679_v44 = vmul.f32 %v5242_v28, %v4968_v56  ;;  %v1680_v53 = vmul.f32 %v5250_v13, %v4977_v48  ;;  %v3767_v56 = vld [vmem:[#allocation4 + $0xa8] ss:$16 sps:$4 sm:$0xff]   ;;  %v7021_v57 = vld [vmem:[#allocation8_spill] sm:$0xff] }
 0x985   : > { %1810 = vmatpush1.bf16.msra.mxu1 %v1704_v36  ;;  %v1714_v54 = vpack.c.bf16 %v1676_v18, %v1674_v1  ;;  %v1678_v61 = vmul.f32 %v7019_v6, %v4977_v48  ;;  %v3768_v28 = vld [vmem:[#allocation4 + $0xc8] ss:$16 sps:$4 sm:$0xff]   ;;  %v5381_v36 = vrot.slane %v1902_v17, %v7021_v57 }
 0x986   : > { %1811 = vmatprep.subr.bf16.mxu1 %v7017_v22  ;;  %v1717_v46 = vpack.c.bf16 %v1681_v26, %v1679_v44  ;;  %v7022_v22 = vld [vmem:[#allocation9_spill] sm:$0xff] }
 0x987   : > { %v1716_v15 = vpack.c.bf16 %v1680_v53, %v1678_v61  ;;  %v5384_v42 = vrot.slane %v1902_v17, %v7022_v22 }
 0x989   : > { %1812 = vmatpush1.bf16.msra.mxu1 %v7018_v47 }
 0x98a   : > { %1813 = vmatprep.subr.bf16.mxu1 %v1709_v14 }
 0x98d   : > { %1814 = vmatpush1.bf16.msra.mxu1 %v1708_v34  ;;  %v1733_v13 = vpop.permute.xlu1 %1732 }
 0x98e   : > { %1815 = vmatprep.subr.bf16.mxu1 %v1711_v7 }
 0x98f   : > { %v1738_v49 = vpop.permute.xlu0 %1737 }
 0x991   : > { %1816 = vmatpush1.bf16.msra.mxu1 %v1710_v21  ;;  %v1743_v9 = vpop.permute.xlu1 %1742 }
 0x992   : > { %1817 = vmatprep.subr.bf16.mxu1 %v1713_v11 }
 0x993   : > { %v1748_v45 = vpop.permute.xlu0 %1747 }
 0x995   : > { %1818 = vmatpush1.bf16.msra.mxu1 %v1712_v39  ;;  %v5420_v43 = vpop.permute.xlu1 %2337  ;;  %v1947_v39 = vld [vmem:[#allocation2 + $0x34] ss:$8 sm:$0x3] }
 0x996   : > { %1840 = vmatprep.subr.bf16.mxu1 %v1715_v20  ;;  %v2000_v20 = vld [vmem:[#allocation2 + $0x35] ss:$8 sm:$0x3] }
 0x997   : > { %v5422_v62 = vpop.permute.xlu0 %2339 }
 0x998   : > { %1820 = vmatmul.mubr.bf16.vlgmr.msra.gmra.mrb[8].mxu1 %v3761_v60  ;;  %v5429_v60 = vrot.slane %v1947_v39, %v7021_v57 }
 0x999   : > { %1841 = vmatpush1.bf16.msra.mxu1 %v1714_v54  ;;  %1829 = vmatprep.mubr.bf16.mxu1 %v3764_v32  ;;  %v5424_v21 = vpop.permute.xlu1 %2341  ;;  %v5432_v32 = vrot.slane %v1947_v39, %v7022_v22 }
 0x99a   : > { %1842 = vmatprep.subr.bf16.mxu1 %v1717_v46  ;;  %v5439_v46 = vrot.slane %v2000_v20, %v7021_v57 }
 0x99b   : > { %v5426_v25 = vpop.permute.xlu0 %2343 }
 0x99d   : > { %1843 = vmatpush1.bf16.msra.mxu1 %v1716_v15  ;;  %v5446_v15 = vrot.slane %v2000_v20, %v7022_v22 }
 0x9a0   : > { %1830 = vmatmul.mubr.bf16.gmra.mrb[12].mxu1 %v3766_v19  ;;  %v2053_v19 = vld [vmem:[#allocation2 + $0x36] ss:$8 sm:$0x3] }
 0x9a1   : > { %1872 = vmatprep.mubr.bf16.mxu1 %v7020_v23 }
 0x9a8   : > { %3608 = vmatmul.mubr.msk.bf16.vlgmr.msra.gmra.mrb[8].mxu1 %vm1780_vm0, %v3767_v56 }
 0x9a9   : > { %1882 = vmatprep.mubr.bf16.mxu1 %v7020_v23 }
 0x9b0   : > { %3609 = vmatmul.mubr.msk.bf16.gmra.mrb[12].mxu1 %vm1780_vm0, %v3768_v28 }
 0xa7b   : > { %v1874_v2 = vpop.f32.mrb[8].mxu1 }
 0xa7c   : > { %v3632_v55 = vadd.f32 %v1874_v2, %v1733_v13  ;;  %v1876_v48 = vpop.f32.mrb[9].mxu1 }
 0xa7d   : > { %v1878_v3 = vpop.f32.mrb[10].mxu1  ;;  %v3633_v12 = vadd.f32 %v1876_v48, %v1733_v13 }
 0xa7e   : > { %v5368_v58 = vmax.f32 %v3632_v55, 0.0  ;;  %v3634_v16 = vadd.f32 %v1878_v3, %v1738_v49  ;;  %v1880_v31 = vpop.f32.mrb[11].mxu1 }
 0xa7f   : > { %v3635_v50 = vadd.f32 %v1880_v31, %v1738_v49  ;;  %v1894_v30 = vmax.f32 %v3633_v12, 0.0 }
 0xa80   : > { %v5370_v38 = vmax.f32 %v3634_v16, 0.0  ;;  %1922 = vrot.lane.b32.xlu1 %v5368_v58, %s3876_s14  ;;  %v1914_v28 = vmul.f32 %v5381_v36, %v5368_v58 }
 0xa81   : > { %v1896_v7 = vmax.f32 %v3635_v50, 0.0  ;;  %v1915_v56 = vmul.f32 %v5384_v42, %v1894_v30 }
 0xa82   : > { %1924 = vrot.lane.b32.xlu0 %v5370_v38, %s3876_s14  ;;  %v1916_v17 = vmul.f32 %v5381_v36, %v5370_v38 }
 0xa83   : > { %v1884_v33 = vpop.f32.mrb[12].mxu1 }
 0xa84   : > { %v3636_v37 = vadd.f32 %v1884_v33, %v1743_v9  ;;  %v1886_v63 = vpop.f32.mrb[13].mxu1  ;;  %1975 = vrot.lane.b32.xlu1 %v5368_v58, %s3874_s12  ;;  %v5464_v33 = vrot.slane %v2053_v19, %v7022_v22 }
 0xa85   : > { %v3637_v4 = vadd.f32 %v1886_v63, %v1743_v9  ;;  %v1888_v41 = vpop.f32.mrb[14].mxu1 }
 0xa86   : > { %v1897_v40 = vmax.f32 %v3636_v37, 0.0  ;;  %v3638_v5 = vadd.f32 %v1888_v41, %v1748_v45  ;;  %v1890_v35 = vpop.f32.mrb[15].mxu1  ;;  %1977 = vrot.lane.b32.xlu0 %v5370_v38, %s3874_s12  ;;  %v1917_v41 = vmul.f32 %v5384_v42, %v1896_v7 }
 0xa87   : > { %v1898_v27 = vmax.f32 %v3637_v4, 0.0  ;;  %v3639_v24 = vadd.f32 %v1890_v35, %v1748_v45 }
 0xa88   : > { %v1899_v14 = vmax.f32 %v3638_v5, 0.0  ;;  %2028 = vrot.lane.b32.xlu1 %v5368_v58, %s3873_s11  ;;  %v5389_v10 = vmul.f32 %v5381_v36, %v1897_v40  ;;  %v5461_v58 = vrot.slane %v2053_v19, %v7021_v57 }
 0xa89   : > { %v1900_v47 = vmax.f32 %v3639_v24, 0.0  ;;  %v5392_v0 = vmul.f32 %v5384_v42, %v1898_v27 }
 0xa8a   : > { %2030 = vrot.lane.b32.xlu0 %v5370_v38, %s3873_s11  ;;  %v5397_v34 = vmul.f32 %v5381_v36, %v1899_v14 }
 0xa8b   : > { %v5400_v52 = vmul.f32 %v5384_v42, %v1900_v47 }
 0xa8c   : > { %1930 = vrot.lane.b32.xlu1 %v1894_v30, %s3876_s14 }
 0xa8e   : > { %1932 = vrot.lane.b32.xlu0 %v1896_v7, %s3876_s14 }
 0xa90   : > { %1983 = vrot.lane.b32.xlu1 %v1894_v30, %s3874_s12 }
 0xa92   : > { %1985 = vrot.lane.b32.xlu0 %v1896_v7, %s3874_s12 }
 0xa94   : > { %2036 = vrot.lane.b32.xlu1 %v1894_v30, %s3873_s11 }
 0xa96   : > { %2038 = vrot.lane.b32.xlu0 %v1896_v7, %s3873_s11 }
 0xa98   : > { %1926 = vrot.lane.b32.xlu1 %v1897_v40, %s3876_s14 }
 0xa9a   : > { %1928 = vrot.lane.b32.xlu0 %v1899_v14, %s3876_s14 }
 0xa9c   : > { %1979 = vrot.lane.b32.xlu1 %v1897_v40, %s3874_s12 }
 0xa9e   : > { %1981 = vrot.lane.b32.xlu0 %v1899_v14, %s3874_s12 }
 0xaa0   : > { %2032 = vrot.lane.b32.xlu1 %v1897_v40, %s3873_s11 }
 0xaa2   : > { %2034 = vrot.lane.b32.xlu0 %v1899_v14, %s3873_s11 }
 0xaa4   : > { %1934 = vrot.lane.b32.xlu1 %v1898_v27, %s3876_s14 }
 0xaa6   : > { %1936 = vrot.lane.b32.xlu0 %v1900_v47, %s3876_s14 }
 0xaa8   : > { %1987 = vrot.lane.b32.xlu1 %v1898_v27, %s3874_s12 }
 0xaaa   : > { %1989 = vrot.lane.b32.xlu0 %v1900_v47, %s3874_s12 }
 0xaac   : > { %2040 = vrot.lane.b32.xlu1 %v1898_v27, %s3873_s11 }
 0xaae   : > { %2042 = vrot.lane.b32.xlu0 %v1900_v47, %s3873_s11 }
 0xaf2   : > { %v1923_v29 = vpop.permute.xlu1 %1922 }
 0xaf4   : > { %v1925_v11 = vpop.permute.xlu0 %1924 }
 0xaf6   : > { %v1976_v51 = vpop.permute.xlu1 %1975 }
 0xaf8   : > { %v1978_v59 = vpop.permute.xlu0 %1977 }
 0xafa   : > { %v2029_v18 = vpop.permute.xlu1 %2028 }
 0xafc   : > { %v2031_v26 = vpop.permute.xlu0 %2030 }
 0xafe   : > { %v1931_v1 = vpop.permute.xlu1 %1930 }
 0xaff   : > { %v1942_v44 = vsel %vm707_vm13, %v1931_v1, %v1923_v29  ;;  %v1938_v54 = vsel %vm707_vm13, %v1923_v29, %v1931_v1 }
 0xb00   : > { %v1933_v53 = vpop.permute.xlu0 %1932  ;;  %v1959_v13 = vmul.f32 %v5429_v60, %v1942_v44  ;;  %v1960_v55 = vmul.f32 %v5432_v32, %v1938_v54 }
 0xb01   : > { %v1939_v6 = vsel %vm707_vm13, %v1925_v11, %v1933_v53  ;;  %v1943_v61 = vsel %vm707_vm13, %v1933_v53, %v1925_v11 }
 0xb02   : > { %v1984_v2 = vpop.permute.xlu1 %1983  ;;  %v1961_v48 = vmul.f32 %v5429_v60, %v1943_v61  ;;  %v1962_v16 = vmul.f32 %v5432_v32, %v1939_v6  ;;  %v1967_v4 = vadd.f32 %v1959_v13, %v1914_v28  ;;  %v1968_v35 = vadd.f32 %v1960_v55, %v1915_v56 }
 0xb03   : > { %v1991_v49 = vsel %vm663_vm11, %v1976_v51, %v1984_v2  ;;  %v1995_v3 = vsel %vm663_vm11, %v1984_v2, %v1976_v51 }
 0xb04   : > { %v2012_v31 = vmul.f32 %v5439_v46, %v1995_v3  ;;  %v1986_v9 = vpop.permute.xlu0 %1985  ;;  %v2013_v37 = vmul.f32 %v5446_v15, %v1991_v49  ;;  %v1969_v27 = vadd.f32 %v1961_v48, %v1916_v17  ;;  %v1970_v24 = vadd.f32 %v1962_v16, %v1917_v41 }
 0xb05   : > { %v1992_v63 = vsel %vm663_vm11, %v1978_v59, %v1986_v9  ;;  %v1996_v45 = vsel %vm663_vm11, %v1986_v9, %v1978_v59 }
 0xb06   : > { %v2014_v12 = vmul.f32 %v5439_v46, %v1996_v45  ;;  %v2015_v40 = vmul.f32 %v5446_v15, %v1992_v63  ;;  %v2037_v5 = vpop.permute.xlu1 %2036  ;;  %v2020_v50 = vadd.f32 %v2012_v31, %v1967_v4  ;;  %v2021_v30 = vadd.f32 %v2013_v37, %v1968_v35 }
 0xb07   : > { %v2044_v38 = vsel %vm641_vm10, %v2029_v18, %v2037_v5  ;;  %v2048_v36 = vsel %vm641_vm10, %v2037_v5, %v2029_v18 }
 0xb08   : > { %v2065_v14 = vmul.f32 %v5461_v58, %v2048_v36  ;;  %v2066_v47 = vmul.f32 %v5464_v33, %v2044_v38  ;;  %v2039_v42 = vpop.permute.xlu0 %2038  ;;  %v2022_v7 = vadd.f32 %v2014_v12, %v1969_v27  ;;  %v2023_v51 = vadd.f32 %v2015_v40, %v1970_v24 }
 0xb09   : > { %v2045_v29 = vsel %vm641_vm10, %v2031_v26, %v2039_v42  ;;  %v2049_v11 = vsel %vm641_vm10, %v2039_v42, %v2031_v26 }
 0xb0a   : > { %v5486_v59 = vadd.f32 %v2065_v14, %v2020_v50  ;;  %v2067_v18 = vmul.f32 %v5461_v58, %v2049_v11  ;;  %v2068_v39 = vmul.f32 %v5464_v33, %v2045_v29  ;;  %v1927_v20 = vpop.permute.xlu1 %1926  ;;  %v5490_v1 = vadd.f32 %v2066_v47, %v2021_v30 }
 0xb0c   : > { %v5492_v44 = vadd.f32 %v2067_v18, %v2022_v7  ;;  %v5494_v54 = vadd.f32 %v2068_v39, %v2023_v51  ;;  %v1929_v53 = vpop.permute.xlu0 %1928  ;;  %2081 = vrot.lane.b32.xlu1 %v5486_v59, %s3873_s11 }
 0xb0e   : > { %2083 = vrot.lane.b32.xlu0 %v5492_v44, %s3873_s11  ;;  %v1980_v26 = vpop.permute.xlu1 %1979 }
 0xb10   : > { %v1982_v19 = vpop.permute.xlu0 %1981  ;;  %2089 = vrot.lane.b32.xlu1 %v5490_v1, %s3873_s11 }
 0xb12   : > { %2091 = vrot.lane.b32.xlu0 %v5494_v54, %s3873_s11  ;;  %v2033_v56 = vpop.permute.xlu1 %2032 }
 0xb14   : > { %v2035_v28 = vpop.permute.xlu0 %2034  ;;  %2113 = vrot.lane.b32.xlu1 %v5486_v59, %s3874_s12 }
 0xb16   : > { %2115 = vrot.lane.b32.xlu0 %v5492_v44, %s3874_s12  ;;  %v1935_v13 = vpop.permute.xlu1 %1934 }
 0xb17   : > { %v1940_v2 = vsel %vm707_vm13, %v1927_v20, %v1935_v13  ;;  %v1944_v55 = vsel %vm707_vm13, %v1935_v13, %v1927_v20  ;;  %v7025_v20 = vld [vmem:[#allocation53_spill] sm:$0xff] }
 0xb18   : > { %v1963_v48 = vmul.f32 %v5429_v60, %v1944_v55  ;;  %v1964_v49 = vmul.f32 %v5432_v32, %v1940_v2  ;;  %v1937_v3 = vpop.permute.xlu0 %1936  ;;  %2121 = vrot.lane.b32.xlu1 %v5490_v1, %s3874_s12 }
 0xb19   : > { %v1941_v16 = vsel %vm707_vm13, %v1929_v53, %v1937_v3  ;;  %v1945_v31 = vsel %vm707_vm13, %v1937_v3, %v1929_v53 }
 0xb1a   : > { %v1971_v9 = vadd.f32 %v1963_v48, %v5389_v10  ;;  %v1972_v17 = vadd.f32 %v1964_v49, %v5392_v0  ;;  %v1965_v37 = vmul.f32 %v5429_v60, %v1945_v31  ;;  %v1966_v63 = vmul.f32 %v5432_v32, %v1941_v16  ;;  %2123 = vrot.lane.b32.xlu0 %v5494_v54, %s3874_s12  ;;  %v1988_v45 = vpop.permute.xlu1 %1987  ;;  %v3771_v48 = vld [vmem:[#allocation4 + $0xe4] ss:$16 sps:$4 sm:$0xff]   ;;  %v7027_v16 = vld [vmem:[#allocation35_spill] sm:$0xff] }
 0xb1b   : > { %v1993_v4 = vsel %vm663_vm11, %v1980_v26, %v1988_v45  ;;  %v1997_v41 = vsel %vm663_vm11, %v1988_v45, %v1980_v26  ;;  %v7026_v49 = vld [vmem:[#allocation34_spill] sm:$0xff]  ;;  %2554 = vmatprep.mubr.bf16.mxu0 %v3771_v48 }
 0xb1c   : > { %v1973_v12 = vadd.f32 %v1965_v37, %v5397_v34  ;;  %v1974_v10 = vadd.f32 %v1966_v63, %v5400_v52  ;;  %v2016_v0 = vmul.f32 %v5439_v46, %v1997_v41  ;;  %v2017_v60 = vmul.f32 %v5446_v15, %v1993_v4  ;;  %v1990_v40 = vpop.permute.xlu0 %1989  ;;  %2145 = vrot.lane.b32.xlu1 %v5486_v59, %s3875_s13 }
 0xb1d   : > { %v1994_v32 = vsel %vm663_vm11, %v1982_v19, %v1990_v40  ;;  %v1998_v5 = vsel %vm663_vm11, %v1990_v40, %v1982_v19 }
 0xb1e   : > { %v2024_v35 = vadd.f32 %v2016_v0, %v1971_v9  ;;  %v2025_v27 = vadd.f32 %v2017_v60, %v1972_v17  ;;  %v2018_v34 = vmul.f32 %v5439_v46, %v1998_v5  ;;  %v2019_v52 = vmul.f32 %v5446_v15, %v1994_v32  ;;  %2147 = vrot.lane.b32.xlu0 %v5492_v44, %s3875_s13  ;;  %v2041_v38 = vpop.permute.xlu1 %2040  ;;  %v7028_v60 = vld [vmem:[#allocation52_spill] sm:$0xff] }
 0xb1f   : > { %v2046_v36 = vsel %vm641_vm10, %v2033_v56, %v2041_v38  ;;  %v2050_v24 = vsel %vm641_vm10, %v2041_v38, %v2033_v56 }
 0xb20   : > { %v2026_v50 = vadd.f32 %v2018_v34, %v1973_v12  ;;  %v2027_v14 = vadd.f32 %v2019_v52, %v1974_v10  ;;  %v2069_v47 = vmul.f32 %v5461_v58, %v2050_v24  ;;  %v2070_v42 = vmul.f32 %v5464_v33, %v2046_v36  ;;  %v2043_v30 = vpop.permute.xlu0 %2042  ;;  %2153 = vrot.lane.b32.xlu1 %v5490_v1, %s3875_s13 }
 0xb21   : > { %v2047_v46 = vsel %vm641_vm10, %v2035_v28, %v2043_v30  ;;  %v2051_v15 = vsel %vm641_vm10, %v2043_v30, %v2035_v28  ;;  %v2488_v30 = vld [vmem:[%s6817_s3 + $0x78] sm:$0xff] }
 0xb22   : > { %v5560_v7 = vadd.f32 %v2069_v47, %v2024_v35  ;;  %v5562_v29 = vadd.f32 %v2070_v42, %v2025_v27  ;;  %v2071_v11 = vmul.f32 %v5461_v58, %v2051_v15  ;;  %v2072_v51 = vmul.f32 %v5464_v33, %v2047_v46  ;;  %2155 = vrot.lane.b32.xlu0 %v5494_v54, %s3875_s13  ;;  %v7023_v58 = vld [vmem:[#allocation50_spill] sm:$0xff]  ;;  %v7024_v33 = vld [vmem:[#allocation51_spill] sm:$0xff]  ;;  %v2487_v47 = vld [vmem:[%s6817_s3 + $0x70] sm:$0xff] }
 0xb24   : > { %v5568_v18 = vadd.f32 %v2071_v11, %v2026_v50  ;;  %v5570_v39 = vadd.f32 %v2072_v51, %v2027_v14  ;;  %2177 = vrot.lane.b32.xlu1 %v5486_v59, %s3876_s14 }
 0xb26   : > { %2179 = vrot.lane.b32.xlu0 %v5492_v44, %s3876_s14 }
 0xb28   : > { %2185 = vrot.lane.b32.xlu1 %v5490_v1, %s3876_s14 }
 0xb2a   : > { %2187 = vrot.lane.b32.xlu0 %v5494_v54, %s3876_s14 }
 0xb2c   : > { %2209 = vrot.lane.b32.xlu1 %v5486_v59, %s3877_s17 }
 0xb2e   : > { %2211 = vrot.lane.b32.xlu0 %v5492_v44, %s3877_s17 }
 0xb30   : > { %2217 = vrot.lane.b32.xlu1 %v5490_v1, %s3877_s17 }
 0xb32   : > { %2219 = vrot.lane.b32.xlu0 %v5494_v54, %s3877_s17 }
 0xb34   : > { %2241 = vrot.lane.b32.xlu1 %v5486_v59, %s3878_s18 }
 0xb36   : > { %2243 = vrot.lane.b32.xlu0 %v5492_v44, %s3878_s18 }
 0xb38   : > { %2249 = vrot.lane.b32.xlu1 %v5490_v1, %s3878_s18 }
 0xb3a   : > { %2251 = vrot.lane.b32.xlu0 %v5494_v54, %s3878_s18 }
 0xb3c   : > { %2273 = vrot.lane.b32.xlu1 %v5486_v59, %s3879_s20 }
 0xb3e   : > { %2275 = vrot.lane.b32.xlu0 %v5492_v44, %s3879_s20 }
 0xb40   : > { %2281 = vrot.lane.b32.xlu1 %v5490_v1, %s3879_s20 }
 0xb42   : > { %2283 = vrot.lane.b32.xlu0 %v5494_v54, %s3879_s20 }
 0xb44   : > { %2305 = vrot.lane.b32.xlu1 %v5486_v59, %s3880_s23 }
 0xb46   : > { %2307 = vrot.lane.b32.xlu0 %v5492_v44, %s3880_s23 }
 0xb48   : > { %2313 = vrot.lane.b32.xlu1 %v5490_v1, %s3880_s23 }
 0xb4a   : > { %2315 = vrot.lane.b32.xlu0 %v5494_v54, %s3880_s23 }
 0xb4c   : > { %2085 = vrot.lane.b32.xlu1 %v5560_v7, %s3873_s11 }
 0xb4e   : > { %2087 = vrot.lane.b32.xlu0 %v5568_v18, %s3873_s11 }
 0xb50   : > { %2093 = vrot.lane.b32.xlu1 %v5562_v29, %s3873_s11 }
 0xb52   : > { %2095 = vrot.lane.b32.xlu0 %v5570_v39, %s3873_s11 }
 0xb54   : > { %2117 = vrot.lane.b32.xlu1 %v5560_v7, %s3874_s12 }
 0xb56   : > { %2119 = vrot.lane.b32.xlu0 %v5568_v18, %s3874_s12 }
 0xb58   : > { %2125 = vrot.lane.b32.xlu1 %v5562_v29, %s3874_s12 }
 0xb5a   : > { %2127 = vrot.lane.b32.xlu0 %v5570_v39, %s3874_s12 }
 0xb5c   : > { %2149 = vrot.lane.b32.xlu1 %v5560_v7, %s3875_s13 }
 0xb5e   : > { %2151 = vrot.lane.b32.xlu0 %v5568_v18, %s3875_s13 }
 0xb60   : > { %2157 = vrot.lane.b32.xlu1 %v5562_v29, %s3875_s13 }
 0xb62   : > { %2159 = vrot.lane.b32.xlu0 %v5570_v39, %s3875_s13 }
 0xb64   : > { %2181 = vrot.lane.b32.xlu1 %v5560_v7, %s3876_s14 }
 0xb66   : > { %2183 = vrot.lane.b32.xlu0 %v5568_v18, %s3876_s14 }
 0xb68   : > { %2189 = vrot.lane.b32.xlu1 %v5562_v29, %s3876_s14 }
 0xb6a   : > { %2191 = vrot.lane.b32.xlu0 %v5570_v39, %s3876_s14 }
 0xb6c   : > { %2353 = vrot.lane.b32.xlu1 %v7023_v58, %s3874_s12 }
 0xb6e   : > { %2355 = vrot.lane.b32.xlu0 %v7024_v33, %s3874_s12 }
 0xb70   : > { %2213 = vrot.lane.b32.xlu1 %v5560_v7, %s3877_s17 }
 0xb72   : > { %2359 = vrot.lane.b32.xlu0 %v7025_v20, %s3874_s12 }
 0xb74   : > { %2221 = vrot.lane.b32.xlu1 %v5562_v29, %s3877_s17 }
 0xb76   : > { %2215 = vrot.lane.b32.xlu0 %v5568_v18, %s3877_s17 }
 0xb78   : > { %2245 = vrot.lane.b32.xlu1 %v5560_v7, %s3878_s18 }
 0xb7a   : > { %2223 = vrot.lane.b32.xlu0 %v5570_v39, %s3877_s17 }
 0xb7c   : > { %2253 = vrot.lane.b32.xlu1 %v5562_v29, %s3878_s18 }
 0xb7e   : > { %2247 = vrot.lane.b32.xlu0 %v5568_v18, %s3878_s18  ;;  %v2082_v53 = vpop.permute.xlu1 %2081 }
 0xb80   : > { %v2084_v26 = vpop.permute.xlu0 %2083  ;;  %2277 = vrot.lane.b32.xlu1 %v5560_v7, %s3879_s20 }
 0xb82   : > { %2255 = vrot.lane.b32.xlu0 %v5570_v39, %s3878_s18  ;;  %v2090_v19 = vpop.permute.xlu1 %2089 }
 0xb83   : > { %v2097_v56 = vsel %vm641_vm10, %v2082_v53, %v2090_v19  ;;  %v2101_v28 = vsel %vm641_vm10, %v2090_v19, %v2082_v53 }
 0xb84   : > { %v2092_v13 = vpop.permute.xlu0 %2091  ;;  %2285 = vrot.lane.b32.xlu1 %v5562_v29, %s3879_s20  ;;  %v2105_v3 = vmul.f32 %v2101_v28, %v7026_v49  ;;  %v2106_v31 = vmul.f32 %v2097_v56, %v7027_v16 }
 0xb85   : > { %v2098_v2 = vsel %vm641_vm10, %v2084_v26, %v2092_v13  ;;  %v2102_v55 = vsel %vm641_vm10, %v2092_v13, %v2084_v26 }
 0xb86   : > { %v2107_v9 = vmul.f32 %v2102_v55, %v7026_v49  ;;  %v2108_v17 = vmul.f32 %v2098_v2, %v7027_v16  ;;  %2279 = vrot.lane.b32.xlu0 %v5568_v18, %s3879_s20  ;;  %v5684_v37 = vpop.permute.xlu1 %2113 }
 0xb88   : > { %v2429_v63 = vpack.c.bf16 %v2107_v9, %v2105_v3  ;;  %v2116_v45 = vpop.permute.xlu0 %2115  ;;  %2309 = vrot.lane.b32.xlu1 %v5560_v7, %s3880_s23  ;;  %v2430_v4 = vpack.c.bf16 %v2108_v17, %v2106_v31 }
 0xb8a   : > { %2287 = vrot.lane.b32.xlu0 %v5570_v39, %s3879_s20  ;;  %2522 = vmatprep.subr.bf16.mxu0 %v2430_v4  ;;  %v5690_v41 = vpop.permute.xlu1 %2121  ;;  %v7029_v4 = vld [vmem:[#allocation37_spill] sm:$0xff] }
 0xb8b   : > { %2523 = vmatpush1.bf16.msra.mxu0 %v2429_v63  ;;  %v2129_v9 = vsel %vm663_vm11, %v5684_v37, %v5690_v41 }
 0xb8c   : > { %v2124_v12 = vpop.permute.xlu0 %2123  ;;  %2317 = vrot.lane.b32.xlu1 %v5562_v29, %s3880_s23 }
 0xb8d   : > { %v2130_v55 = vsel %vm663_vm11, %v2116_v45, %v2124_v12  ;;  %v2134_v63 = vsel %vm663_vm11, %v2124_v12, %v2116_v45  ;;  %v2133_v45 = vsel %vm663_vm11, %v5690_v41, %v5684_v37  ;;  %v2138_v12 = vmul.f32 %v2129_v9, %v7029_v4 }
 0xb8e   : > { %2311 = vrot.lane.b32.xlu0 %v5568_v18, %s3880_s23  ;;  %v5696_v10 = vpop.permute.xlu1 %2145 }
 0xb90   : > { %v5698_v0 = vpop.permute.xlu0 %2147  ;;  %2357 = vrot.lane.b32.xlu1 %v7028_v60, %s3874_s12 }
 0xb92   : > { %2319 = vrot.lane.b32.xlu0 %v5570_v39, %s3880_s23  ;;  %v5704_v40 = vpop.permute.xlu1 %2153 }
 0xb94   : > { %v5706_v32 = vpop.permute.xlu0 %2155  ;;  %2369 = vrot.lane.b32.xlu1 %v7023_v58, %s3875_s13 }
 0xb96   : > { %2371 = vrot.lane.b32.xlu0 %v7024_v33, %s3875_s13  ;;  %v5712_v5 = vpop.permute.xlu1 %2177 }
 0xb98   : > { %v5714_v35 = vpop.permute.xlu0 %2179  ;;  %2373 = vrot.lane.b32.xlu1 %v7028_v60, %s3875_s13 }
 0xb9a   : > { %2375 = vrot.lane.b32.xlu0 %v7025_v20, %s3875_s13  ;;  %v5720_v27 = vpop.permute.xlu1 %2185 }
 0xb9c   : > { %v5722_v34 = vpop.permute.xlu0 %2187  ;;  %2385 = vrot.lane.b32.xlu1 %v7023_v58, %s3876_s14 }
 0xb9e   : > { %2387 = vrot.lane.b32.xlu0 %v7024_v33, %s3876_s14  ;;  %v5728_v52 = vpop.permute.xlu1 %2209 }
 0xba0   : > { %v5730_v38 = vpop.permute.xlu0 %2211  ;;  %2389 = vrot.lane.b32.xlu1 %v7028_v60, %s3876_s14 }
 0xba2   : > { %2391 = vrot.lane.b32.xlu0 %v7025_v20, %s3876_s14  ;;  %v5736_v36 = vpop.permute.xlu1 %2217 }
 0xba4   : > { %v5738_v24 = vpop.permute.xlu0 %2219  ;;  %2405 = vrot.lane.b32.xlu1 %v7023_v58, %s3878_s18 }
 0xba6   : > { %2407 = vrot.lane.b32.xlu0 %v7024_v33, %s3878_s18  ;;  %v5744_v50 = vpop.permute.xlu1 %2241 }
 0xba8   : > { %v5746_v14 = vpop.permute.xlu0 %2243  ;;  %2409 = vrot.lane.b32.xlu1 %v7028_v60, %s3878_s18 }
 0xbaa   : > { %2411 = vrot.lane.b32.xlu0 %v7025_v20, %s3878_s18  ;;  %v5755_v42 = vpop.permute.xlu1 %2249 }
 0xbac   : > { %v5760_v46 = vpop.permute.xlu0 %2251  ;;  %2491 = vperm.xlu1 %3750, %v2487_v47   ;;  %v2140_v47 = vmul.f32 %v2130_v55, %v7029_v4  ;;  %v7030_v55 = vld [vmem:[#allocation36_spill] sm:$0xff] }
 0xbad   : > { %v2139_v23 = vmul.f32 %v2134_v63, %v7030_v55  ;;  %v2166_v63 = vsel %vm685_vm12, %v5706_v32, %v5698_v0 }
 0xbae   : > { %2496 = vperm.xlu0 %3749, %v2488_v30   ;;  %v5762_v15 = vpop.permute.xlu1 %2273 }
 0xbb0   : > { %v5764_v11 = vpop.permute.xlu0 %2275 }
 0xbb2   : > { %v5766_v51 = vpop.permute.xlu1 %2281 }
 0xbb4   : > { %v5768_v53 = vpop.permute.xlu0 %2283 }
 0xbb6   : > { %v5770_v26 = vpop.permute.xlu1 %2305 }
 0xbb8   : > { %v5772_v19 = vpop.permute.xlu0 %2307 }
 0xbba   : > { %v5774_v56 = vpop.permute.xlu1 %2313 }
 0xbbc   : > { %v5776_v28 = vpop.permute.xlu0 %2315 }
 0xbbe   : > { %v2086_v13 = vpop.permute.xlu1 %2085 }
 0xbc0   : > { %v2088_v2 = vpop.permute.xlu0 %2087 }
 0xbc2   : > { %v2094_v48 = vpop.permute.xlu1 %2093 }
 0xbc3   : > { %v2099_v3 = vsel %vm641_vm10, %v2086_v13, %v2094_v48  ;;  %v2103_v31 = vsel %vm641_vm10, %v2094_v48, %v2086_v13 }
 0xbc4   : > { %v2096_v17 = vpop.permute.xlu0 %2095  ;;  %v2109_v6 = vmul.f32 %v2103_v31, %v7026_v49  ;;  %v2110_v13 = vmul.f32 %v2099_v3, %v7027_v16  ;;  %v2137_v31 = vmul.f32 %v2133_v45, %v7030_v55 }
 0xbc5   : > { %v2100_v30 = vsel %vm641_vm10, %v2088_v2, %v2096_v17  ;;  %v2104_v61 = vsel %vm641_vm10, %v2096_v17, %v2088_v2 }
 0xbc6   : > { %v2111_v48 = vmul.f32 %v2104_v61, %v7026_v49  ;;  %v2112_v22 = vmul.f32 %v2100_v30, %v7027_v16  ;;  %v2118_v57 = vpop.permute.xlu1 %2117  ;;  %v2162_v61 = vsel %vm685_vm12, %v5698_v0, %v5706_v32  ;;  %v2434_v30 = vpack.c.bf16 %v2140_v47, %v2138_v12  ;;  %v7031_v47 = vld [vmem:[#allocation39_spill] sm:$0xff] }
 0xbc7   : > { %v2165_v0 = vsel %vm685_vm12, %v5704_v40, %v5696_v10 }
 0xbc8   : > { %v2431_v33 = vpack.c.bf16 %v2111_v48, %v2109_v6  ;;  %v2120_v2 = vpop.permute.xlu0 %2119  ;;  %v2432_v17 = vpack.c.bf16 %v2112_v22, %v2110_v13  ;;  %v2433_v6 = vpack.c.bf16 %v2139_v23, %v2137_v31  ;;  %v2161_v22 = vsel %vm685_vm12, %v5696_v10, %v5704_v40  ;;  %v7032_v31 = vld [vmem:[#allocation38_spill] sm:$0xff] }
 0xbc9   : > { %v2172_v13 = vmul.f32 %v2162_v61, %v7031_v47  ;;  %v2170_v32 = vmul.f32 %v2161_v22, %v7031_v47  ;;  %v2171_v61 = vmul.f32 %v2166_v63, %v7032_v31  ;;  %v2193_v22 = vsel %vm707_vm13, %v5712_v5, %v5720_v27 }
 0xbca   : > { %2524 = vmatprep.subr.bf16.mxu0 %v2432_v17  ;;  %v2126_v3 = vpop.permute.xlu1 %2125 }
 0xbcb   : > { %v2131_v37 = vsel %vm663_vm11, %v2118_v57, %v2126_v3  ;;  %v2135_v41 = vsel %vm663_vm11, %v2126_v3, %v2118_v57  ;;  %2525 = vmatpush1.bf16.msra.mxu0 %v2431_v33 }
 0xbcc   : > { %v2128_v9 = vpop.permute.xlu0 %2127  ;;  %2526 = vmatprep.subr.bf16.mxu0 %v2434_v30  ;;  %v2141_v57 = vmul.f32 %v2135_v41, %v7030_v55  ;;  %v2142_v33 = vmul.f32 %v2131_v37, %v7029_v4  ;;  %v2169_v37 = vmul.f32 %v2165_v0, %v7032_v31  ;;  %v2194_v41 = vsel %vm707_vm13, %v5714_v35, %v5722_v34 }
 0xbcd   : > { %v2132_v48 = vsel %vm663_vm11, %v2120_v2, %v2128_v9  ;;  %v2136_v23 = vsel %vm663_vm11, %v2128_v9, %v2120_v2 }
 0xbce   : > { %v2143_v45 = vmul.f32 %v2136_v23, %v7030_v55  ;;  %v2144_v12 = vmul.f32 %v2132_v48, %v7029_v4  ;;  %v2150_v17 = vpop.permute.xlu1 %2149  ;;  %v2438_v48 = vpack.c.bf16 %v2172_v13, %v2170_v32  ;;  %v2198_v13 = vsel %vm707_vm13, %v5722_v34, %v5714_v35  ;;  %v7033_v23 = vld [vmem:[#allocation41_spill] sm:$0xff] }
 0xbcf   : > { %2527 = vmatpush1.bf16.msra.mxu0 %v2433_v6  ;;  %v2437_v6 = vpack.c.bf16 %v2171_v61, %v2169_v37  ;;  %v2197_v35 = vsel %vm707_vm13, %v5720_v27, %v5712_v5  ;;  %v2202_v34 = vmul.f32 %v2193_v22, %v7033_v23  ;;  %v7034_v37 = vld [vmem:[#allocation40_spill] sm:$0xff] }
 0xbd0   : > { %v2435_v2 = vpack.c.bf16 %v2143_v45, %v2141_v57  ;;  %v2152_v3 = vpop.permute.xlu0 %2151  ;;  %v2436_v30 = vpack.c.bf16 %v2144_v12, %v2142_v33  ;;  %v2204_v57 = vmul.f32 %v2194_v41, %v7033_v23  ;;  %v2203_v41 = vmul.f32 %v2198_v13, %v7034_v37 }
 0xbd2   : > { %2528 = vmatprep.subr.bf16.mxu0 %v2436_v30  ;;  %v2158_v9 = vpop.permute.xlu1 %2157 }
 0xbd3   : > { %v2163_v10 = vsel %vm685_vm12, %v2150_v17, %v2158_v9  ;;  %v2167_v40 = vsel %vm685_vm12, %v2158_v9, %v2150_v17  ;;  %2529 = vmatpush1.bf16.msra.mxu0 %v2435_v2 }
 0xbd4   : > { %v2160_v63 = vpop.permute.xlu0 %2159  ;;  %2530 = vmatprep.subr.bf16.mxu0 %v2438_v48  ;;  %v2173_v12 = vmul.f32 %v2167_v40, %v7032_v31  ;;  %v2174_v17 = vmul.f32 %v2163_v10, %v7031_v47  ;;  %v2442_v48 = vpack.c.bf16 %v2204_v57, %v2202_v34  ;;  %v2201_v10 = vmul.f32 %v2197_v35, %v7034_v37 }
 0xbd5   : > { %v2164_v33 = vsel %vm685_vm12, %v2152_v3, %v2160_v63  ;;  %v2168_v45 = vsel %vm685_vm12, %v2160_v63, %v2152_v3  ;;  %v2230_v35 = vsel %vm729_vm14, %v5738_v24, %v5730_v38 }
 0xbd6   : > { %v2175_v0 = vmul.f32 %v2168_v45, %v7032_v31  ;;  %v2176_v32 = vmul.f32 %v2164_v33, %v7031_v47  ;;  %v2182_v61 = vpop.permute.xlu1 %2181  ;;  %v2441_v27 = vpack.c.bf16 %v2203_v41, %v2201_v10  ;;  %v7036_v41 = vld [vmem:[#allocation43_spill] sm:$0xff]  ;;  %v2448_v10 = vpack.c.bf16 %v5570_v39, %v5562_v29 }
 0xbd7   : > { %2531 = vmatpush1.bf16.msra.mxu0 %v2437_v6  ;;  %v2262_v39 = vsel %vm751_vm15, %v5760_v46, %v5746_v14 }
 0xbd8   : > { %v2439_v2 = vpack.c.bf16 %v2175_v0, %v2173_v12  ;;  %v2184_v30 = vpop.permute.xlu0 %2183  ;;  %v2440_v3 = vpack.c.bf16 %v2176_v32, %v2174_v17 }
 0xbda   : > { %2532 = vmatprep.subr.bf16.mxu0 %v2440_v3  ;;  %v2190_v9 = vpop.permute.xlu1 %2189  ;;  %v2226_v3 = vsel %vm729_vm14, %v5730_v38, %v5738_v24  ;;  %v2447_v24 = vpack.c.bf16 %v5568_v18, %v5560_v7  ;;  %v2261_v7 = vsel %vm751_vm15, %v5755_v42, %v5744_v50 }
 0xbdb   : > { %v2195_v40 = vsel %vm707_vm13, %v2182_v61, %v2190_v9  ;;  %v2199_v6 = vsel %vm707_vm13, %v2190_v9, %v2182_v61  ;;  %2533 = vmatpush1.bf16.msra.mxu0 %v2439_v2  ;;  %v7035_v2 = vpack.c.bf16 %v5494_v54, %v5490_v1  ;;  %v2236_v9 = vmul.f32 %v2230_v35, %v7036_v41 }
 0xbdc   : > { %v2192_v5 = vpop.permute.xlu0 %2191  ;;  %2534 = vmatprep.subr.bf16.mxu0 %v2442_v48  ;;  %v2205_v13 = vmul.f32 %v2199_v6, %v7034_v37  ;;  %v2206_v57 = vmul.f32 %v2195_v40, %v7033_v23  ;;  %v2225_v1 = vsel %vm729_vm14, %v5728_v52, %v5736_v36  ;;  %v7037_v54 = vpack.c.bf16 %v5492_v44, %v5486_v59  ;;  %v7038_v6 = vld [vmem:[#allocation42_spill] sm:$0xff] }
 0xbdd   : > { %v2196_v22 = vsel %vm707_vm13, %v2184_v30, %v2192_v5  ;;  %v2200_v63 = vsel %vm707_vm13, %v2192_v5, %v2184_v30  ;;  %v2229_v30 = vsel %vm729_vm14, %v5736_v36, %v5728_v52  ;;  %v2235_v5 = vmul.f32 %v2226_v3, %v7038_v6 }
 0xbde   : > { %v2207_v33 = vmul.f32 %v2200_v63, %v7034_v37  ;;  %v2208_v45 = vmul.f32 %v2196_v22, %v7033_v23  ;;  %v5882_v12 = vpop.permute.xlu1 %2353  ;;  %v2234_v40 = vmul.f32 %v2229_v30, %v7036_v41  ;;  %v2233_v29 = vmul.f32 %v2225_v1, %v7038_v6  ;;  %v7039_v63 = vld [vmem:[#allocation45_spill] sm:$0xff] }
 0xbdf   : > { %2535 = vmatpush1.bf16.msra.mxu0 %v2441_v27  ;;  %v2258_v22 = vsel %vm751_vm15, %v5746_v14, %v5760_v46  ;;  %v2257_v14 = vsel %vm751_vm15, %v5744_v50, %v5755_v42  ;;  %v2266_v46 = vmul.f32 %v2261_v7, %v7039_v63  ;;  %v2294_v1 = vsel %vm773_vm6, %v5768_v53, %v5764_v11 }
 0xbe0   : > { %v2443_v17 = vpack.c.bf16 %v2207_v33, %v2205_v13  ;;  %v5884_v0 = vpop.permute.xlu0 %2355  ;;  %v2444_v32 = vpack.c.bf16 %v2208_v45, %v2206_v57  ;;  %v2450_v36 = vpack.c.bf16 %v2236_v9, %v2234_v40  ;;  %v2449_v27 = vpack.c.bf16 %v2235_v5, %v2233_v29 }
 0xbe1   : > { %v2268_v13 = vmul.f32 %v2262_v39, %v7039_v63  ;;  %v2290_v29 = vsel %vm773_vm6, %v5764_v11, %v5768_v53  ;;  %v7041_v39 = vld [vmem:[#allocation47_spill] sm:$0xff]  ;;  %v2289_v11 = vsel %vm773_vm6, %v5762_v15, %v5766_v51 }
 0xbe2   : > { %2536 = vmatprep.subr.bf16.mxu0 %v2444_v32  ;;  %v2214_v61 = vpop.permute.xlu1 %2213 }
 0xbe3   : > { %2537 = vmatpush1.bf16.msra.mxu0 %v2443_v17  ;;  %v2454_v40 = vpack.c.bf16 %v2268_v13, %v2266_v46  ;;  %v7042_v13 = vld [vmem:[#allocation46_spill] sm:$0xff] }
 0xbe4   : > { %v5890_v34 = vpop.permute.xlu0 %2359  ;;  %2538 = vmatprep.subr.bf16.mxu0 %v7035_v2  ;;  %v7040_v2 = vld [vmem:[#allocation44_spill] sm:$0xff] }
 0xbe5   : > { %v2267_v30 = vmul.f32 %v2258_v22, %v7040_v2 }
 0xbe6   : > { %v2222_v48 = vpop.permute.xlu1 %2221 }
 0xbe7   : > { %2539 = vmatpush1.bf16.msra.mxu0 %v7037_v54  ;;  %v2227_v59 = vsel %vm729_vm14, %v2214_v61, %v2222_v48  ;;  %v2231_v44 = vsel %vm729_vm14, %v2222_v48, %v2214_v61 }
 0xbe8   : > { %v2216_v38 = vpop.permute.xlu0 %2215  ;;  %2540 = vmatprep.subr.bf16.mxu0 %v2448_v10  ;;  %v2237_v45 = vmul.f32 %v2227_v59, %v7038_v6  ;;  %v2238_v17 = vmul.f32 %v2231_v44, %v7036_v41  ;;  %v2265_v10 = vmul.f32 %v2257_v14, %v7040_v2 }
 0xbea   : > { %v2246_v52 = vpop.permute.xlu1 %2245  ;;  %v2453_v5 = vpack.c.bf16 %v2267_v30, %v2265_v10  ;;  %v2325_v30 = vsel %vm795_vm7, %v5774_v56, %v5770_v26 }
 0xbeb   : > { %2541 = vmatpush1.bf16.msra.mxu0 %v2447_v24 }
 0xbec   : > { %v2224_v18 = vpop.permute.xlu0 %2223  ;;  %2542 = vmatprep.subr.bf16.mxu0 %v2450_v36  ;;  %v2300_v36 = vmul.f32 %v2294_v1, %v7041_v39 }
 0xbed   : > { %v2228_v57 = vsel %vm729_vm14, %v2216_v38, %v2224_v18  ;;  %v2232_v33 = vsel %vm729_vm14, %v2224_v18, %v2216_v38  ;;  %v2293_v38 = vsel %vm773_vm6, %v5766_v51, %v5762_v15 }
 0xbee   : > { %v2239_v32 = vmul.f32 %v2228_v57, %v7038_v6  ;;  %v2240_v61 = vmul.f32 %v2232_v33, %v7036_v41  ;;  %v2254_v35 = vpop.permute.xlu1 %2253  ;;  %v2298_v53 = vmul.f32 %v2293_v38, %v7041_v39  ;;  %v2299_v57 = vmul.f32 %v2290_v29, %v7042_v13 }
 0xbef   : > { %2543 = vmatpush1.bf16.msra.mxu0 %v2449_v27  ;;  %v2259_v50 = vsel %vm751_vm15, %v2246_v52, %v2254_v35  ;;  %v2263_v42 = vsel %vm751_vm15, %v2254_v35, %v2246_v52 }
 0xbf0   : > { %v2451_v3 = vpack.c.bf16 %v2239_v32, %v2237_v45  ;;  %v2248_v9 = vpop.permute.xlu0 %2247  ;;  %v2452_v48 = vpack.c.bf16 %v2240_v61, %v2238_v17  ;;  %v2269_v44 = vmul.f32 %v2259_v50, %v7040_v2  ;;  %v2270_v27 = vmul.f32 %v2263_v42, %v7039_v63 }
 0xbf1   : > { %v2297_v32 = vmul.f32 %v2289_v11, %v7042_v13  ;;  %v2326_v61 = vsel %vm795_vm7, %v5776_v28, %v5772_v19  ;;  %v2458_v14 = vpack.c.bf16 %v2300_v36, %v2298_v53  ;;  %v3772_v11 = vld [vmem:[#allocation4 + $0xec] ss:$16 sps:$4 sm:$0xff]   ;;  %v2345_v53 = vsel %vm641_vm10, %v5420_v43, %v5424_v21 }
 0xbf2   : > { %v2278_v54 = vpop.permute.xlu1 %2277  ;;  %2544 = vmatprep.subr.bf16.mxu0 %v2452_v48  ;;  %v7043_v48 = vld [vmem:[#allocation49_spill] sm:$0xff] }
 0xbf3   : > { %2545 = vmatpush1.bf16.msra.mxu0 %v2451_v3  ;;  %v2457_v46 = vpack.c.bf16 %v2299_v57, %v2297_v32  ;;  %v2332_v10 = vmul.f32 %v2326_v61, %v7043_v48  ;;  %v2348_v57 = vsel %vm641_vm10, %v5426_v25, %v5422_v62 }
 0xbf4   : > { %v2256_v24 = vpop.permute.xlu0 %2255  ;;  %2546 = vmatprep.subr.bf16.mxu0 %v2454_v40 }
 0xbf5   : > { %v2260_v59 = vsel %vm751_vm15, %v2248_v9, %v2256_v24  ;;  %v2264_v52 = vsel %vm751_vm15, %v2256_v24, %v2248_v9  ;;  %v2322_v9 = vsel %vm795_vm7, %v5772_v19, %v5776_v28  ;;  %v2321_v19 = vsel %vm795_vm7, %v5770_v26, %v5774_v56 }
 0xbf6   : > { %v2271_v7 = vmul.f32 %v2260_v59, %v7040_v2  ;;  %v2272_v18 = vmul.f32 %v2264_v52, %v7039_v63  ;;  %v2286_v22 = vpop.permute.xlu1 %2285  ;;  %v2330_v28 = vmul.f32 %v2325_v30, %v7043_v48  ;;  %v7044_v59 = vld [vmem:[#allocation48_spill] sm:$0xff]  ;;  %v2350_v30 = vmul.f32 %v2345_v53, %v7027_v16 }
 0xbf7   : > { %2547 = vmatpush1.bf16.msra.mxu0 %v2453_v5  ;;  %v2291_v15 = vsel %vm773_vm6, %v2278_v54, %v2286_v22  ;;  %v2295_v51 = vsel %vm773_vm6, %v2286_v22, %v2278_v54  ;;  %v2331_v52 = vmul.f32 %v2322_v9, %v7044_v59  ;;  %v2329_v22 = vmul.f32 %v2321_v19, %v7044_v59 }
 0xbf8   : > { %v2455_v33 = vpack.c.bf16 %v2271_v7, %v2269_v44  ;;  %v2280_v45 = vpop.permute.xlu0 %2279  ;;  %v2456_v17 = vpack.c.bf16 %v2272_v18, %v2270_v27  ;;  %v2301_v40 = vmul.f32 %v2291_v15, %v7042_v13  ;;  %v2302_v50 = vmul.f32 %v2295_v51, %v7041_v39  ;;  %v3769_v18 = vld [vmem:[#allocation4 + $0xe0] ss:$16 sps:$4 sm:$0xff]  }
 0xbf9   : > { %v2346_v44 = vsel %vm641_vm10, %v5422_v62, %v5426_v25  ;;  %v2462_v7 = vpack.c.bf16 %v2332_v10, %v2330_v28 }
 0xbfa   : > { %v2310_v35 = vpop.permute.xlu1 %2309  ;;  %2548 = vmatprep.subr.bf16.mxu0 %v2456_v17  ;;  %v2461_v17 = vpack.c.bf16 %v2331_v52, %v2329_v22 }
 0xbfb   : > { %2549 = vmatpush1.bf16.msra.mxu0 %v2455_v33 }
 0xbfc   : > { %v2288_v3 = vpop.permute.xlu0 %2287  ;;  %2550 = vmatprep.subr.bf16.mxu0 %v2458_v14 }
 0xbfd   : > { %v2292_v1 = vsel %vm773_vm6, %v2280_v45, %v2288_v3  ;;  %v2296_v54 = vsel %vm773_vm6, %v2288_v3, %v2280_v45  ;;  %v2352_v45 = vmul.f32 %v2346_v44, %v7027_v16 }
 0xbfe   : > { %v2303_v42 = vmul.f32 %v2292_v1, %v7042_v13  ;;  %v2304_v5 = vmul.f32 %v2296_v54, %v7041_v39  ;;  %v2318_v38 = vpop.permute.xlu1 %2317  ;;  %v2351_v1 = vmul.f32 %v2348_v57, %v7026_v49  ;;  %v2362_v54 = vsel %vm663_vm11, %v5884_v0, %v5890_v34 }
 0xbff   : > { %2551 = vmatpush1.bf16.msra.mxu0 %v2457_v46  ;;  %v2323_v26 = vsel %vm795_vm7, %v2310_v35, %v2318_v38  ;;  %v2327_v56 = vsel %vm795_vm7, %v2318_v38, %v2310_v35  ;;  %v2347_v46 = vsel %vm641_vm10, %v5424_v21, %v5420_v43  ;;  %v2466_v43 = vpack.c.bf16 %v2352_v45, %v2350_v30 }
 0xc00   : > { %v2459_v24 = vpack.c.bf16 %v2303_v42, %v2301_v40  ;;  %v2312_v29 = vpop.permute.xlu0 %2311  ;;  %v2460_v36 = vpack.c.bf16 %v2304_v5, %v2302_v50  ;;  %v2333_v35 = vmul.f32 %v2323_v26, %v7044_v59  ;;  %v2334_v14 = vmul.f32 %v2327_v56, %v7043_v48 }
 0xc01   : > { %v2349_v21 = vmul.f32 %v2347_v46, %v7026_v49  ;;  %v2364_v5 = vsel %vm663_vm11, %v5890_v34, %v5884_v0  ;;  %v2368_v38 = vmul.f32 %v2362_v54, %v7029_v4 }
 0xc02   : > { %v2358_v27 = vpop.permute.xlu1 %2357  ;;  %2552 = vmatprep.subr.bf16.mxu0 %v2460_v36  ;;  %v2367_v34 = vmul.f32 %v2364_v5, %v7030_v55  ;;  %v7047_v5 = vld [vmem:[#allocation57_spill] sm:$0xff] }
 0xc03   : > { %2553 = vmatpush1.bf16.msra.mxu0 %v2459_v24  ;;  %v2361_v51 = vsel %vm663_vm11, %v5882_v12, %v2358_v27  ;;  %v2363_v40 = vsel %vm663_vm11, %v2358_v27, %v5882_v12  ;;  %v2465_v28 = vpack.c.bf16 %v2351_v1, %v2349_v21  ;;  %v7046_v21 = vld [vmem:[#allocation56_spill] sm:$0xff] }
 0xc04   : > { %v2320_v33 = vpop.permute.xlu0 %2319  ;;  %2565 = vmatprep.subr.bf16.mxu0 %v2462_v7  ;;  %v2366_v50 = vmul.f32 %v2361_v51, %v7029_v4  ;;  %v2365_v12 = vmul.f32 %v2363_v40, %v7030_v55  ;;  %v7045_v40 = vld [vmem:[#allocation51_spill] sm:$0xff] }
 0xc05   : > { %v2324_v32 = vsel %vm795_vm7, %v2312_v29, %v2320_v33  ;;  %v2328_v61 = vsel %vm795_vm7, %v2320_v33, %v2312_v29 }
 0xc06   : > { %v2335_v15 = vmul.f32 %v2324_v32, %v7044_v59  ;;  %v2336_v62 = vmul.f32 %v2328_v61, %v7043_v48  ;;  %v2370_v25 = vpop.permute.xlu1 %2369  ;;  %2555 = vmatmul.mubr.bf16.vlgmr.msra.gmra.mrb[16].mxu0 %v3769_v18  ;;  %v2468_v0 = vpack.c.bf16 %v2368_v38, %v2366_v50  ;;  %v2467_v22 = vpack.c.bf16 %v2367_v34, %v2365_v12  ;;  %v7049_v12 = vld [vmem:[#allocation55_spill] sm:$0xff] }
 0xc07   : > { %2566 = vmatpush1.bf16.msra.mxu0 %v2461_v17  ;;  %3614 = vmatprep.mubr.msk.bf16.mxu0 %vm2518_vm2, %v3772_v11  ;;  %v2473_v50 = vpack.c.bf16 %v7045_v40, %v7023_v58  ;;  %v7048_v38 = vpack.c.bf16 %v7046_v21, %v7047_v5  ;;  %v7055_v34 = vld [vmem:[#allocation59_spill] sm:$0xff] }
 0xc08   : > { %v2463_v3 = vpack.c.bf16 %v2335_v15, %v2333_v35  ;;  %v2372_v9 = vpop.permute.xlu0 %2371  ;;  %v2464_v10 = vpack.c.bf16 %v2336_v62, %v2334_v14  ;;  %v2760_v40 = vld [vmem:[%s6817_s3 + $0x80] sm:$0xff] }
 0xc0a   : > { %v2374_v42 = vpop.permute.xlu1 %2373  ;;  %2567 = vmatprep.subr.bf16.mxu0 %v2464_v10 }
 0xc0b   : > { %2568 = vmatpush1.bf16.msra.mxu0 %v2463_v3  ;;  %v2377_v24 = vsel %vm685_vm12, %v2370_v25, %v2374_v42  ;;  %v2379_v27 = vsel %vm685_vm12, %v2374_v42, %v2370_v25 }
 0xc0c   : > { %v2376_v19 = vpop.permute.xlu0 %2375  ;;  %2569 = vmatprep.subr.bf16.mxu0 %v2466_v43  ;;  %v2382_v7 = vmul.f32 %v2377_v24, %v7031_v47  ;;  %v2381_v53 = vmul.f32 %v2379_v27, %v7032_v31  ;;  %v7050_v24 = vld [vmem:[#allocation54_spill] sm:$0xff] }
 0xc0d   : > { %v2378_v29 = vsel %vm685_vm12, %v2372_v9, %v2376_v19  ;;  %v2380_v36 = vsel %vm685_vm12, %v2376_v19, %v2372_v9  ;;  %v2474_v9 = vpack.c.bf16 %v7025_v20, %v7028_v60  ;;  %v7056_v27 = vld [vmem:[#allocation58_spill] sm:$0xff] }
 0xc0e   : > { %v2384_v52 = vmul.f32 %v2378_v29, %v7031_v47  ;;  %v2386_v44 = vpop.permute.xlu1 %2385  ;;  %v2383_v26 = vmul.f32 %v2380_v36, %v7032_v31  ;;  %v7051_v29 = vpack.c.bf16 %v7049_v12, %v7050_v24 }
 0xc0f   : > { %2570 = vmatpush1.bf16.msra.mxu0 %v2465_v28 }
 0xc10   : > { %v2388_v18 = vpop.permute.xlu0 %2387  ;;  %2571 = vmatprep.subr.bf16.mxu0 %v2468_v0  ;;  %v2470_v11 = vpack.c.bf16 %v2384_v52, %v2382_v7  ;;  %v2469_v17 = vpack.c.bf16 %v2383_v26, %v2381_v53  ;;  %v7052_v52 = vld [vmem:[#allocation61_spill] sm:$0xff]  ;;  %v7057_v7 = vpack.c.bf16 %v7055_v34, %v7056_v27  ;;  %v7062_v53 = vld [vmem:[#allocation62_spill] sm:$0xff] }
 0xc12   : > { %v2390_v56 = vpop.permute.xlu1 %2389 }
 0xc13   : > { %v2393_v57 = vsel %vm707_vm13, %v2386_v44, %v2390_v56  ;;  %v2395_v33 = vsel %vm707_vm13, %v2390_v56, %v2386_v44  ;;  %2572 = vmatpush1.bf16.msra.mxu0 %v2467_v22  ;;  %v7053_v44 = vld [vmem:[#allocation60_spill] sm:$0xff]  ;;  %v7059_v22 = vld [vmem:[#allocation65_spill] sm:$0xff] }
 0xc14   : > { %v2392_v45 = vpop.permute.xlu0 %2391  ;;  %2573 = vmatprep.subr.bf16.mxu0 %v2470_v11  ;;  %v2397_v35 = vmul.f32 %v2395_v33, %v7034_v37  ;;  %v2398_v14 = vmul.f32 %v2393_v57, %v7033_v23  ;;  %v7054_v0 = vpack.c.bf16 %v7052_v52, %v7053_v44  ;;  %v3774_v56 = vld [vmem:[#allocation4 + $0xe8] ss:$16 sps:$4 sm:$0xff]   ;;  %v7064_v33 = vmov 0  }
 0xc15   : > { %v2394_v32 = vsel %vm707_vm13, %v2388_v18, %v2392_v45  ;;  %v2396_v61 = vsel %vm707_vm13, %v2392_v45, %v2388_v18  ;;  %v7058_v18 = vld [vmem:[#allocation64_spill] sm:$0xff]  ;;  %v7061_v11 = vld [vmem:[#allocation63_spill] sm:$0xff] }
 0xc16   : > { %v2399_v15 = vmul.f32 %v2396_v61, %v7034_v37  ;;  %v2400_v62 = vmul.f32 %v2394_v32, %v7033_v23  ;;  %v2406_v25 = vpop.permute.xlu1 %2405  ;;  %v7060_v26 = vpack.c.bf16 %v7058_v18, %v7059_v22  ;;  %v7063_v57 = vpack.c.bf16 %v7061_v11, %v7062_v53 }
 0xc17   : > { %2574 = vmatpush1.bf16.msra.mxu0 %v2469_v17 }
 0xc18   : > { %v2471_v51 = vpack.c.bf16 %v2399_v15, %v2397_v35  ;;  %v2408_v46 = vpop.permute.xlu0 %2407  ;;  %v2472_v30 = vpack.c.bf16 %v2400_v62, %v2398_v14 }
 0xc1a   : > { %v2410_v3 = vpop.permute.xlu1 %2409  ;;  %2575 = vmatprep.subr.bf16.mxu0 %v2472_v30 }
 0xc1b   : > { %2576 = vmatpush1.bf16.msra.mxu0 %v2471_v51  ;;  %v2415_v1 = vsel %vm751_vm15, %v2410_v3, %v2406_v25  ;;  %v2413_v20 = vsel %vm751_vm15, %v2406_v25, %v2410_v3 }
 0xc1c   : > { %v2412_v10 = vpop.permute.xlu0 %2411  ;;  %2577 = vmatprep.subr.bf16.mxu0 %v2474_v9  ;;  %v2418_v60 = vmul.f32 %v2415_v1, %v7039_v63  ;;  %v2417_v58 = vmul.f32 %v2413_v20, %v7040_v2 }
 0xc1d   : > { %v2416_v54 = vsel %vm751_vm15, %v2412_v10, %v2408_v46  ;;  %v2414_v42 = vsel %vm751_vm15, %v2408_v46, %v2412_v10 }
 0xc1e   : > { %v2420_v43 = vmul.f32 %v2416_v54, %v7039_v63  ;;  %v2419_v19 = vmul.f32 %v2414_v42, %v7040_v2  ;;  %v3777_v54 = vld [vmem:[#allocation4 + $0x104] ss:$16 sps:$4 sm:$0xff]  }
 0xc1f   : > { %2578 = vmatpush1.bf16.msra.mxu0 %v2473_v50  ;;  %3617 = vmatprep.mubr.msk.bf16.mxu1 %vm1067_vm9, %v3777_v54  ;;  %v2761_v50 = vld [vmem:[%s6817_s3 + $0x88] sm:$0xff]  ;;  %vm7074_vm9 = vmmov %vm7069_vm4 }
 0xc20   : > { %2579 = vmatprep.subr.bf16.mxu0 %v7048_v38  ;;  %v2478_v28 = vpack.c.bf16 %v2420_v43, %v2418_v60  ;;  %v2477_v36 = vpack.c.bf16 %v2419_v19, %v2417_v58 }
 0xc23   : > { %2580 = vmatpush1.bf16.msra.mxu0 %v7051_v29 }
 0xc24   : > { %2581 = vmatprep.subr.bf16.mxu0 %v2478_v28 }
 0xc27   : > { %2582 = vmatpush1.bf16.msra.mxu0 %v2477_v36 }
 0xc28   : > { %2583 = vmatprep.subr.bf16.mxu0 %v7054_v0 }
 0xc2b   : > { %2584 = vmatpush1.bf16.msra.mxu0 %v7057_v7  ;;  %v2492_v45 = vpop.permute.xlu1 %2491 }
 0xc2c   : > { %2585 = vmatprep.subr.bf16.mxu0 %v7060_v26 }
 0xc2d   : > { %v2497_v35 = vpop.permute.xlu0 %2496 }
 0xc2f   : > { %2586 = vmatpush1.bf16.msra.mxu0 %v7063_v57 }
 0xc32   : > { %2598 = vmatmul.mubr.bf16.vlgmr.msra.gmra.mrb[16].mxu0 %v3774_v56 }
 0xc33   : > { %3337 = vmatprep.mubr.bf16.mxu0 %v7064_v33 }
 0xd05   : > { %v2599_v17 = vpop.f32.mrb[16].mxu0 }
 0xd06   : > { %v3640_v32 = vadd.f32 %v2599_v17, %v2492_v45  ;;  %v2601_v61 = vpop.f32.mrb[17].mxu0 }
 0xd07   : > { %v3641_v14 = vadd.f32 %v2601_v61, %v2492_v45  ;;  %v2603_v15 = vpop.f32.mrb[18].mxu0 }
 0xd08   : > { %v6123_v62 = vmax.f32 %v3640_v32, 0.0  ;;  %v3642_v25 = vadd.f32 %v2603_v15, %v2497_v35  ;;  %v2605_v51 = vpop.f32.mrb[19].mxu0 }
 0xd09   : > { %v3643_v46 = vadd.f32 %v2605_v51, %v2497_v35  ;;  %v6129_v3 = vmax.f32 %v3641_v14, 0.0 }
 0xd0a   : > { %v6125_v30 = vmax.f32 %v3642_v25, 0.0  ;;  %2612 = vrot.lane.b32.xlu1 %v6123_v62, %s3873_s11 }
 0xd0b   : > { %v6131_v9 = vmax.f32 %v3643_v46, 0.0 }
 0xd0c   : > { %2614 = vrot.lane.b32.xlu0 %v6125_v30, %s3873_s11  ;;  %v2748_v10 = vpack.c.bf16 %v6125_v30, %v6123_v62 }
 0xd0d   : > { %v2749_v1 = vpack.c.bf16 %v6131_v9, %v6129_v3 }
 0xd0e   : > { %2628 = vrot.lane.b32.xlu1 %v6123_v62, %s3874_s12 }
 0xd10   : > { %2630 = vrot.lane.b32.xlu0 %v6125_v30, %s3874_s12 }
 0xd12   : > { %2644 = vrot.lane.b32.xlu1 %v6123_v62, %s3875_s13 }
 0xd14   : > { %2646 = vrot.lane.b32.xlu0 %v6125_v30, %s3875_s13 }
 0xd16   : > { %2660 = vrot.lane.b32.xlu1 %v6123_v62, %s3876_s14 }
 0xd18   : > { %2662 = vrot.lane.b32.xlu0 %v6125_v30, %s3876_s14 }
 0xd1a   : > { %2676 = vrot.lane.b32.xlu1 %v6123_v62, %s3877_s17 }
 0xd1c   : > { %2678 = vrot.lane.b32.xlu0 %v6125_v30, %s3877_s17 }
 0xd1e   : > { %2692 = vrot.lane.b32.xlu1 %v6123_v62, %s3878_s18 }
 0xd20   : > { %2694 = vrot.lane.b32.xlu0 %v6125_v30, %s3878_s18 }
 0xd22   : > { %2708 = vrot.lane.b32.xlu1 %v6123_v62, %s3879_s20 }
 0xd24   : > { %2710 = vrot.lane.b32.xlu0 %v6125_v30, %s3879_s20 }
 0xd26   : > { %2616 = vrot.lane.b32.xlu1 %v6129_v3, %s3873_s11 }
 0xd28   : > { %2618 = vrot.lane.b32.xlu0 %v6131_v9, %s3873_s11 }
 0xd2a   : > { %2632 = vrot.lane.b32.xlu1 %v6129_v3, %s3874_s12 }
 0xd2c   : > { %2634 = vrot.lane.b32.xlu0 %v6131_v9, %s3874_s12 }
 0xd2e   : > { %2648 = vrot.lane.b32.xlu1 %v6129_v3, %s3875_s13 }
 0xd30   : > { %2650 = vrot.lane.b32.xlu0 %v6131_v9, %s3875_s13 }
 0xd32   : > { %2664 = vrot.lane.b32.xlu1 %v6129_v3, %s3876_s14 }
 0xd34   : > { %2666 = vrot.lane.b32.xlu0 %v6131_v9, %s3876_s14 }
 0xd36   : > { %2724 = vrot.lane.b32.xlu1 %v6123_v62, %s3880_s23 }
 0xd38   : > { %2726 = vrot.lane.b32.xlu0 %v6125_v30, %s3880_s23 }
 0xd3a   : > { %2680 = vrot.lane.b32.xlu1 %v6129_v3, %s3877_s17 }
 0xd3c   : > { %2682 = vrot.lane.b32.xlu0 %v6131_v9, %s3877_s17  ;;  %s7075_s17 = smov 15  }
 0xd3e   : > { %2696 = vrot.lane.b32.xlu1 %v6129_v3, %s3878_s18 }
 0xd40   : > { %2698 = vrot.lane.b32.xlu0 %v6131_v9, %s3878_s18  ;;  %s7076_s18 = smov 127  }
 0xd42   : > { %2712 = vrot.lane.b32.xlu1 %v6129_v3, %s3879_s20 }
 0xd44   : > { %2714 = vrot.lane.b32.xlu0 %v6131_v9, %s3879_s20  ;;  %s7077_s20 = smov 113  }
 0xd46   : > { %2728 = vrot.lane.b32.xlu1 %v6129_v3, %s3880_s23 }
 0xd48   : > { %2730 = vrot.lane.b32.xlu0 %v6131_v9, %s3880_s23  ;;  %s7078_s23 = smov 112  }
 0xd4a   : > { %2764 = vperm.xlu1 %3750, %v2760_v40  }
 0xd4c   : > { %2769 = vperm.xlu0 %3749, %v2761_v50  }
 0xd7c   : > { %v2613_v42 = vpop.permute.xlu1 %2612 }
 0xd7e   : > { %v2615_v43 = vpop.permute.xlu0 %2614 }
 0xd80   : > { %v2629_v20 = vpop.permute.xlu1 %2628 }
 0xd82   : > { %v2631_v60 = vpop.permute.xlu0 %2630 }
 0xd84   : > { %v2645_v21 = vpop.permute.xlu1 %2644 }
 0xd86   : > { %v2647_v5 = vpop.permute.xlu0 %2646 }
 0xd88   : > { %v2661_v38 = vpop.permute.xlu1 %2660 }
 0xd8a   : > { %v2663_v19 = vpop.permute.xlu0 %2662 }
 0xd8c   : > { %v6206_v28 = vpop.permute.xlu1 %2676 }
 0xd8e   : > { %v6208_v58 = vpop.permute.xlu0 %2678 }
 0xd90   : > { %v6210_v12 = vpop.permute.xlu1 %2692 }
 0xd92   : > { %v6212_v24 = vpop.permute.xlu0 %2694 }
 0xd94   : > { %v6214_v29 = vpop.permute.xlu1 %2708 }
 0xd96   : > { %v6216_v36 = vpop.permute.xlu0 %2710 }
 0xd98   : > { %v2617_v52 = vpop.permute.xlu1 %2616 }
 0xd99   : > { %v2620_v44 = vsel %vm641_vm10, %v2613_v42, %v2617_v52  ;;  %v2622_v0 = vsel %vm641_vm10, %v2617_v52, %v2613_v42 }
 0xd9a   : > { %v2619_v34 = vpop.permute.xlu0 %2618  ;;  %v2624_v18 = vmul.f32 %v2622_v0, %v7026_v49  ;;  %v2625_v22 = vmul.f32 %v2620_v44, %v7027_v16 }
 0xd9b   : > { %v2621_v27 = vsel %vm641_vm10, %v2615_v43, %v2619_v34  ;;  %v2623_v7 = vsel %vm641_vm10, %v2619_v34, %v2615_v43  ;;  %vm3162_vm10 = vcmask 719872  }
 0xd9c   : > { %v2626_v26 = vmul.f32 %v2623_v7, %v7026_v49  ;;  %v2627_v56 = vmul.f32 %v2621_v27, %v7027_v16  ;;  %v2633_v11 = vpop.permute.xlu1 %2632 }
 0xd9d   : > { %v2636_v53 = vsel %vm663_vm11, %v2629_v20, %v2633_v11  ;;  %v2638_v57 = vsel %vm663_vm11, %v2633_v11, %v2629_v20 }
 0xd9e   : > { %v2740_v45 = vpack.c.bf16 %v2626_v26, %v2624_v18  ;;  %v2635_v17 = vpop.permute.xlu0 %2634  ;;  %v2741_v32 = vpack.c.bf16 %v2627_v56, %v2625_v22  ;;  %v2640_v49 = vmul.f32 %v2638_v57, %v7030_v55  ;;  %v2641_v16 = vmul.f32 %v2636_v53, %v7029_v4 }
 0xd9f   : > { %v2637_v61 = vsel %vm663_vm11, %v2631_v60, %v2635_v17  ;;  %v2639_v35 = vsel %vm663_vm11, %v2635_v17, %v2631_v60  ;;  %vm7080_vm11 = vmmov %vm7069_vm4 }
 0xda0   : > { %v2642_v14 = vmul.f32 %v2639_v35, %v7030_v55  ;;  %v2643_v15 = vmul.f32 %v2637_v61, %v7029_v4  ;;  %2784 = vmatprep.subr.bf16.mxu1 %v2741_v32  ;;  %v2649_v25 = vpop.permute.xlu1 %2648 }
 0xda1   : > { %v2652_v51 = vsel %vm685_vm12, %v2645_v21, %v2649_v25  ;;  %v2654_v46 = vsel %vm685_vm12, %v2649_v25, %v2645_v21  ;;  %2785 = vmatpush1.bf16.msra.mxu1 %v2740_v45 }
 0xda2   : > { %v2742_v54 = vpack.c.bf16 %v2642_v14, %v2640_v49  ;;  %v2651_v40 = vpop.permute.xlu0 %2650  ;;  %v2743_v50 = vpack.c.bf16 %v2643_v15, %v2641_v16  ;;  %v2656_v4 = vmul.f32 %v2654_v46, %v7032_v31  ;;  %v2657_v43 = vmul.f32 %v2652_v51, %v7031_v47 }
 0xda3   : > { %v2653_v42 = vsel %vm685_vm12, %v2647_v5, %v2651_v40  ;;  %v2655_v55 = vsel %vm685_vm12, %v2651_v40, %v2647_v5  ;;  %vm7081_vm12 = vmmov %vm7069_vm4 }
 0xda4   : > { %v2658_v20 = vmul.f32 %v2655_v55, %v7032_v31  ;;  %v2659_v60 = vmul.f32 %v2653_v42, %v7031_v47  ;;  %2786 = vmatprep.subr.bf16.mxu1 %v2743_v50  ;;  %v2665_v21 = vpop.permute.xlu1 %2664 }
 0xda5   : > { %v2668_v52 = vsel %vm707_vm13, %v2661_v38, %v2665_v21  ;;  %v2670_v44 = vsel %vm707_vm13, %v2665_v21, %v2661_v38  ;;  %2787 = vmatpush1.bf16.msra.mxu1 %v2742_v54 }
 0xda6   : > { %v2744_v0 = vpack.c.bf16 %v2658_v20, %v2656_v4  ;;  %v2667_v34 = vpop.permute.xlu0 %2666  ;;  %v2745_v5 = vpack.c.bf16 %v2659_v60, %v2657_v43  ;;  %v2672_v47 = vmul.f32 %v2670_v44, %v7034_v37  ;;  %v2673_v7 = vmul.f32 %v2668_v52, %v7033_v23 }
 0xda7   : > { %v2669_v27 = vsel %vm707_vm13, %v2663_v19, %v2667_v34  ;;  %v2671_v31 = vsel %vm707_vm13, %v2667_v34, %v2663_v19  ;;  %v3775_v34 = vld [vmem:[#allocation4 + $0x100] ss:$16 sps:$4 sm:$0xff]   ;;  %vm7082_vm13 = vmmov %vm7069_vm4 }
 0xda8   : > { %v2674_v18 = vmul.f32 %v2671_v31, %v7034_v37  ;;  %v2675_v22 = vmul.f32 %v2669_v27, %v7033_v23  ;;  %2788 = vmatprep.subr.bf16.mxu1 %v2745_v5  ;;  %v2725_v38 = vpop.permute.xlu1 %2724 }
 0xda9   : > { %2789 = vmatpush1.bf16.msra.mxu1 %v2744_v0 }
 0xdaa   : > { %v2746_v26 = vpack.c.bf16 %v2674_v18, %v2672_v47  ;;  %v2727_v56 = vpop.permute.xlu0 %2726  ;;  %v2747_v11 = vpack.c.bf16 %v2675_v22, %v2673_v7 }
 0xdac   : > { %2790 = vmatprep.subr.bf16.mxu1 %v2747_v11  ;;  %v2681_v53 = vpop.permute.xlu1 %2680 }
 0xdad   : > { %v2684_v19 = vsel %vm729_vm14, %v6206_v28, %v2681_v53  ;;  %v2686_v57 = vsel %vm729_vm14, %v2681_v53, %v6206_v28  ;;  %2791 = vmatpush1.bf16.msra.mxu1 %v2746_v26 }
 0xdae   : > { %v2683_v37 = vpop.permute.xlu0 %2682  ;;  %2792 = vmatprep.subr.bf16.mxu1 %v2749_v1  ;;  %v2688_v17 = vmul.f32 %v2684_v19, %v7038_v6  ;;  %v2689_v32 = vmul.f32 %v2686_v57, %v7036_v41  ;;  %v7065_v19 = vld [vmem:[#allocation26_spill] sm:$0xff]  ;;  %v7066_v57 = vld [vmem:[#allocation27_spill] sm:$0xff] }
 0xdaf   : > { %v2685_v23 = vsel %vm729_vm14, %v6208_v58, %v2683_v37  ;;  %v2687_v45 = vsel %vm729_vm14, %v2683_v37, %v6208_v58  ;;  %vm7083_vm14 = vmmov %vm7069_vm4 }
 0xdb0   : > { %v2690_v28 = vmul.f32 %v2685_v23, %v7038_v6  ;;  %v2691_v61 = vmul.f32 %v2687_v45, %v7036_v41  ;;  %v2697_v35 = vpop.permute.xlu1 %2696 }
 0xdb1   : > { %v2700_v3 = vsel %vm751_vm15, %v6210_v12, %v2697_v35  ;;  %v2702_v9 = vsel %vm751_vm15, %v2697_v35, %v6210_v12  ;;  %2793 = vmatpush1.bf16.msra.mxu1 %v2748_v10 }
 0xdb2   : > { %v2750_v1 = vpack.c.bf16 %v2690_v28, %v2688_v17  ;;  %v2699_v58 = vpop.permute.xlu0 %2698  ;;  %v2751_v49 = vpack.c.bf16 %v2691_v61, %v2689_v32  ;;  %v2704_v16 = vmul.f32 %v2700_v3, %v7040_v2  ;;  %v2705_v14 = vmul.f32 %v2702_v9, %v7039_v63  ;;  %v2832_v28 = vld [vmem:[#allocation2 + $0x37] ss:$8 sm:$0x3]  ;;  %v2861_v61 = vld [vmem:[#allocation2 + $0x40] ss:$8 sm:$0x3] }
 0xdb3   : > { %v2701_v41 = vsel %vm751_vm15, %v6212_v24, %v2699_v58  ;;  %v2703_v6 = vsel %vm751_vm15, %v2699_v58, %v6212_v24  ;;  %v2894_v3 = vld [vmem:[#allocation2 + $0x41] ss:$8 sm:$0x3]  ;;  %vm7088_vm15 = vcmp.lt.s32.totalorder %v4026_v8, 15 }
 0xdb4   : > { %v2706_v12 = vmul.f32 %v2701_v41, %v7040_v2  ;;  %v2707_v62 = vmul.f32 %v2703_v6, %v7039_v63  ;;  %v2713_v30 = vpop.permute.xlu1 %2712  ;;  %2794 = vmatprep.subr.bf16.mxu1 %v2751_v49  ;;  %v7067_v9 = vld [vmem:[#allocation8_spill] sm:$0xff]  ;;  %v7068_v58 = vld [vmem:[#allocation9_spill] sm:$0xff]  ;;  %vm7089_vm0 = vmmov %vm7088_vm15 }
 0xdb5   : > { %v2716_v10 = vsel %vm773_vm6, %v6214_v29, %v2713_v30  ;;  %v2718_v15 = vsel %vm773_vm6, %v2713_v30, %v6214_v29  ;;  %2795 = vmatpush1.bf16.msra.mxu1 %v2750_v1  ;;  %v2837_v1 = vrot.slane %v2832_v28, %v7067_v9  ;;  %v2841_v49 = vrot.slane %v2832_v28, %v7068_v58  ;;  %vm7090_vm2 = vmmov %vm7089_vm0 }
 0xdb6   : > { %v2752_v24 = vpack.c.bf16 %v2706_v12, %v2704_v16  ;;  %v2715_v25 = vpop.permute.xlu0 %2714  ;;  %v2753_v51 = vpack.c.bf16 %v2707_v62, %v2705_v14  ;;  %v2720_v46 = vmul.f32 %v2716_v10, %v7042_v13  ;;  %v2721_v54 = vmul.f32 %v2718_v15, %v7041_v39 }
 0xdb7   : > { %v2717_v2 = vsel %vm773_vm6, %v6216_v36, %v2715_v25  ;;  %v2719_v63 = vsel %vm773_vm6, %v2715_v25, %v6216_v36  ;;  %v2866_v41 = vrot.slane %v2861_v61, %v7067_v9  ;;  %v2870_v16 = vrot.slane %v2861_v61, %v7068_v58  ;;  %v2927_v25 = vld [vmem:[#allocation2 + $0x42] ss:$8 sm:$0x3]  ;;  %vm7071_vm6 = vmmov %vm7069_vm4 }
 0xdb8   : > { %v2722_v40 = vmul.f32 %v2717_v2, %v7042_v13  ;;  %v2723_v29 = vmul.f32 %v2719_v63, %v7041_v39  ;;  %v2729_v50 = vpop.permute.xlu1 %2728  ;;  %2796 = vmatprep.subr.bf16.mxu1 %v2753_v51  ;;  %v2899_v30 = vrot.slane %v2894_v3, %v7067_v9 }
 0xdb9   : > { %v2732_v42 = vsel %vm795_vm7, %v2725_v38, %v2729_v50  ;;  %v2734_v55 = vsel %vm795_vm7, %v2729_v50, %v2725_v38  ;;  %2797 = vmatpush1.bf16.msra.mxu1 %v2752_v24  ;;  %v2903_v24 = vrot.slane %v2894_v3, %v7068_v58 }
 0xdba   : > { %v2754_v4 = vpack.c.bf16 %v2722_v40, %v2720_v46  ;;  %v2731_v43 = vpop.permute.xlu0 %2730  ;;  %v2755_v36 = vpack.c.bf16 %v2723_v29, %v2721_v54  ;;  %v2736_v39 = vmul.f32 %v2732_v42, %v7044_v59  ;;  %v2737_v60 = vmul.f32 %v2734_v55, %v7043_v48 }
 0xdbb   : > { %v2733_v20 = vsel %vm795_vm7, %v2727_v56, %v2731_v43  ;;  %v2735_v13 = vsel %vm795_vm7, %v2731_v43, %v2727_v56  ;;  %v2932_v43 = vrot.slane %v2927_v25, %v7067_v9  ;;  %vm7072_vm7 = vmmov %vm7069_vm4 }
 0xdbc   : > { %v2738_v21 = vmul.f32 %v2733_v20, %v7044_v59  ;;  %v2739_v52 = vmul.f32 %v2735_v13, %v7043_v48  ;;  %2798 = vmatprep.subr.bf16.mxu1 %v2755_v36  ;;  %v2936_v36 = vrot.slane %v2927_v25, %v7068_v58 }
 0xdbd   : > { %2799 = vmatpush1.bf16.msra.mxu1 %v2754_v4 }
 0xdbe   : > { %v2756_v44 = vpack.c.bf16 %v2738_v21, %v2736_v39  ;;  %v2757_v0 = vpack.c.bf16 %v2739_v52, %v2737_v60 }
 0xdc0   : > { %2800 = vmatprep.subr.bf16.mxu1 %v2757_v0 }
 0xdc1   : > { %2801 = vmatpush1.bf16.msra.mxu1 %v2756_v44 }
 0xdc4   : > { %2817 = vmatmul.mubr.bf16.vlgmr.msra.gmra.mrb[16].mxu1 %v3775_v34 }
 0xdc9   : > { %v2765_v5 = vpop.permute.xlu1 %2764 }
 0xdcb   : > { %v2770_v7 = vpop.permute.xlu0 %2769 }
 0xe97   : > { %v2818_v27 = vpop.f32.mrb[16].mxu1 }
 0xe98   : > { %v2819_v31 = vadd.f32 %v2818_v27, %v2765_v5  ;;  %v2820_v47 = vpop.f32.mrb[17].mxu1 }
 0xe99   : > { %v2822_v18 = vpop.f32.mrb[18].mxu1  ;;  %v2821_v48 = vadd.f32 %v2820_v47, %v2765_v5 }
 0xe9a   : > { %v2827_v22 = vmax.f32 %v2819_v31, 0.0  ;;  %v2823_v38 = vadd.f32 %v2822_v18, %v2770_v7  ;;  %v2824_v26 = vpop.f32.mrb[19].mxu1 }
 0xe9b   : > { %v2825_v56 = vadd.f32 %v2824_v26, %v2770_v7  ;;  %v2828_v11 = vmax.f32 %v2821_v48, 0.0 }
 0xe9c   : > { %v2829_v59 = vmax.f32 %v2823_v38, 0.0  ;;  %2848 = vrot.lane.b32.xlu1 %v2827_v22, %s3866_s27  ;;  %v2844_v2 = vmul.f32 %v2837_v1, %v2827_v22 }
 0xe9d   : > { %v2830_v53 = vmax.f32 %v2825_v56, 0.0  ;;  %v2845_v51 = vmul.f32 %v2841_v49, %v2828_v11 }
 0xe9e   : > { %2850 = vrot.lane.b32.xlu0 %v2829_v59, %s3866_s27  ;;  %v2846_v20 = vmul.f32 %v2837_v1, %v2829_v59 }
 0xe9f   : > { %v2847_v52 = vmul.f32 %v2841_v49, %v2830_v53  ;;  %v3150_v49 = vld [vmem:[%s6817_s3 + $0x90] sm:$0xff] }
 0xea0   : > { %2881 = vrot.lane.b32.xlu1 %v2827_v22, %s3867_s28 }
 0xea2   : > { %2883 = vrot.lane.b32.xlu0 %v2829_v59, %s3867_s28 }
 0xea4   : > { %2914 = vrot.lane.b32.xlu1 %v2827_v22, %s3865_s26 }
 0xea6   : > { %2916 = vrot.lane.b32.xlu0 %v2829_v59, %s3865_s26 }
 0xea8   : > { %2852 = vrot.lane.b32.xlu1 %v2828_v11, %s3866_s27 }
 0xeaa   : > { %2854 = vrot.lane.b32.xlu0 %v2830_v53, %s3866_s27 }
 0xeac   : > { %2885 = vrot.lane.b32.xlu1 %v2828_v11, %s3867_s28 }
 0xeae   : > { %2887 = vrot.lane.b32.xlu0 %v2830_v53, %s3867_s28 }
 0xeb0   : > { %2918 = vrot.lane.b32.xlu1 %v2828_v11, %s3865_s26 }
 0xeb2   : > { %2920 = vrot.lane.b32.xlu0 %v2830_v53, %s3865_s26 }
 0xeb4   : > { %3075 = vrot.lane.b32.xlu1 %v7065_v19, %s3865_s26 }
 0xeb6   : > { %3077 = vrot.lane.b32.xlu0 %v7066_v57, %s3865_s26 }
 0xeb8   : > { %3083 = vrot.lane.b32.xlu1 %v7065_v19, %s3867_s28 }
 0xeba   : > { %3085 = vrot.lane.b32.xlu0 %v7066_v57, %s3867_s28 }
 0xf0e   : > { %v2849_v37 = vpop.permute.xlu1 %2848 }
 0xf10   : > { %v2851_v23 = vpop.permute.xlu0 %2850 }
 0xf12   : > { %v2882_v45 = vpop.permute.xlu1 %2881 }
 0xf14   : > { %v2884_v17 = vpop.permute.xlu0 %2883 }
 0xf16   : > { %v2915_v32 = vpop.permute.xlu1 %2914 }
 0xf18   : > { %v2917_v35 = vpop.permute.xlu0 %2916 }
 0xf1a   : > { %v2853_v6 = vpop.permute.xlu1 %2852 }
 0xf1b   : > { %v2858_v14 = vsel %vm303_vm3, %v2853_v6, %v2849_v37  ;;  %v2856_v12 = vsel %vm303_vm3, %v2849_v37, %v2853_v6 }
 0xf1c   : > { %v2855_v62 = vpop.permute.xlu0 %2854  ;;  %v2873_v63 = vmul.f32 %v2866_v41, %v2858_v14  ;;  %v2874_v54 = vmul.f32 %v2870_v16, %v2856_v12 }
 0xf1d   : > { %v2857_v10 = vsel %vm303_vm3, %v2851_v23, %v2855_v62  ;;  %v2859_v15 = vsel %vm303_vm3, %v2855_v62, %v2851_v23 }
 0xf1e   : > { %v2886_v46 = vpop.permute.xlu1 %2885  ;;  %v2875_v40 = vmul.f32 %v2866_v41, %v2859_v15  ;;  %v2876_v42 = vmul.f32 %v2870_v16, %v2857_v10  ;;  %v2877_v21 = vadd.f32 %v2873_v63, %v2844_v2  ;;  %v2878_v5 = vadd.f32 %v2874_v54, %v2845_v51  ;;  %v6483_v41 = vld [vmem:[#allocation4 + $0x120] sm:$0xff]  ;;  %v7084_v2 = vld [vmem:[#allocation12_spill] sm:$0xff] }
 0xf1f   : > { %v2889_v29 = vsel %vm259_vm1, %v2882_v45, %v2886_v46  ;;  %v2891_v50 = vsel %vm259_vm1, %v2886_v46, %v2882_v45  ;;  %v3619_v6 = vcombine.high %v6483_v41, %v6483_v41  ;;  %v7085_v46 = vld [vmem:[#allocation10_spill] sm:$0xff] }
 0xf20   : > { %v2906_v55 = vmul.f32 %v2899_v30, %v2891_v50  ;;  %v2888_v4 = vpop.permute.xlu0 %2887  ;;  %v2907_v13 = vmul.f32 %v2903_v24, %v2889_v29  ;;  %v2879_v27 = vadd.f32 %v2875_v40, %v2846_v20  ;;  %v2880_v7 = vadd.f32 %v2876_v42, %v2847_v52 }
 0xf21   : > { %v2890_v39 = vsel %vm259_vm1, %v2884_v17, %v2888_v4  ;;  %v2892_v60 = vsel %vm259_vm1, %v2888_v4, %v2884_v17  ;;  %3621 = vmatprep.mubr.msk.bf16.mxu1 %vm3162_vm10, %v3619_v6 }
 0xf22   : > { %v2908_v44 = vmul.f32 %v2899_v30, %v2892_v60  ;;  %v2909_v0 = vmul.f32 %v2903_v24, %v2890_v39  ;;  %v2919_v34 = vpop.permute.xlu1 %2918  ;;  %v2910_v18 = vadd.f32 %v2906_v55, %v2877_v21  ;;  %v2911_v59 = vadd.f32 %v2907_v13, %v2878_v5  ;;  %v7086_v21 = vld [vmem:[#allocation13_spill] sm:$0xff] }
 0xf23   : > { %v2922_v31 = vsel %vm7069_vm4, %v2915_v32, %v2919_v34  ;;  %v2924_v47 = vsel %vm7070_vm5, %v2919_v34, %v2915_v32  ;;  %vm7091_vm4 = vmmov %vm7089_vm0  ;;  %vm7096_vm5 = vcmp.lt.s32.totalorder %v4026_v8, 127 }
 0xf24   : > { %v2939_v22 = vmul.f32 %v2932_v43, %v2924_v47  ;;  %v2940_v38 = vmul.f32 %v2936_v36, %v2922_v31  ;;  %v2921_v26 = vpop.permute.xlu0 %2920  ;;  %v2912_v48 = vadd.f32 %v2908_v44, %v2879_v27  ;;  %v2913_v53 = vadd.f32 %v2909_v0, %v2880_v7  ;;  %v7087_v44 = vld [vmem:[#allocation11_spill] sm:$0xff] }
 0xf25   : > { %v2923_v56 = vsel %vm7071_vm6, %v2917_v35, %v2921_v26  ;;  %v2925_v11 = vsel %vm7072_vm7, %v2921_v26, %v2917_v35  ;;  %vm7097_vm6 = vmmov %vm7096_vm5 }
 0xf26   : > { %v6384_v37 = vadd.f32 %v2939_v22, %v2910_v18  ;;  %v2941_v23 = vmul.f32 %v2932_v43, %v2925_v11  ;;  %v2942_v45 = vmul.f32 %v2936_v36, %v2923_v56  ;;  %v6386_v17 = vadd.f32 %v2940_v38, %v2911_v59  ;;  %v3076_v61 = vpop.permute.xlu1 %3075  ;;  %v7092_v56 = vld [vmem:[#allocation16_spill] sm:$0xff]  ;;  %vm7098_vm7 = vmmov %vm7096_vm5 }
 0xf28   : > { %v6388_v32 = vadd.f32 %v2941_v23, %v2912_v48  ;;  %v6390_v28 = vadd.f32 %v2942_v45, %v2913_v53  ;;  %v3078_v3 = vpop.permute.xlu0 %3077  ;;  %2947 = vrot.lane.b32.xlu1 %v6384_v37, %s3865_s26  ;;  %v7093_v53 = vld [vmem:[#allocation14_spill] sm:$0xff] }
 0xf29   : > { %v6396_v9 = vsel %vm7073_vm8, %v3076_v61, %v3078_v3  ;;  %v6400_v35 = vsel %vm7074_vm9, %v3078_v3, %v3076_v61  ;;  %vm7099_vm8 = vmmov %vm7096_vm5  ;;  %vm7102_vm9 = vcmp.lt.s32.totalorder %v4026_v8, 113 }
 0xf2a   : > { %2949 = vrot.lane.b32.xlu0 %v6388_v32, %s3865_s26  ;;  %v3130_v1 = vpack.c.bf16 %v6390_v28, %v6386_v17  ;;  %v3129_v58 = vpack.c.bf16 %v6388_v32, %v6384_v37  ;;  %v6487_v16 = vpop.permute.xlu1 %3083  ;;  %vm7103_vm10 = vmmov %vm7102_vm9 }
 0xf2c   : > { %2951 = vrot.lane.b32.xlu1 %v6386_v17, %s3865_s26  ;;  %v6489_v14 = vpop.permute.xlu0 %3085 }
 0xf2e   : > { %2953 = vrot.lane.b32.xlu0 %v6390_v28, %s3865_s26 }
 0xf30   : > { %2963 = vrot.lane.b32.xlu1 %v6384_v37, %s3867_s28 }
 0xf32   : > { %2965 = vrot.lane.b32.xlu0 %v6388_v32, %s3867_s28 }
 0xf34   : > { %2967 = vrot.lane.b32.xlu1 %v6386_v17, %s3867_s28 }
 0xf36   : > { %2969 = vrot.lane.b32.xlu0 %v6390_v28, %s3867_s28 }
 0xf38   : > { %2979 = vrot.lane.b32.xlu1 %v6384_v37, %s7075_s17 }
 0xf3a   : > { %2981 = vrot.lane.b32.xlu0 %v6388_v32, %s7075_s17 }
 0xf3c   : > { %2983 = vrot.lane.b32.xlu1 %v6386_v17, %s7075_s17 }
 0xf3e   : > { %2985 = vrot.lane.b32.xlu0 %v6390_v28, %s7075_s17 }
 0xf40   : > { %2995 = vrot.lane.b32.xlu1 %v6384_v37, %s3866_s27 }
 0xf42   : > { %2997 = vrot.lane.b32.xlu0 %v6388_v32, %s3866_s27 }
 0xf44   : > { %2999 = vrot.lane.b32.xlu1 %v6386_v17, %s3866_s27 }
 0xf46   : > { %3001 = vrot.lane.b32.xlu0 %v6390_v28, %s3866_s27 }
 0xf48   : > { %3011 = vrot.lane.b32.xlu1 %v6384_v37, %s7076_s18 }
 0xf4a   : > { %3013 = vrot.lane.b32.xlu0 %v6388_v32, %s7076_s18 }
 0xf4c   : > { %3015 = vrot.lane.b32.xlu1 %v6386_v17, %s7076_s18 }
 0xf4e   : > { %3017 = vrot.lane.b32.xlu0 %v6390_v28, %s7076_s18 }
 0xf50   : > { %3027 = vrot.lane.b32.xlu1 %v6384_v37, %s7077_s20 }
 0xf52   : > { %3029 = vrot.lane.b32.xlu0 %v6388_v32, %s7077_s20 }
 0xf54   : > { %3031 = vrot.lane.b32.xlu1 %v6386_v17, %s7077_s20 }
 0xf56   : > { %3033 = vrot.lane.b32.xlu0 %v6390_v28, %s7077_s20 }
 0xf58   : > { %3043 = vrot.lane.b32.xlu1 %v6384_v37, %s7078_s23 }
 0xf5a   : > { %3045 = vrot.lane.b32.xlu0 %v6388_v32, %s7078_s23 }
 0xf5c   : > { %3047 = vrot.lane.b32.xlu1 %v6386_v17, %s7078_s23 }
 0xf5e   : > { %3049 = vrot.lane.b32.xlu0 %v6390_v28, %s7078_s23 }
 0xf60   : > { %3059 = vrot.lane.b32.xlu1 %v6384_v37, %s7079_s21 }
 0xf62   : > { %3061 = vrot.lane.b32.xlu0 %v6388_v32, %s7079_s21  ;;  %v7106_v32 = vld [vmem:[#allocation22_spill] sm:$0xff] }
 0xf64   : > { %3063 = vrot.lane.b32.xlu1 %v6386_v17, %s7079_s21 }
 0xf66   : > { %3065 = vrot.lane.b32.xlu0 %v6390_v28, %s7079_s21 }
 0xf68   : > { %3091 = vrot.lane.b32.xlu1 %v7065_v19, %s7075_s17 }
 0xf6a   : > { %3093 = vrot.lane.b32.xlu0 %v7066_v57, %s7075_s17 }
 0xf6c   : > { %3099 = vrot.lane.b32.xlu1 %v7065_v19, %s3866_s27 }
 0xf6e   : > { %3101 = vrot.lane.b32.xlu0 %v7066_v57, %s3866_s27 }
 0xf70   : > { %3109 = vrot.lane.b32.xlu1 %v7065_v19, %s7077_s20 }
 0xf72   : > { %3111 = vrot.lane.b32.xlu0 %v7066_v57, %s7077_s20 }
 0xf74   : > { %3153 = vperm.xlu1 %3750, %v3150_v49  }
 0xf9a   : > { %v2948_v12 = vpop.permute.xlu1 %2947 }
 0xf9c   : > { %v2950_v62 = vpop.permute.xlu0 %2949 }
 0xf9e   : > { %v2952_v30 = vpop.permute.xlu1 %2951 }
 0xf9f   : > { %v2955_v10 = vsel %vm7080_vm11, %v2948_v12, %v2952_v30  ;;  %v2957_v15 = vsel %vm7081_vm12, %v2952_v30, %v2948_v12  ;;  %vm7104_vm11 = vmmov %vm7102_vm9 }
 0xfa0   : > { %v2954_v24 = vpop.permute.xlu0 %2953  ;;  %v2959_v63 = vmul.f32 %v2957_v15, %v7084_v2  ;;  %v2960_v54 = vmul.f32 %v2955_v10, %v7085_v46  ;;  %vm7105_vm12 = vmmov %vm7102_vm9 }
 0xfa1   : > { %v2956_v25 = vsel %vm7082_vm13, %v2950_v62, %v2954_v24  ;;  %v2958_v51 = vsel %vm7083_vm14, %v2954_v24, %v2950_v62  ;;  %vm7108_vm13 = vcmp.lt.s32.totalorder %v4026_v8, 112 }
 0xfa2   : > { %v2961_v40 = vmul.f32 %v2958_v51, %v7084_v2  ;;  %v2962_v29 = vmul.f32 %v2956_v25, %v7085_v46  ;;  %v2964_v50 = vpop.permute.xlu1 %2963  ;;  %v7094_v51 = vld [vmem:[#allocation17_spill] sm:$0xff]  ;;  %vm7109_vm14 = vmmov %vm7108_vm13 }
 0xfa4   : > { %v3121_v42 = vpack.c.bf16 %v2961_v40, %v2959_v63  ;;  %v2966_v55 = vpop.permute.xlu0 %2965  ;;  %v3122_v4 = vpack.c.bf16 %v2962_v29, %v2960_v54  ;;  %v7095_v54 = vld [vmem:[#allocation15_spill] sm:$0xff] }
 0xfa6   : > { %3172 = vmatprep.subr.bf16.mxu1 %v3122_v4  ;;  %v2968_v43 = vpop.permute.xlu1 %2967 }
 0xfa7   : > { %v2971_v36 = vsel %vm259_vm1, %v2964_v50, %v2968_v43  ;;  %v2973_v20 = vsel %vm259_vm1, %v2968_v43, %v2964_v50  ;;  %3173 = vmatpush1.bf16.msra.mxu1 %v3121_v42 }
 0xfa8   : > { %v2970_v13 = vpop.permute.xlu0 %2969  ;;  %v2975_v52 = vmul.f32 %v2973_v20, %v7086_v21  ;;  %v2976_v0 = vmul.f32 %v2971_v36, %v7087_v44 }
 0xfa9   : > { %v2972_v39 = vsel %vm259_vm1, %v2966_v55, %v2970_v13  ;;  %v2974_v60 = vsel %vm259_vm1, %v2970_v13, %v2966_v55 }
 0xfaa   : > { %v2977_v34 = vmul.f32 %v2974_v60, %v7086_v21  ;;  %v2978_v5 = vmul.f32 %v2972_v39, %v7087_v44  ;;  %v2980_v27 = vpop.permute.xlu1 %2979 }
 0xfac   : > { %v3123_v31 = vpack.c.bf16 %v2977_v34, %v2975_v52  ;;  %v2982_v47 = vpop.permute.xlu0 %2981  ;;  %v3124_v7 = vpack.c.bf16 %v2978_v5, %v2976_v0  ;;  %v7100_v0 = vld [vmem:[#allocation19_spill] sm:$0xff]  ;;  %v7101_v5 = vld [vmem:[#allocation18_spill] sm:$0xff] }
 0xfae   : > { %3174 = vmatprep.subr.bf16.mxu1 %v3124_v7  ;;  %v2984_v18 = vpop.permute.xlu1 %2983 }
 0xfaf   : > { %v2987_v22 = vsel %vm7088_vm15, %v2980_v27, %v2984_v18  ;;  %v2989_v38 = vsel %vm7089_vm0, %v2984_v18, %v2980_v27  ;;  %3175 = vmatpush1.bf16.msra.mxu1 %v3123_v31  ;;  %vm7110_vm15 = vmmov %vm7108_vm13 }
 0xfb0   : > { %v2986_v26 = vpop.permute.xlu0 %2985  ;;  %v2991_v11 = vmul.f32 %v2989_v38, %v7092_v56  ;;  %v2992_v23 = vmul.f32 %v2987_v22, %v7093_v53  ;;  %vm7111_vm0 = vmmov %vm7108_vm13 }
 0xfb1   : > { %v2988_v59 = vsel %vm7090_vm2, %v2982_v47, %v2986_v26  ;;  %v2990_v48 = vsel %vm7091_vm4, %v2986_v26, %v2982_v47  ;;  %vm7114_vm2 = vcmp.lt.s32.totalorder %v4026_v8, 111 }
 0xfb2   : > { %v2993_v45 = vmul.f32 %v2990_v48, %v7092_v56  ;;  %v2994_v61 = vmul.f32 %v2988_v59, %v7093_v53  ;;  %v2996_v3 = vpop.permute.xlu1 %2995  ;;  %v7107_v48 = vld [vmem:[#allocation20_spill] sm:$0xff]  ;;  %vm7115_vm4 = vmmov %vm7114_vm2 }
 0xfb4   : > { %v3125_v49 = vpack.c.bf16 %v2993_v45, %v2991_v11  ;;  %v2998_v6 = vpop.permute.xlu0 %2997  ;;  %v3126_v12 = vpack.c.bf16 %v2994_v61, %v2992_v23 }
 0xfb6   : > { %3176 = vmatprep.subr.bf16.mxu1 %v3126_v12  ;;  %v3000_v62 = vpop.permute.xlu1 %2999 }
 0xfb7   : > { %v3003_v30 = vsel %vm303_vm3, %v2996_v3, %v3000_v62  ;;  %v3005_v10 = vsel %vm303_vm3, %v3000_v62, %v2996_v3  ;;  %3177 = vmatpush1.bf16.msra.mxu1 %v3125_v49 }
 0xfb8   : > { %v3002_v15 = vpop.permute.xlu0 %3001  ;;  %v3007_v63 = vmul.f32 %v3005_v10, %v7094_v51  ;;  %v3008_v40 = vmul.f32 %v3003_v30, %v7095_v54 }
 0xfb9   : > { %v3004_v24 = vsel %vm303_vm3, %v2998_v6, %v3002_v15  ;;  %v3006_v25 = vsel %vm303_vm3, %v3002_v15, %v2998_v6 }
 0xfba   : > { %v3009_v29 = vmul.f32 %v3006_v25, %v7094_v51  ;;  %v3010_v50 = vmul.f32 %v3004_v24, %v7095_v54  ;;  %v3012_v42 = vpop.permute.xlu1 %3011  ;;  %v7112_v25 = vld [vmem:[#allocation23_spill] sm:$0xff] }
 0xfbc   : > { %v3127_v55 = vpack.c.bf16 %v3009_v29, %v3007_v63  ;;  %v3014_v4 = vpop.permute.xlu0 %3013  ;;  %v3128_v43 = vpack.c.bf16 %v3010_v50, %v3008_v40  ;;  %v7113_v40 = vld [vmem:[#allocation21_spill] sm:$0xff] }
 0xfbe   : > { %3178 = vmatprep.subr.bf16.mxu1 %v3128_v43  ;;  %v3016_v36 = vpop.permute.xlu1 %3015 }
 0xfbf   : > { %v3019_v20 = vsel %vm7096_vm5, %v3012_v42, %v3016_v36  ;;  %v3021_v13 = vsel %vm7097_vm6, %v3016_v36, %v3012_v42  ;;  %3179 = vmatpush1.bf16.msra.mxu1 %v3127_v55  ;;  %vm7116_vm5 = vmmov %vm7114_vm2 }
 0xfc0   : > { %v3018_v39 = vpop.permute.xlu0 %3017  ;;  %3180 = vmatprep.subr.bf16.mxu1 %v3130_v1  ;;  %v3023_v34 = vmul.f32 %v3019_v20, %v7100_v0  ;;  %v3024_v27 = vmul.f32 %v3021_v13, %v7101_v5  ;;  %v3087_v20 = vsel %vm259_vm1, %v6487_v16, %v6489_v14  ;;  %vm7117_vm6 = vmmov %vm7114_vm2 }
 0xfc1   : > { %v3020_v60 = vsel %vm7098_vm7, %v3014_v4, %v3018_v39  ;;  %v3022_v52 = vsel %vm7099_vm8, %v3018_v39, %v3014_v4  ;;  %vm7120_vm7 = vcmp.lt.s32.totalorder %v4026_v8, 15 }
 0xfc2   : > { %v3025_v31 = vmul.f32 %v3020_v60, %v7100_v0  ;;  %v3026_v47 = vmul.f32 %v3022_v52, %v7101_v5  ;;  %v3028_v7 = vpop.permute.xlu1 %3027  ;;  %vm7121_vm8 = vmmov %vm7120_vm7 }
 0xfc3   : > { %3181 = vmatpush1.bf16.msra.mxu1 %v3129_v58 }
 0xfc4   : > { %v3131_v17 = vpack.c.bf16 %v3025_v31, %v3023_v34  ;;  %v3030_v28 = vpop.permute.xlu0 %3029  ;;  %v3132_v1 = vpack.c.bf16 %v3026_v47, %v3024_v27  ;;  %v3088_v34 = vsel %vm259_vm1, %v6489_v14, %v6487_v16  ;;  %v3090_v27 = vmul.f32 %v3087_v20, %v7087_v44 }
 0xfc5   : > { %v3082_v16 = vmul.f32 %v6396_v9, %v7085_v46  ;;  %v7122_v9 = vld [vmem:[#allocation29_spill] sm:$0xff] }
 0xfc6   : > { %v3032_v18 = vpop.permute.xlu1 %3031  ;;  %3182 = vmatprep.subr.bf16.mxu1 %v3132_v1 }
 0xfc7   : > { %v3035_v22 = vsel %vm7102_vm9, %v3028_v7, %v3032_v18  ;;  %v3037_v38 = vsel %vm7103_vm10, %v3032_v18, %v3028_v7  ;;  %3183 = vmatpush1.bf16.msra.mxu1 %v3131_v17  ;;  %v7118_v7 = vld [vmem:[#allocation25_spill] sm:$0xff]  ;;  %vm7124_vm10 = vmmov %vm7102_vm9 }
 0xfc8   : > { %v3034_v26 = vpop.permute.xlu0 %3033  ;;  %v3039_v58 = vmul.f32 %v3035_v22, %v7106_v32  ;;  %v3040_v11 = vmul.f32 %v3037_v38, %v7107_v48 }
 0xfc9   : > { %v3036_v59 = vsel %vm7104_vm11, %v3030_v28, %v3034_v26  ;;  %v3038_v37 = vsel %vm7105_vm12, %v3034_v26, %v3030_v28  ;;  %v7119_v28 = vld [vmem:[#allocation24_spill] sm:$0xff]  ;;  %vm7129_vm11 = vcmask 1043456  }
 0xfca   : > { %v3041_v23 = vmul.f32 %v3036_v59, %v7106_v32  ;;  %v3042_v45 = vmul.f32 %v3038_v37, %v7107_v48  ;;  %v3044_v61 = vpop.permute.xlu1 %3043  ;;  %v3089_v37 = vmul.f32 %v3088_v34, %v7086_v21  ;;  %v7126_v34 = vld [vmem:[#allocation32_spill] sm:$0xff]  ;;  %vm7130_vm12 = vmmov %vm7129_vm11 }
 0xfcc   : > { %v3133_v3 = vpack.c.bf16 %v3041_v23, %v3039_v58  ;;  %v3046_v49 = vpop.permute.xlu0 %3045  ;;  %v3134_v6 = vpack.c.bf16 %v3042_v45, %v3040_v11  ;;  %v3140_v11 = vpack.c.bf16 %v3090_v27, %v3082_v16  ;;  %v3081_v23 = vmul.f32 %v6400_v35, %v7084_v2 }
 0xfcd   : > { %v3119_v27 = vmul.f32 %v7126_v34, %v7118_v7  ;;  %v3618_v16 = vcombine.low %v6483_v41, %v6483_v41  ;;  %v3290_v41 = vld [vmem:[%s6817_s3 + $0x98] sm:$0xff] }
 0xfce   : > { %v3048_v12 = vpop.permute.xlu1 %3047  ;;  %3184 = vmatprep.subr.bf16.mxu1 %v3134_v6  ;;  %v3139_v6 = vpack.c.bf16 %v3089_v37, %v3081_v23 }
 0xfcf   : > { %v3051_v62 = vsel %vm7108_vm13, %v3044_v61, %v3048_v12  ;;  %v3053_v30 = vsel %vm7109_vm14, %v3048_v12, %v3044_v61  ;;  %3185 = vmatpush1.bf16.msra.mxu1 %v3133_v3  ;;  %vm7131_vm13 = vcmp.lt.s32.totalorder %v4026_v8, 17 }
 0xfd0   : > { %v3050_v10 = vpop.permute.xlu0 %3049  ;;  %v3055_v63 = vmul.f32 %v3051_v62, %v7112_v25  ;;  %v3056_v29 = vmul.f32 %v3053_v30, %v7113_v40  ;;  %vm7132_vm14 = vmmov %vm7131_vm13 }
 0xfd1   : > { %v3052_v15 = vsel %vm7110_vm15, %v3046_v49, %v3050_v10  ;;  %v3054_v24 = vsel %vm7111_vm0, %v3050_v10, %v3046_v49  ;;  %v3108_v49 = vmul.f32 %v7122_v9, %v7101_v5  ;;  %vm7133_vm15 = vmmov %vm7120_vm7 }
 0xfd2   : > { %v3057_v50 = vmul.f32 %v3052_v15, %v7112_v25  ;;  %v3058_v42 = vmul.f32 %v3054_v24, %v7113_v40  ;;  %v3060_v55 = vpop.permute.xlu1 %3059  ;;  %vm7134_vm0 = vmmov %vm7120_vm7 }
 0xfd3   : > { %v3144_v20 = vpack.c.bf16 %v3108_v49, %v7066_v57 }
 0xfd4   : > { %v3135_v4 = vpack.c.bf16 %v3057_v50, %v3055_v63  ;;  %v3062_v43 = vpop.permute.xlu0 %3061  ;;  %v3136_v36 = vpack.c.bf16 %v3058_v42, %v3056_v29  ;;  %v7123_v42 = vld [vmem:[#allocation28_spill] sm:$0xff] }
 0xfd6   : > { %v3064_v13 = vpop.permute.xlu1 %3063  ;;  %3186 = vmatprep.subr.bf16.mxu1 %v3136_v36 }
 0xfd7   : > { %v3067_v39 = vsel %vm7114_vm2, %v3060_v55, %v3064_v13  ;;  %v3069_v60 = vsel %vm7115_vm4, %v3064_v13, %v3060_v55  ;;  %3187 = vmatpush1.bf16.msra.mxu1 %v3135_v4  ;;  %v3107_v55 = vmul.f32 %v7123_v42, %v7100_v0  ;;  %v7125_v13 = vld [vmem:[#allocation31_spill] sm:$0xff]  ;;  %vm7135_vm2 = vcmp.lt.s32.totalorder %v4026_v8, 127 }
 0xfd8   : > { %v3066_v52 = vpop.permute.xlu0 %3065  ;;  %v3071_v17 = vmul.f32 %v3067_v39, %v7118_v7  ;;  %v3072_v1 = vmul.f32 %v3069_v60, %v7119_v28  ;;  %v3118_v39 = vmul.f32 %v7125_v13, %v7113_v40  ;;  %vm7136_vm4 = vmmov %vm7135_vm2 }
 0xfd9   : > { %v3068_v31 = vsel %vm7116_vm5, %v3062_v43, %v3066_v52  ;;  %v3070_v47 = vsel %vm7117_vm6, %v3066_v52, %v3062_v43  ;;  %v3143_v60 = vpack.c.bf16 %v3107_v55, %v7065_v19  ;;  %vm7137_vm5 = vmmov %vm7102_vm9 }
 0xfda   : > { %v3073_v18 = vmul.f32 %v3068_v31, %v7118_v7  ;;  %v3074_v22 = vmul.f32 %v3070_v47, %v7119_v28  ;;  %v3092_v38 = vpop.permute.xlu1 %3091  ;;  %v7127_v31 = vld [vmem:[#allocation33_spill] sm:$0xff]  ;;  %vm7138_vm6 = vmmov %vm7137_vm5 }
 0xfdb   : > { %v3120_v47 = vmul.f32 %v7127_v31, %v7119_v28 }
 0xfdc   : > { %v3137_v14 = vpack.c.bf16 %v3073_v18, %v3071_v17  ;;  %v3094_v26 = vpop.permute.xlu0 %3093  ;;  %v3138_v59 = vpack.c.bf16 %v3074_v22, %v3072_v1  ;;  %v7128_v1 = vld [vmem:[#allocation30_spill] sm:$0xff]  ;;  %v3147_v22 = vpack.c.bf16 %v3119_v27, %v3119_v27 }
 0xfdd   : > { %v3095_v45 = vsel %vm7120_vm7, %v3092_v38, %v3094_v26  ;;  %v3096_v61 = vsel %vm7121_vm8, %v3094_v26, %v3092_v38  ;;  %v3117_v18 = vmul.f32 %v7128_v1, %v7112_v25  ;;  %v3148_v38 = vpack.c.bf16 %v3120_v47, %v3120_v47 }
 0xfde   : > { %v3100_v58 = vpop.permute.xlu1 %3099  ;;  %3188 = vmatprep.subr.bf16.mxu1 %v3138_v59  ;;  %v3097_v35 = vmul.f32 %v3096_v61, %v7092_v56  ;;  %v3098_v30 = vmul.f32 %v3095_v45, %v7093_v53  ;;  %v3167_v19 = vsel %vm7130_vm12, %v3147_v22, 0  ;;  %vm7139_vm7 = vcmp.lt.s32.totalorder %v4026_v8, 112  ;;  %vm7143_vm12 = vmmov %vm7129_vm11 }
 0xfdf   : > { %3189 = vmatpush1.bf16.msra.mxu1 %v3137_v14  ;;  %vm7140_vm8 = vmmov %vm7139_vm7 }
 0xfe0   : > { %v3102_v3 = vpop.permute.xlu0 %3101  ;;  %3190 = vmatprep.subr.bf16.mxu1 %v3140_v11 }
 0xfe1   : > { %v3103_v12 = vsel %vm303_vm3, %v3100_v58, %v3102_v3  ;;  %v3104_v62 = vsel %vm303_vm3, %v3102_v3, %v3100_v58 }
 0xfe2   : > { %v3105_v10 = vmul.f32 %v3104_v62, %v7094_v51  ;;  %v3106_v15 = vmul.f32 %v3103_v12, %v7095_v54  ;;  %v3110_v63 = vpop.permute.xlu1 %3109 }
 0xfe3   : > { %3191 = vmatpush1.bf16.msra.mxu1 %v3139_v6 }
 0xfe4   : > { %v3141_v24 = vpack.c.bf16 %v3105_v10, %v3097_v35  ;;  %v3112_v29 = vpop.permute.xlu0 %3111  ;;  %v3142_v50 = vpack.c.bf16 %v3106_v15, %v3098_v30 }
 0xfe5   : > { %v3114_v4 = vsel %vm7102_vm9, %v3112_v29, %v3110_v63  ;;  %v3113_v43 = vsel %vm7124_vm10, %v3110_v63, %v3112_v29  ;;  %vm7141_vm9 = vcmp.lt.s32.totalorder %v4026_v8, 111 }
 0xfe6   : > { %v3116_v36 = vmul.f32 %v3114_v4, %v7107_v48  ;;  %3192 = vmatprep.subr.bf16.mxu1 %v3142_v50  ;;  %v3115_v52 = vmul.f32 %v3113_v43, %v7106_v32  ;;  %vm7142_vm10 = vmmov %vm7141_vm9 }
 0xfe7   : > { %3193 = vmatpush1.bf16.msra.mxu1 %v3141_v24 }
 0xfe8   : > { %3194 = vmatprep.subr.bf16.mxu1 %v3144_v20  ;;  %v3146_v17 = vpack.c.bf16 %v3118_v39, %v3116_v36  ;;  %v3145_v57 = vpack.c.bf16 %v3117_v18, %v3115_v52 }
 0xfeb   : > { %3195 = vmatpush1.bf16.msra.mxu1 %v3143_v60 }
 0xfec   : > { %3196 = vmatprep.subr.bf16.mxu1 %v3146_v17 }
 0xfef   : > { %3197 = vmatpush1.bf16.msra.mxu1 %v3145_v57 }
 0xff0   : > { %3620 = vmatprep.subr.msk.bf16.mxu1 %vm7129_vm11, %v3148_v38 }
 0xff3   : > { %3199 = vmatpush1.bf16.msra.mxu1 %v3167_v19  ;;  %v3154_v14 = vpop.permute.xlu1 %3153 }
 0xff6   : > { %3205 = vmatmul.mubr.bf16.vlgmr.msra.gmra.mrb[20].mxu1 %v3618_v16 }
0x10c9   : > { %v3206_v26 = vpop.f32.mrb[20].mxu1 }
0x10ca   : > { %v3207_v59 = vadd.f32 %v3206_v26, %v3154_v14  ;;  %v3208_v37 = vpop.f32.mrb[21].mxu1 }
0x10cb   : > { %v3209_v58 = vadd.f32 %v3208_v37, %v3154_v14  ;;  %v3210_v11 = vpop.f32.mrb[22].mxu1 }
0x10cc   : > { %v6643_v23 = vmax.f32 %v3207_v59, 0.0  ;;  %v3211_v45 = vpop.f32.mrb[23].mxu1 }
0x10cd   : > { %v3214_v61 = vmax.f32 %v3209_v58, 0.0 }
0x10ce   : > { %3215 = vrot.lane.b32.xlu0 %v6643_v23, %s3865_s26 }
0x10cf   : > { %3217 = vrot.lane.b32.xlu1 %v3214_v61, %s3865_s26 }
0x10d2   : > { %3223 = vrot.lane.b32.xlu0 %v6643_v23, %s3867_s28 }
0x10d3   : > { %3225 = vrot.lane.b32.xlu1 %v3214_v61, %s3867_s28 }
0x10d6   : > { %3231 = vrot.lane.b32.xlu0 %v6643_v23, %s7075_s17 }
0x10d7   : > { %3233 = vrot.lane.b32.xlu1 %v3214_v61, %s7075_s17 }
0x10da   : > { %3239 = vrot.lane.b32.xlu0 %v6643_v23, %s3866_s27 }
0x10db   : > { %3241 = vrot.lane.b32.xlu1 %v3214_v61, %s3866_s27 }
0x10de   : > { %3247 = vrot.lane.b32.xlu0 %v6643_v23, %s7076_s18 }
0x10df   : > { %3249 = vrot.lane.b32.xlu1 %v3214_v61, %s7076_s18 }
0x10e2   : > { %3255 = vrot.lane.b32.xlu0 %v6643_v23, %s7077_s20 }
0x10e3   : > { %3257 = vrot.lane.b32.xlu1 %v3214_v61, %s7077_s20 }
0x10e6   : > { %3263 = vrot.lane.b32.xlu0 %v6643_v23, %s7078_s23 }
0x10e7   : > { %3265 = vrot.lane.b32.xlu1 %v3214_v61, %s7078_s23 }
0x10ea   : > { %3271 = vrot.lane.b32.xlu0 %v6643_v23, %s7079_s21 }
0x10eb   : > { %3273 = vrot.lane.b32.xlu1 %v3214_v61, %s7079_s21 }
0x10ee   : > { %3293 = vperm.xlu0 %3749, %v3290_v41  }
0x1140   : > { %v3216_v3 = vpop.permute.xlu0 %3215 }
0x1141   : > { %v3218_v9 = vpop.permute.xlu1 %3217 }
0x1142   : > { %v3219_v49 = vsel %vm7131_vm13, %v3216_v3, %v3218_v9  ;;  %v3220_v6 = vsel %vm7132_vm14, %v3218_v9, %v3216_v3  ;;  %vm7144_vm13 = vcmask 588800  }
0x1143   : > { %v3221_v10 = vmul.f32 %v3220_v6, %v7084_v2  ;;  %v3222_v15 = vmul.f32 %v3219_v49, %v7085_v46 }
0x1144   : > { %v3224_v12 = vpop.permute.xlu0 %3223 }
0x1145   : > { %v3226_v62 = vpop.permute.xlu1 %3225 }
0x1146   : > { %v3227_v35 = vsel %vm259_vm1, %v3224_v12, %v3226_v62  ;;  %v3228_v30 = vsel %vm259_vm1, %v3226_v62, %v3224_v12 }
0x1147   : > { %v3229_v24 = vmul.f32 %v3228_v30, %v7086_v21  ;;  %v3230_v63 = vmul.f32 %v3227_v35, %v7087_v44 }
0x1148   : > { %v3232_v29 = vpop.permute.xlu0 %3231 }
0x1149   : > { %v3279_v50 = vpack.c.bf16 %v3229_v24, %v3221_v10  ;;  %v3234_v42 = vpop.permute.xlu1 %3233  ;;  %v3280_v55 = vpack.c.bf16 %v3230_v63, %v3222_v15 }
0x114a   : > { %v3235_v4 = vsel %vm7133_vm15, %v3232_v29, %v3234_v42  ;;  %v3236_v43 = vsel %vm7134_vm0, %v3234_v42, %v3232_v29  ;;  %vm7145_vm15 = vmmov %vm7132_vm14 }
0x114b   : > { %3305 = vmatprep.subr.bf16.mxu0 %v3280_v55  ;;  %v3237_v60 = vmul.f32 %v3236_v43, %v7092_v56  ;;  %v3238_v52 = vmul.f32 %v3235_v4, %v7093_v53 }
0x114c   : > { %3306 = vmatpush1.bf16.msra.mxu0 %v3279_v50  ;;  %v3240_v36 = vpop.permute.xlu0 %3239  ;;  %v3289_v50 = vld [vmem:[#allocation4 + $0x130] sm:$0xf] }
0x114d   : > { %v3242_v20 = vpop.permute.xlu1 %3241 }
0x114e   : > { %v3243_v13 = vsel %vm303_vm3, %v3240_v36, %v3242_v20  ;;  %v3244_v39 = vsel %vm303_vm3, %v3242_v20, %v3240_v36 }
0x114f   : > { %v3245_v34 = vmul.f32 %v3244_v39, %v7094_v51  ;;  %v3246_v27 = vmul.f32 %v3243_v13, %v7095_v54 }
0x1150   : > { %v3248_v31 = vpop.permute.xlu0 %3247 }
0x1151   : > { %v3281_v47 = vpack.c.bf16 %v3245_v34, %v3237_v60  ;;  %v3250_v17 = vpop.permute.xlu1 %3249  ;;  %v3282_v1 = vpack.c.bf16 %v3246_v27, %v3238_v52 }
0x1152   : > { %v3251_v18 = vsel %vm7135_vm2, %v3248_v31, %v3250_v17  ;;  %v3252_v57 = vsel %vm7136_vm4, %v3250_v17, %v3248_v31  ;;  %vm7146_vm2 = vmmov %vm7134_vm0 }
0x1153   : > { %v3253_v22 = vmul.f32 %v3251_v18, %v7100_v0  ;;  %v3254_v38 = vmul.f32 %v3252_v57, %v7101_v5  ;;  %3307 = vmatprep.subr.bf16.mxu0 %v3282_v1 }
0x1154   : > { %3308 = vmatpush1.bf16.msra.mxu0 %v3281_v47  ;;  %v3256_v19 = vpop.permute.xlu0 %3255 }
0x1155   : > { %v3283_v16 = vpack.c.bf16 %v3253_v22, %v6643_v23  ;;  %v3258_v14 = vpop.permute.xlu1 %3257  ;;  %v3284_v26 = vpack.c.bf16 %v3254_v38, %v3214_v61 }
0x1156   : > { %v3259_v59 = vsel %vm7137_vm5, %v3256_v19, %v3258_v14  ;;  %v3260_v37 = vsel %vm7138_vm6, %v3258_v14, %v3256_v19  ;;  %vm7151_vm6 = vmmov %vm7139_vm7 }
0x1157   : > { %3309 = vmatprep.subr.bf16.mxu0 %v3284_v26  ;;  %v3261_v23 = vmul.f32 %v3259_v59, %v7106_v32  ;;  %v3262_v61 = vmul.f32 %v3260_v37, %v7107_v48 }
0x1158   : > { %3310 = vmatpush1.bf16.msra.mxu0 %v3283_v16  ;;  %v3264_v58 = vpop.permute.xlu0 %3263 }
0x1159   : > { %v3266_v11 = vpop.permute.xlu1 %3265 }
0x115a   : > { %v3267_v45 = vsel %vm7139_vm7, %v3264_v58, %v3266_v11  ;;  %v3268_v41 = vsel %vm7140_vm8, %v3266_v11, %v3264_v58  ;;  %vm7152_vm7 = vmmov %vm7151_vm6 }
0x115b   : > { %v3269_v3 = vmul.f32 %v3267_v45, %v7112_v25  ;;  %v3270_v9 = vmul.f32 %v3268_v41, %v7113_v40  ;;  %vm7153_vm8 = vmmov %vm7141_vm9 }
0x115c   : > { %v3272_v49 = vpop.permute.xlu0 %3271 }
0x115d   : > { %v3285_v6 = vpack.c.bf16 %v3269_v3, %v3261_v23  ;;  %v3274_v12 = vpop.permute.xlu1 %3273  ;;  %v3286_v62 = vpack.c.bf16 %v3270_v9, %v3262_v61 }
0x115e   : > { %v3275_v35 = vsel %vm7141_vm9, %v3272_v49, %v3274_v12  ;;  %v3276_v30 = vsel %vm7142_vm10, %v3274_v12, %v3272_v49  ;;  %vm7154_vm9 = vmmov %vm7153_vm8 }
0x115f   : > { %v3277_v10 = vmul.f32 %v3275_v35, %v7118_v7  ;;  %v3278_v15 = vmul.f32 %v3276_v30, %v7119_v28  ;;  %3311 = vmatprep.subr.bf16.mxu0 %v3286_v62  ;;  %vm7155_vm10 = vmmov %vm7129_vm11 }
0x1160   : > { %3312 = vmatpush1.bf16.msra.mxu0 %v3285_v6 }
0x1161   : > { %v3287_v24 = vpack.c.bf16 %v3277_v10, %v3277_v10  ;;  %v3288_v63 = vpack.c.bf16 %v3278_v15, %v3278_v15 }
0x1163   : > { %3622 = vmatprep.subr.msk.bf16.mxu0 %vm7129_vm11, %v3288_v63  ;;  %v3300_v29 = vsel %vm7143_vm12, %v3287_v24, 0  ;;  %vm7156_vm11 = vmmov %vm7155_vm10 }
0x1164   : > { %3314 = vmatpush1.bf16.msra.mxu0 %v3300_v29  ;;  %vm7157_vm12 = vmmov %vm7144_vm13 }
0x1167   : > { %3623 = vmatmul.mubr.msk.bf16.vlgmr.msra.gmra.mrb[20].mxu0 %vm7144_vm13, %v3289_v50 }
0x1168   : > { %3470 = vmatprep.mubr.bf16.mxu0 %v7064_v33  ;;  %v3423_v33 = vld [vmem:[%s6817_s3 + $0xa0] sm:$0x7] }
0x116d   : > { %v3294_v42 = vpop.permute.xlu0 %3293 }
0x123a   : > { %v3339_v55 = vpop.f32.mrb[20].mxu0 }
0x123b   : > { %v3340_v4 = vadd.f32 %v3339_v55, %v3294_v42  ;;  %v3341_v43 = vpop.f32.mrb[21].mxu0 }
0x123c   : > { %v3342_v36 = vadd.f32 %v3341_v43, %v3294_v42  ;;  %v3343_v20 = vpop.f32.mrb[22].mxu0 }
0x123d   : > { %v6725_v13 = vmax.f32 %v3340_v4, 0.0  ;;  %v3344_v39 = vpop.f32.mrb[23].mxu0 }
0x123e   : > { %v3347_v60 = vmax.f32 %v3342_v36, 0.0 }
0x123f   : > { %3348 = vrot.lane.b32.xlu1 %v6725_v13, %s3865_s26 }
0x1240   : > { %3350 = vrot.lane.b32.xlu0 %v3347_v60, %s3865_s26 }
0x1243   : > { %3356 = vrot.lane.b32.xlu1 %v6725_v13, %s3867_s28 }
0x1244   : > { %3358 = vrot.lane.b32.xlu0 %v3347_v60, %s3867_s28  ;;  %s7158_s28 = sshll.u32 %s7160_s16, 3 }
0x1245   : > { %s227_s22 = scalar_lea.vmem %s6818_s4, %s7158_s28 }
0x1247   : > { %3364 = vrot.lane.b32.xlu1 %v6725_v13, %s7075_s17 }
0x1248   : > { %3366 = vrot.lane.b32.xlu0 %v3347_v60, %s7075_s17 }
0x124b   : > { %3372 = vrot.lane.b32.xlu1 %v6725_v13, %s3866_s27 }
0x124c   : > { %3374 = vrot.lane.b32.xlu0 %v3347_v60, %s3866_s27 }
0x124f   : > { %3380 = vrot.lane.b32.xlu1 %v6725_v13, %s7076_s18 }
0x1250   : > { %3382 = vrot.lane.b32.xlu0 %v3347_v60, %s7076_s18 }
0x1253   : > { %3388 = vrot.lane.b32.xlu1 %v6725_v13, %s7077_s20 }
0x1254   : > { %3390 = vrot.lane.b32.xlu0 %v3347_v60, %s7077_s20 }
0x1257   : > { %3396 = vrot.lane.b32.xlu1 %v6725_v13, %s7078_s23 }
0x1258   : > { %3398 = vrot.lane.b32.xlu0 %v3347_v60, %s7078_s23 }
0x125b   : > { %3404 = vrot.lane.b32.xlu1 %v6725_v13, %s7079_s21 }
0x125c   : > { %3406 = vrot.lane.b32.xlu0 %v3347_v60, %s7079_s21 }
0x125f   : > { %3426 = vperm.xlu1 %3750, %v3423_v33  }
0x12b1   : > { %v3349_v52 = vpop.permute.xlu1 %3348 }
0x12b2   : > { %v3351_v34 = vpop.permute.xlu0 %3350 }
0x12b3   : > { %v3352_v27 = vsel %vm7132_vm14, %v3349_v52, %v3351_v34  ;;  %v3353_v31 = vsel %vm7145_vm15, %v3351_v34, %v3349_v52 }
0x12b4   : > { %v3354_v57 = vmul.f32 %v3353_v31, %v7084_v2  ;;  %v3355_v22 = vmul.f32 %v3352_v27, %v7085_v46 }
0x12b5   : > { %v3357_v47 = vpop.permute.xlu1 %3356 }
0x12b6   : > { %v3359_v17 = vpop.permute.xlu0 %3358 }
0x12b7   : > { %v3360_v1 = vsel %vm259_vm1, %v3357_v47, %v3359_v17  ;;  %v3361_v18 = vsel %vm259_vm1, %v3359_v17, %v3357_v47  ;;  %vm7147_vm1 = vmmov %vm7136_vm4 }
0x12b8   : > { %v3362_v38 = vmul.f32 %v3361_v18, %v7086_v21  ;;  %v3363_v19 = vmul.f32 %v3360_v1, %v7087_v44  ;;  %vm7148_vm4 = vmmov %vm7147_vm1 }
0x12b9   : > { %v3365_v16 = vpop.permute.xlu1 %3364 }
0x12ba   : > { %v3412_v14 = vpack.c.bf16 %v3362_v38, %v3354_v57  ;;  %v3367_v26 = vpop.permute.xlu0 %3366  ;;  %v3413_v59 = vpack.c.bf16 %v3363_v19, %v3355_v22 }
0x12bb   : > { %v3368_v37 = vsel %vm7134_vm0, %v3365_v16, %v3367_v26  ;;  %v3369_v58 = vsel %vm7146_vm2, %v3367_v26, %v3365_v16 }
0x12bc   : > { %3438 = vmatprep.subr.bf16.mxu0 %v3413_v59  ;;  %v3370_v44 = vmul.f32 %v3369_v58, %v7092_v56  ;;  %v3371_v45 = vmul.f32 %v3368_v37, %v7093_v53 }
0x12bd   : > { %3439 = vmatpush1.bf16.msra.mxu0 %v3412_v14  ;;  %v3373_v11 = vpop.permute.xlu1 %3372 }
0x12be   : > { %v3375_v2 = vpop.permute.xlu0 %3374 }
0x12bf   : > { %v3376_v46 = vsel %vm303_vm3, %v3373_v11, %v3375_v2  ;;  %v3377_v21 = vsel %vm303_vm3, %v3375_v2, %v3373_v11  ;;  %vm7149_vm3 = vmmov %vm7137_vm5 }
0x12c0   : > { %v3378_v41 = vmul.f32 %v3377_v21, %v7094_v51  ;;  %v3379_v23 = vmul.f32 %v3376_v46, %v7095_v54  ;;  %vm7150_vm5 = vmmov %vm7149_vm3 }
0x12c1   : > { %v3381_v61 = vpop.permute.xlu1 %3380 }
0x12c2   : > { %v3414_v3 = vpack.c.bf16 %v3378_v41, %v3370_v44  ;;  %v3383_v9 = vpop.permute.xlu0 %3382  ;;  %v3415_v49 = vpack.c.bf16 %v3379_v23, %v3371_v45 }
0x12c3   : > { %v3384_v6 = vsel %vm7147_vm1, %v3381_v61, %v3383_v9  ;;  %v3385_v12 = vsel %vm7148_vm4, %v3383_v9, %v3381_v61 }
0x12c4   : > { %v3386_v62 = vmul.f32 %v3384_v6, %v7100_v0  ;;  %v3387_v56 = vmul.f32 %v3385_v12, %v7101_v5  ;;  %3440 = vmatprep.subr.bf16.mxu0 %v3415_v49 }
0x12c5   : > { %3441 = vmatpush1.bf16.msra.mxu0 %v3414_v3  ;;  %v3389_v53 = vpop.permute.xlu1 %3388 }
0x12c6   : > { %v3416_v51 = vpack.c.bf16 %v3386_v62, %v6725_v13  ;;  %v3391_v54 = vpop.permute.xlu0 %3390  ;;  %v3417_v35 = vpack.c.bf16 %v3387_v56, %v3347_v60  ;;  %v3422_v60 = vld [vmem:[#allocation4 + $0x140] sm:$0x3] }
0x12c7   : > { %v3392_v30 = vsel %vm7149_vm3, %v3389_v53, %v3391_v54  ;;  %v3393_v10 = vsel %vm7150_vm5, %v3391_v54, %v3389_v53 }
0x12c8   : > { %3442 = vmatprep.subr.bf16.mxu0 %v3417_v35  ;;  %v3394_v63 = vmul.f32 %v3392_v30, %v7106_v32  ;;  %v3395_v29 = vmul.f32 %v3393_v10, %v7107_v48 }
0x12c9   : > { %3443 = vmatpush1.bf16.msra.mxu0 %v3416_v51  ;;  %v3397_v15 = vpop.permute.xlu1 %3396 }
0x12ca   : > { %v3399_v24 = vpop.permute.xlu0 %3398 }
0x12cb   : > { %v3400_v0 = vsel %vm7151_vm6, %v3397_v15, %v3399_v24  ;;  %v3401_v5 = vsel %vm7152_vm7, %v3399_v24, %v3397_v15 }
0x12cc   : > { %v3402_v50 = vmul.f32 %v3400_v0, %v7112_v25  ;;  %v3403_v42 = vmul.f32 %v3401_v5, %v7113_v40 }
0x12cd   : > { %v3405_v55 = vpop.permute.xlu1 %3404 }
0x12ce   : > { %v3418_v4 = vpack.c.bf16 %v3402_v50, %v3394_v63  ;;  %v3407_v43 = vpop.permute.xlu0 %3406  ;;  %v3419_v36 = vpack.c.bf16 %v3403_v42, %v3395_v29 }
0x12cf   : > { %v3408_v20 = vsel %vm7153_vm8, %v3405_v55, %v3407_v43  ;;  %v3409_v13 = vsel %vm7154_vm9, %v3407_v43, %v3405_v55 }
0x12d0   : > { %v3410_v39 = vmul.f32 %v3408_v20, %v7118_v7  ;;  %v3411_v32 = vmul.f32 %v3409_v13, %v7119_v28  ;;  %3444 = vmatprep.subr.bf16.mxu0 %v3419_v36 }
0x12d1   : > { %3445 = vmatpush1.bf16.msra.mxu0 %v3418_v4 }
0x12d2   : > { %v3420_v48 = vpack.c.bf16 %v3410_v39, %v3410_v39  ;;  %v3421_v25 = vpack.c.bf16 %v3411_v32, %v3411_v32 }
0x12d4   : > { %3624 = vmatprep.subr.msk.bf16.mxu0 %vm7155_vm10, %v3421_v25  ;;  %v3433_v40 = vsel %vm7156_vm11, %v3420_v48, 0 }
0x12d5   : > { %3447 = vmatpush1.bf16.msra.mxu0 %v3433_v40 }
0x12d8   : > { %3625 = vmatmul.mubr.msk.bf16.vlgmr.msra.gmra.mrb[24].mxu0 %vm7157_vm12, %v3422_v60 }
0x12de   : > { %v3427_v33 = vpop.permute.xlu1 %3426 }
0x13ab   : > { %v3472_v52 = vpop.f32.mrb[24].mxu0 }
0x13ac   : > { %v3473_v8 = vadd.f32 %v3472_v52, %v3427_v33  ;;  %v3474_v34 = vpop.f32.mrb[25].mxu0 }
0x13ad   : > { %v3475_v7 = vadd.f32 %v3474_v34, %v3427_v33  ;;  %v3476_v27 = vpop.f32.mrb[26].mxu0 }
0x13ae   : > { %v3626_v28 = vmul.f32 -1.442695, %v3473_v8  ;;  %v3477_v31 = vpop.f32.mrb[27].mxu0 }
0x13af   : > { %v3627_v47 = vmul.f32 -1.442695, %v3475_v7 }
0x13b0   : > { %3780 = vpow2.f32 %v3626_v28 }
0x13b1   : > { %3782 = vpow2.f32 %v3627_v47 }
0x13ba   : > { %v3781_v17 = vpop.eup %3780 }
0x13bb   : > { %v3783_v1 = vpop.eup %3782  ;;  %v3485_v18 = vadd.f32 1.0, %v3781_v17 }
0x13bc   : > { %v3486_v57 = vadd.f32 1.0, %v3783_v1 }
0x13bd   : > { %3784 = vrcp.f32 %v3485_v18 }
0x13be   : > { %3786 = vrcp.f32 %v3486_v57 }
0x13c7   : > { %v3785_v22 = vpop.eup %3784 }
0x13c8   : > { %v3787_v38 = vpop.eup %3786 }
0x13c9   : > { %v3493_v19 = vcombine.low %v3785_v22, %v3787_v38 }
0x13cb   : > { %3495 = vst [vmem:[%s227_s22] sm:$0x77] %v3493_v19 }
0x13cc PF: > { %s16_s15 = sadd.s32 1, %s3858_s15  }
0x13cd   : > { %p13_p5 = scmp.ge.s32.totalorder %s16_s15, 4  }
0x13cf   :  { %15 = sbr.rel (!%p13_p5) target bundleno = 2 (0x2), region = 106 }
0x13d6   :  { %3517 = vsyncpa [#allocation3], 1 }
0x13d7   :  { %3519 = vsyncpa [#allocation3 + $0x1], 1 }
0x13d8   :  { %3520 = vsyncpa [#allocation5], 1 }

</bundles_post_ra>
